<compile_context>
chip_gen: v6e
topology: v6e:2x2x1
jax: 0.10.0
libtpu: 0.0.40
codegen_flags: <defaults>
</compile_context>

<pallas_src>
import jax
import jax.numpy as jnp
from jax.experimental import pallas as pl
from jax.experimental.pallas import tpu as pltpu

KSIZE = 5
STRIDE = 2
PAD = 2
BN_EPS = 1e-5


def _make_conv_row_kernel(kh, wo, m1):
    """Build a kernel that accumulates `kh` kernel-row matmuls + bias + ReLU."""

    def kernel(slab_ref, w_ref, b_ref, o_ref):
        # slab_ref: (2, 1, Mh, kw*Cin) bf16 — H-parity x flattened (h2, ow) rows
        # w_ref:    (kh, kw*Cin, Cout) bf16 — BN scale pre-folded
        # b_ref:    (1, Cout) f32         — folded conv bias + BN shift
        # o_ref:    (m1, Cout)            — output rows (oh, ow) for one image
        acc = None
        for i in range(kh):                      # static, unrolled
            parity, dh = i % 2, i // 2
            lhs = slab_ref[parity, 0, dh * wo:dh * wo + m1, :]   # (m1, kw*Cin)
            part = jnp.dot(lhs, w_ref[i], preferred_element_type=jnp.float32)
            acc = part if acc is None else acc + part
        y = acc + b_ref[...]
        o_ref[...] = jnp.maximum(y, 0.0).astype(o_ref.dtype)

    return kernel


def conv_bn_relu_block(x, params, out_dtype=jnp.bfloat16):
    """Conv2d(5,5,stride=2,pad=2) + BatchNorm(running stats) + ReLU.

    x: (N, H, W, Cin) NHWC  ->  (N, Ho, Wo, Cout) NHWC.
    """
    w, b, gamma, beta, r_mean, r_var = params    # w: (Cout, Cin, 5, 5) torch layout
    n, h, wd, cin = x.shape
    cout = w.shape[0]
    ho = (h + 2 * PAD - KSIZE) // STRIDE + 1
    wo = (wd + 2 * PAD - KSIZE) // STRIDE + 1
    hp, wp = h + 2 * PAD, wd + 2 * PAD           # even for all layers here
    hph = hp // 2
    mh, m1, kj = hph * wo, ho * wo, KSIZE * cin

    # --- cheap packing in the wrapper (stays bf16, ~2.5x data, ~10 small ops) ---
    xp = jnp.pad(x, ((0, 0), (PAD, PAD), (PAD, PAD), (0, 0)))
    # width taps: xj[n, h, ow, j, c] = xp[n, h, 2*ow + j, c]
    taps = [xp[:, :, j:j + STRIDE * wo:STRIDE, :] for j in range(KSIZE)]
    xj = jnp.stack(taps, axis=3)                             # (N, Hp, Wo, 5, Cin)
    # H-parity split so each kernel row reads a contiguous row range in-kernel
    slab = jnp.stack([xj[:, 0::2], xj[:, 1::2]], axis=0)     # (2, N, Hph, Wo, 5, Cin)
    slab = slab.reshape(2, n, mh, kj).astype(jnp.bfloat16)

    # --- fold BN into weights/bias ---
    scale = gamma / jnp.sqrt(r_var + BN_EPS)                 # (Cout,)
    w_rows = jnp.transpose(w, (2, 3, 1, 0)) * scale          # (kh, kw, Cin, Cout)
    w_rows = w_rows.reshape(KSIZE, kj, cout).astype(jnp.bfloat16)
    bias = ((b - r_mean) * scale + beta).reshape(1, cout).astype(jnp.float32)

    out2d = pl.pallas_call(
        _make_conv_row_kernel(KSIZE, wo, m1),
        out_shape=jax.ShapeDtypeStruct((n * m1, cout), out_dtype),
        grid_spec=pltpu.PrefetchScalarGridSpec(
            num_scalar_prefetch=0,
            grid=(n,),                                       # 2 parallel tiles
            in_specs=[
                pl.BlockSpec((2, 1, mh, kj), lambda i: (0, i, 0, 0)),
                pl.BlockSpec((KSIZE, kj, cout), lambda i: (0, 0, 0)),
                pl.BlockSpec((1, cout), lambda i: (0, 0)),
            ],
            out_specs=pl.BlockSpec((m1, cout), lambda i: (i, 0)),
        ),
        compiler_params=pltpu.CompilerParams(
            dimension_semantics=("parallel",)),
    )(slab, w_rows, bias)

    return out2d.reshape(n, ho, wo, cout)


def dtn_base_forward(x_nchw, params):
    # TODO(synk): training-mode Dropout2d (stochastic channel masks) and
    # batch-stat BatchNorm are not reproduced; eval-mode semantics are used.
    x = jnp.transpose(x_nchw, (0, 2, 3, 1)).astype(jnp.bfloat16)   # NCHW -> NHWC
    x = conv_bn_relu_block(x, params[0], out_dtype=jnp.bfloat16)
    x = conv_bn_relu_block(x, params[1], out_dtype=jnp.bfloat16)
    x = conv_bn_relu_block(x, params[2], out_dtype=jnp.float32)
    # PyTorch flattens NCHW: match its (C, H, W) flatten order.
    x = jnp.transpose(x, (0, 3, 1, 2))
    return x.reshape(x.shape[0], -1)                               # (N, 256*4*4)


def init_params(key):
    def conv_block_params(k, cin, cout, ksize=KSIZE):
        kw, kb, kg = jax.random.split(k, 3)
        fan_in = cin * ksize * ksize
        w = jax.random.normal(kw, (cout, cin, ksize, ksize), jnp.float32) \
            * (1.0 / jnp.sqrt(fan_in))
        b = jax.random.normal(kb, (cout,), jnp.float32) * 0.01
        gamma = 1.0 + 0.1 * jax.random.normal(kg, (cout,), jnp.float32)
        beta = jnp.zeros((cout,), jnp.float32)
        r_mean = jnp.zeros((cout,), jnp.float32)
        r_var = jnp.ones((cout,), jnp.float32)
        return (w, b, gamma, beta, r_mean, r_var)

    k1, k2, k3 = jax.random.split(key, 3)
    return [conv_block_params(k1, 3, 64),
            conv_block_params(k2, 64, 128),
            conv_block_params(k3, 128, 256)]


if __name__ == "__main__":
    key = jax.random.PRNGKey(0)
    kx, kp = jax.random.split(key)
    # DTNBase implies 32x32 inputs (3 stride-2 convs -> 4x4, in_features=256*4*4).
    x = jax.random.normal(kx, (2, 3, 32, 32), jnp.float32)
    params = init_params(kp)
    fwd = jax.jit(dtn_base_forward)
    out = fwd(x, params)
    out = jax.block_until_ready(out)
    assert out.shape == (2, 256 * 4 * 4), out.shape
    print("KERNEL_OK")
</pallas_src>

<mosaic_0001>
module attributes {stable_mosaic.version = 11 : i64} {
  func.func @kernel(%arg0: i32, %arg1: memref<2x1x288x15xbf16, #tpu.memory_space<vmem>>, %arg2: memref<5x15x64xbf16, #tpu.memory_space<vmem>>, %arg3: memref<1x64xf32, #tpu.memory_space<vmem>>, %arg4: memref<256x64xbf16, #tpu.memory_space<vmem>>) attributes {dimension_semantics = [#tpu.dimension_semantics<parallel>], iteration_bounds = array<i64: 2>, scalar_prefetch = 0 : i64, scratch_operands = 0 : i64, tpu.core_type = #tpu.core_type<tc>, window_params = [{transform_indices = @transform_0, window_bounds = array<i64: 2, 1, 288, 15>}, {pipeline_mode = #tpu.pipeline_mode<synchronous>, transform_indices = @transform_1, window_bounds = array<i64: 5, 15, 64>}, {pipeline_mode = #tpu.pipeline_mode<synchronous>, transform_indices = @transform_2, window_bounds = array<i64: 1, 64>}, {transform_indices = @transform_3, window_bounds = array<i64: 256, 64>}]} {
    %c0 = arith.constant 0 : index
    %c0_0 = arith.constant 0 : index
    %c0_1 = arith.constant 0 : index
    %c0_2 = arith.constant 0 : index
    %0 = vector.load %arg1[%c0, %c0_0, %c0_1, %c0_2] : memref<2x1x288x15xbf16, #tpu.memory_space<vmem>>, vector<1x1x256x15xbf16>
    %1 = vector.shape_cast %0 : vector<1x1x256x15xbf16> to vector<256x15xbf16>
    %c0_3 = arith.constant 0 : index
    %c0_4 = arith.constant 0 : index
    %c0_5 = arith.constant 0 : index
    %2 = vector.load %arg2[%c0_3, %c0_4, %c0_5] : memref<5x15x64xbf16, #tpu.memory_space<vmem>>, vector<1x15x64xbf16>
    %3 = vector.shape_cast %2 : vector<1x15x64xbf16> to vector<15x64xbf16>
    %cst = arith.constant dense<0.000000e+00> : vector<256x64xf32>
    %4 = tpu.matmul %1, %3, %cst {dimension_numbers = #tpu.dot_dimension_numbers<[1], [0], [0], [1], [0, 0, 1, 1], [], []>} : vector<256x15xbf16>, vector<15x64xbf16>, vector<256x64xf32> -> vector<256x64xf32>
    %c1 = arith.constant 1 : index
    %c0_6 = arith.constant 0 : index
    %c0_7 = arith.constant 0 : index
    %c0_8 = arith.constant 0 : index
    %5 = vector.load %arg1[%c1, %c0_6, %c0_7, %c0_8] : memref<2x1x288x15xbf16, #tpu.memory_space<vmem>>, vector<1x1x256x15xbf16>
    %6 = vector.shape_cast %5 : vector<1x1x256x15xbf16> to vector<256x15xbf16>
    %c1_9 = arith.constant 1 : index
    %c0_10 = arith.constant 0 : index
    %c0_11 = arith.constant 0 : index
    %7 = vector.load %arg2[%c1_9, %c0_10, %c0_11] : memref<5x15x64xbf16, #tpu.memory_space<vmem>>, vector<1x15x64xbf16>
    %8 = vector.shape_cast %7 : vector<1x15x64xbf16> to vector<15x64xbf16>
    %cst_12 = arith.constant dense<0.000000e+00> : vector<256x64xf32>
    %9 = tpu.matmul %6, %8, %cst_12 {dimension_numbers = #tpu.dot_dimension_numbers<[1], [0], [0], [1], [0, 0, 1, 1], [], []>} : vector<256x15xbf16>, vector<15x64xbf16>, vector<256x64xf32> -> vector<256x64xf32>
    %10 = arith.addf %4, %9 : vector<256x64xf32>
    %c0_13 = arith.constant 0 : index
    %c0_14 = arith.constant 0 : index
    %c16 = arith.constant 16 : index
    %c0_15 = arith.constant 0 : index
    %11 = vector.load %arg1[%c0_13, %c0_14, %c16, %c0_15] : memref<2x1x288x15xbf16, #tpu.memory_space<vmem>>, vector<1x1x256x15xbf16>
    %12 = vector.shape_cast %11 : vector<1x1x256x15xbf16> to vector<256x15xbf16>
    %c2 = arith.constant 2 : index
    %c0_16 = arith.constant 0 : index
    %c0_17 = arith.constant 0 : index
    %13 = vector.load %arg2[%c2, %c0_16, %c0_17] : memref<5x15x64xbf16, #tpu.memory_space<vmem>>, vector<1x15x64xbf16>
    %14 = vector.shape_cast %13 : vector<1x15x64xbf16> to vector<15x64xbf16>
    %cst_18 = arith.constant dense<0.000000e+00> : vector<256x64xf32>
    %15 = tpu.matmul %12, %14, %cst_18 {dimension_numbers = #tpu.dot_dimension_numbers<[1], [0], [0], [1], [0, 0, 1, 1], [], []>} : vector<256x15xbf16>, vector<15x64xbf16>, vector<256x64xf32> -> vector<256x64xf32>
    %16 = arith.addf %10, %15 : vector<256x64xf32>
    %c1_19 = arith.constant 1 : index
    %c0_20 = arith.constant 0 : index
    %c16_21 = arith.constant 16 : index
    %c0_22 = arith.constant 0 : index
    %17 = vector.load %arg1[%c1_19, %c0_20, %c16_21, %c0_22] : memref<2x1x288x15xbf16, #tpu.memory_space<vmem>>, vector<1x1x256x15xbf16>
    %18 = vector.shape_cast %17 : vector<1x1x256x15xbf16> to vector<256x15xbf16>
    %c3 = arith.constant 3 : index
    %c0_23 = arith.constant 0 : index
    %c0_24 = arith.constant 0 : index
    %19 = vector.load %arg2[%c3, %c0_23, %c0_24] : memref<5x15x64xbf16, #tpu.memory_space<vmem>>, vector<1x15x64xbf16>
    %20 = vector.shape_cast %19 : vector<1x15x64xbf16> to vector<15x64xbf16>
    %cst_25 = arith.constant dense<0.000000e+00> : vector<256x64xf32>
    %21 = tpu.matmul %18, %20, %cst_25 {dimension_numbers = #tpu.dot_dimension_numbers<[1], [0], [0], [1], [0, 0, 1, 1], [], []>} : vector<256x15xbf16>, vector<15x64xbf16>, vector<256x64xf32> -> vector<256x64xf32>
    %22 = arith.addf %16, %21 : vector<256x64xf32>
    %c0_26 = arith.constant 0 : index
    %c0_27 = arith.constant 0 : index
    %c32 = arith.constant 32 : index
    %c0_28 = arith.constant 0 : index
    %23 = vector.load %arg1[%c0_26, %c0_27, %c32, %c0_28] : memref<2x1x288x15xbf16, #tpu.memory_space<vmem>>, vector<1x1x256x15xbf16>
    %24 = vector.shape_cast %23 : vector<1x1x256x15xbf16> to vector<256x15xbf16>
    %c4 = arith.constant 4 : index
    %c0_29 = arith.constant 0 : index
    %c0_30 = arith.constant 0 : index
    %25 = vector.load %arg2[%c4, %c0_29, %c0_30] : memref<5x15x64xbf16, #tpu.memory_space<vmem>>, vector<1x15x64xbf16>
    %26 = vector.shape_cast %25 : vector<1x15x64xbf16> to vector<15x64xbf16>
    %cst_31 = arith.constant dense<0.000000e+00> : vector<256x64xf32>
    %27 = tpu.matmul %24, %26, %cst_31 {dimension_numbers = #tpu.dot_dimension_numbers<[1], [0], [0], [1], [0, 0, 1, 1], [], []>} : vector<256x15xbf16>, vector<15x64xbf16>, vector<256x64xf32> -> vector<256x64xf32>
    %28 = arith.addf %22, %27 : vector<256x64xf32>
    %c0_32 = arith.constant 0 : index
    %c0_33 = arith.constant 0 : index
    %29 = vector.load %arg3[%c0_32, %c0_33] : memref<1x64xf32, #tpu.memory_space<vmem>>, vector<1x64xf32>
    %30 = vector.broadcast %29 : vector<1x64xf32> to vector<256x64xf32>
    %31 = arith.addf %28, %30 : vector<256x64xf32>
    %cst_34 = arith.constant 0.000000e+00 : f32
    %32 = vector.broadcast %cst_34 : f32 to vector<256x64xf32>
    %33 = arith.maximumf %31, %32 : vector<256x64xf32>
    %34 = arith.truncf %33 : vector<256x64xf32> to vector<256x64xbf16>
    %c0_35 = arith.constant 0 : index
    %c0_36 = arith.constant 0 : index
    %35 = vector.load %arg4[%c0_35, %c0_36] : memref<256x64xbf16, #tpu.memory_space<vmem>>, vector<256x64xbf16>
    tpu.vector_store %arg4[%c0_35, %c0_36], %34 {strides = array<i32>} : memref<256x64xbf16, #tpu.memory_space<vmem>>, vector<256x64xbf16>,
    return
  }
  func.func @transform_0(%arg0: i32) -> (i32, i32, i32, i32) {
    %c0_i32 = arith.constant 0 : i32
    %c0_i32_0 = arith.constant 0 : i32
    %c0_i32_1 = arith.constant 0 : i32
    %c0_i32_2 = arith.constant 0 : i32
    return %c0_i32, %arg0, %c0_i32_0, %c0_i32_1 : i32, i32, i32, i32
  }
  func.func @transform_1(%arg0: i32) -> (i32, i32, i32) {
    %c0_i32 = arith.constant 0 : i32
    %c0_i32_0 = arith.constant 0 : i32
    %c0_i32_1 = arith.constant 0 : i32
    %c0_i32_2 = arith.constant 0 : i32
    return %c0_i32, %c0_i32_0, %c0_i32_1 : i32, i32, i32
  }
  func.func @transform_2(%arg0: i32) -> (i32, i32) {
    %c0_i32 = arith.constant 0 : i32
    %c0_i32_0 = arith.constant 0 : i32
    %c0_i32_1 = arith.constant 0 : i32
    return %c0_i32, %c0_i32_0 : i32, i32
  }
  func.func @transform_3(%arg0: i32) -> (i32, i32) {
    %c0_i32 = arith.constant 0 : i32
    %c0_i32_0 = arith.constant 0 : i32
    return %arg0, %c0_i32 : i32, i32
  }
}

module attributes {stable_mosaic.version = 11 : i64} {
  func.func @kernel(%arg0: i32, %arg1: memref<2x1x80x320xbf16, #tpu.memory_space<vmem>>, %arg2: memref<5x320x128xbf16, #tpu.memory_space<vmem>>, %arg3: memref<1x128xf32, #tpu.memory_space<vmem>>, %arg4: memref<64x128xbf16, #tpu.memory_space<vmem>>) attributes {dimension_semantics = [#tpu.dimension_semantics<parallel>], iteration_bounds = array<i64: 2>, scalar_prefetch = 0 : i64, scratch_operands = 0 : i64, tpu.core_type = #tpu.core_type<tc>, window_params = [{transform_indices = @transform_0, window_bounds = array<i64: 2, 1, 80, 320>}, {pipeline_mode = #tpu.pipeline_mode<synchronous>, transform_indices = @transform_1, window_bounds = array<i64: 5, 320, 128>}, {pipeline_mode = #tpu.pipeline_mode<synchronous>, transform_indices = @transform_2, window_bounds = array<i64: 1, 128>}, {transform_indices = @transform_3, window_bounds = array<i64: 64, 128>}]} {
    %c0 = arith.constant 0 : index
    %c0_0 = arith.constant 0 : index
    %c0_1 = arith.constant 0 : index
    %c0_2 = arith.constant 0 : index
    %0 = vector.load %arg1[%c0, %c0_0, %c0_1, %c0_2] : memref<2x1x80x320xbf16, #tpu.memory_space<vmem>>, vector<1x1x64x320xbf16>
    %1 = vector.shape_cast %0 : vector<1x1x64x320xbf16> to vector<64x320xbf16>
    %c0_3 = arith.constant 0 : index
    %c0_4 = arith.constant 0 : index
    %c0_5 = arith.constant 0 : index
    %2 = vector.load %arg2[%c0_3, %c0_4, %c0_5] : memref<5x320x128xbf16, #tpu.memory_space<vmem>>, vector<1x320x128xbf16>
    %3 = vector.shape_cast %2 : vector<1x320x128xbf16> to vector<320x128xbf16>
    %cst = arith.constant dense<0.000000e+00> : vector<64x128xf32>
    %4 = tpu.matmul %1, %3, %cst {dimension_numbers = #tpu.dot_dimension_numbers<[1], [0], [0], [1], [0, 0, 1, 1], [], []>} : vector<64x320xbf16>, vector<320x128xbf16>, vector<64x128xf32> -> vector<64x128xf32>
    %c1 = arith.constant 1 : index
    %c0_6 = arith.constant 0 : index
    %c0_7 = arith.constant 0 : index
    %c0_8 = arith.constant 0 : index
    %5 = vector.load %arg1[%c1, %c0_6, %c0_7, %c0_8] : memref<2x1x80x320xbf16, #tpu.memory_space<vmem>>, vector<1x1x64x320xbf16>
    %6 = vector.shape_cast %5 : vector<1x1x64x320xbf16> to vector<64x320xbf16>
    %c1_9 = arith.constant 1 : index
    %c0_10 = arith.constant 0 : index
    %c0_11 = arith.constant 0 : index
    %7 = vector.load %arg2[%c1_9, %c0_10, %c0_11] : memref<5x320x128xbf16, #tpu.memory_space<vmem>>, vector<1x320x128xbf16>
    %8 = vector.shape_cast %7 : vector<1x320x128xbf16> to vector<320x128xbf16>
    %cst_12 = arith.constant dense<0.000000e+00> : vector<64x128xf32>
    %9 = tpu.matmul %6, %8, %cst_12 {dimension_numbers = #tpu.dot_dimension_numbers<[1], [0], [0], [1], [0, 0, 1, 1], [], []>} : vector<64x320xbf16>, vector<320x128xbf16>, vector<64x128xf32> -> vector<64x128xf32>
    %10 = arith.addf %4, %9 : vector<64x128xf32>
    %c0_13 = arith.constant 0 : index
    %c0_14 = arith.constant 0 : index
    %c8 = arith.constant 8 : index
    %c0_15 = arith.constant 0 : index
    %11 = vector.load %arg1[%c0_13, %c0_14, %c8, %c0_15] : memref<2x1x80x320xbf16, #tpu.memory_space<vmem>>, vector<1x1x64x320xbf16>
    %12 = vector.shape_cast %11 : vector<1x1x64x320xbf16> to vector<64x320xbf16>
    %c2 = arith.constant 2 : index
    %c0_16 = arith.constant 0 : index
    %c0_17 = arith.constant 0 : index
    %13 = vector.load %arg2[%c2, %c0_16, %c0_17] : memref<5x320x128xbf16, #tpu.memory_space<vmem>>, vector<1x320x128xbf16>
    %14 = vector.shape_cast %13 : vector<1x320x128xbf16> to vector<320x128xbf16>
    %cst_18 = arith.constant dense<0.000000e+00> : vector<64x128xf32>
    %15 = tpu.matmul %12, %14, %cst_18 {dimension_numbers = #tpu.dot_dimension_numbers<[1], [0], [0], [1], [0, 0, 1, 1], [], []>} : vector<64x320xbf16>, vector<320x128xbf16>, vector<64x128xf32> -> vector<64x128xf32>
    %16 = arith.addf %10, %15 : vector<64x128xf32>
    %c1_19 = arith.constant 1 : index
    %c0_20 = arith.constant 0 : index
    %c8_21 = arith.constant 8 : index
    %c0_22 = arith.constant 0 : index
    %17 = vector.load %arg1[%c1_19, %c0_20, %c8_21, %c0_22] : memref<2x1x80x320xbf16, #tpu.memory_space<vmem>>, vector<1x1x64x320xbf16>
    %18 = vector.shape_cast %17 : vector<1x1x64x320xbf16> to vector<64x320xbf16>
    %c3 = arith.constant 3 : index
    %c0_23 = arith.constant 0 : index
    %c0_24 = arith.constant 0 : index
    %19 = vector.load %arg2[%c3, %c0_23, %c0_24] : memref<5x320x128xbf16, #tpu.memory_space<vmem>>, vector<1x320x128xbf16>
    %20 = vector.shape_cast %19 : vector<1x320x128xbf16> to vector<320x128xbf16>
    %cst_25 = arith.constant dense<0.000000e+00> : vector<64x128xf32>
    %21 = tpu.matmul %18, %20, %cst_25 {dimension_numbers = #tpu.dot_dimension_numbers<[1], [0], [0], [1], [0, 0, 1, 1], [], []>} : vector<64x320xbf16>, vector<320x128xbf16>, vector<64x128xf32> -> vector<64x128xf32>
    %22 = arith.addf %16, %21 : vector<64x128xf32>
    %c0_26 = arith.constant 0 : index
    %c0_27 = arith.constant 0 : index
    %c16 = arith.constant 16 : index
    %c0_28 = arith.constant 0 : index
    %23 = vector.load %arg1[%c0_26, %c0_27, %c16, %c0_28] : memref<2x1x80x320xbf16, #tpu.memory_space<vmem>>, vector<1x1x64x320xbf16>
    %24 = vector.shape_cast %23 : vector<1x1x64x320xbf16> to vector<64x320xbf16>
    %c4 = arith.constant 4 : index
    %c0_29 = arith.constant 0 : index
    %c0_30 = arith.constant 0 : index
    %25 = vector.load %arg2[%c4, %c0_29, %c0_30] : memref<5x320x128xbf16, #tpu.memory_space<vmem>>, vector<1x320x128xbf16>
    %26 = vector.shape_cast %25 : vector<1x320x128xbf16> to vector<320x128xbf16>
    %cst_31 = arith.constant dense<0.000000e+00> : vector<64x128xf32>
    %27 = tpu.matmul %24, %26, %cst_31 {dimension_numbers = #tpu.dot_dimension_numbers<[1], [0], [0], [1], [0, 0, 1, 1], [], []>} : vector<64x320xbf16>, vector<320x128xbf16>, vector<64x128xf32> -> vector<64x128xf32>
    %28 = arith.addf %22, %27 : vector<64x128xf32>
    %c0_32 = arith.constant 0 : index
    %c0_33 = arith.constant 0 : index
    %29 = vector.load %arg3[%c0_32, %c0_33] : memref<1x128xf32, #tpu.memory_space<vmem>>, vector<1x128xf32>
    %30 = vector.broadcast %29 : vector<1x128xf32> to vector<64x128xf32>
    %31 = arith.addf %28, %30 : vector<64x128xf32>
    %cst_34 = arith.constant 0.000000e+00 : f32
    %32 = vector.broadcast %cst_34 : f32 to vector<64x128xf32>
    %33 = arith.maximumf %31, %32 : vector<64x128xf32>
    %34 = arith.truncf %33 : vector<64x128xf32> to vector<64x128xbf16>
    %c0_35 = arith.constant 0 : index
    %c0_36 = arith.constant 0 : index
    %35 = vector.load %arg4[%c0_35, %c0_36] : memref<64x128xbf16, #tpu.memory_space<vmem>>, vector<64x128xbf16>
    tpu.vector_store %arg4[%c0_35, %c0_36], %34 {strides = array<i32>} : memref<64x128xbf16, #tpu.memory_space<vmem>>, vector<64x128xbf16>,
    return
  }
  func.func @transform_0(%arg0: i32) -> (i32, i32, i32, i32) {
    %c0_i32 = arith.constant 0 : i32
    %c0_i32_0 = arith.constant 0 : i32
    %c0_i32_1 = arith.constant 0 : i32
    %c0_i32_2 = arith.constant 0 : i32
    return %c0_i32, %arg0, %c0_i32_0, %c0_i32_1 : i32, i32, i32, i32
  }
  func.func @transform_1(%arg0: i32) -> (i32, i32, i32) {
    %c0_i32 = arith.constant 0 : i32
    %c0_i32_0 = arith.constant 0 : i32
    %c0_i32_1 = arith.constant 0 : i32
    %c0_i32_2 = arith.constant 0 : i32
    return %c0_i32, %c0_i32_0, %c0_i32_1 : i32, i32, i32
  }
  func.func @transform_2(%arg0: i32) -> (i32, i32) {
    %c0_i32 = arith.constant 0 : i32
    %c0_i32_0 = arith.constant 0 : i32
    %c0_i32_1 = arith.constant 0 : i32
    return %c0_i32, %c0_i32_0 : i32, i32
  }
  func.func @transform_3(%arg0: i32) -> (i32, i32) {
    %c0_i32 = arith.constant 0 : i32
    %c0_i32_0 = arith.constant 0 : i32
    return %arg0, %c0_i32 : i32, i32
  }
}

module attributes {stable_mosaic.version = 11 : i64} {
  func.func @kernel(%arg0: i32, %arg1: memref<2x1x24x640xbf16, #tpu.memory_space<vmem>>, %arg2: memref<5x640x256xbf16, #tpu.memory_space<vmem>>, %arg3: memref<1x256xf32, #tpu.memory_space<vmem>>, %arg4: memref<16x256xf32, #tpu.memory_space<vmem>>) attributes {dimension_semantics = [#tpu.dimension_semantics<parallel>], iteration_bounds = array<i64: 2>, scalar_prefetch = 0 : i64, scratch_operands = 0 : i64, tpu.core_type = #tpu.core_type<tc>, window_params = [{transform_indices = @transform_0, window_bounds = array<i64: 2, 1, 24, 640>}, {pipeline_mode = #tpu.pipeline_mode<synchronous>, transform_indices = @transform_1, window_bounds = array<i64: 5, 640, 256>}, {pipeline_mode = #tpu.pipeline_mode<synchronous>, transform_indices = @transform_2, window_bounds = array<i64: 1, 256>}, {transform_indices = @transform_3, window_bounds = array<i64: 16, 256>}]} {
    %c0 = arith.constant 0 : index
    %c0_0 = arith.constant 0 : index
    %c0_1 = arith.constant 0 : index
    %c0_2 = arith.constant 0 : index
    %0 = vector.load %arg1[%c0, %c0_0, %c0_1, %c0_2] : memref<2x1x24x640xbf16, #tpu.memory_space<vmem>>, vector<1x1x16x640xbf16>
    %1 = vector.shape_cast %0 : vector<1x1x16x640xbf16> to vector<16x640xbf16>
    %c0_3 = arith.constant 0 : index
    %c0_4 = arith.constant 0 : index
    %c0_5 = arith.constant 0 : index
    %2 = vector.load %arg2[%c0_3, %c0_4, %c0_5] : memref<5x640x256xbf16, #tpu.memory_space<vmem>>, vector<1x640x256xbf16>
    %3 = vector.shape_cast %2 : vector<1x640x256xbf16> to vector<640x256xbf16>
    %cst = arith.constant dense<0.000000e+00> : vector<16x256xf32>
    %4 = tpu.matmul %1, %3, %cst {dimension_numbers = #tpu.dot_dimension_numbers<[1], [0], [0], [1], [0, 0, 1, 1], [], []>} : vector<16x640xbf16>, vector<640x256xbf16>, vector<16x256xf32> -> vector<16x256xf32>
    %c1 = arith.constant 1 : index
    %c0_6 = arith.constant 0 : index
    %c0_7 = arith.constant 0 : index
    %c0_8 = arith.constant 0 : index
    %5 = vector.load %arg1[%c1, %c0_6, %c0_7, %c0_8] : memref<2x1x24x640xbf16, #tpu.memory_space<vmem>>, vector<1x1x16x640xbf16>
    %6 = vector.shape_cast %5 : vector<1x1x16x640xbf16> to vector<16x640xbf16>
    %c1_9 = arith.constant 1 : index
    %c0_10 = arith.constant 0 : index
    %c0_11 = arith.constant 0 : index
    %7 = vector.load %arg2[%c1_9, %c0_10, %c0_11] : memref<5x640x256xbf16, #tpu.memory_space<vmem>>, vector<1x640x256xbf16>
    %8 = vector.shape_cast %7 : vector<1x640x256xbf16> to vector<640x256xbf16>
    %cst_12 = arith.constant dense<0.000000e+00> : vector<16x256xf32>
    %9 = tpu.matmul %6, %8, %cst_12 {dimension_numbers = #tpu.dot_dimension_numbers<[1], [0], [0], [1], [0, 0, 1, 1], [], []>} : vector<16x640xbf16>, vector<640x256xbf16>, vector<16x256xf32> -> vector<16x256xf32>
    %10 = arith.addf %4, %9 : vector<16x256xf32>
    %c0_13 = arith.constant 0 : index
    %c0_14 = arith.constant 0 : index
    %c4 = arith.constant 4 : index
    %c0_15 = arith.constant 0 : index
    %11 = vector.load %arg1[%c0_13, %c0_14, %c4, %c0_15] : memref<2x1x24x640xbf16, #tpu.memory_space<vmem>>, vector<1x1x16x640xbf16>
    %12 = vector.shape_cast %11 : vector<1x1x16x640xbf16> to vector<16x640xbf16>
    %c2 = arith.constant 2 : index
    %c0_16 = arith.constant 0 : index
    %c0_17 = arith.constant 0 : index
    %13 = vector.load %arg2[%c2, %c0_16, %c0_17] : memref<5x640x256xbf16, #tpu.memory_space<vmem>>, vector<1x640x256xbf16>
    %14 = vector.shape_cast %13 : vector<1x640x256xbf16> to vector<640x256xbf16>
    %cst_18 = arith.constant dense<0.000000e+00> : vector<16x256xf32>
    %15 = tpu.matmul %12, %14, %cst_18 {dimension_numbers = #tpu.dot_dimension_numbers<[1], [0], [0], [1], [0, 0, 1, 1], [], []>} : vector<16x640xbf16>, vector<640x256xbf16>, vector<16x256xf32> -> vector<16x256xf32>
    %16 = arith.addf %10, %15 : vector<16x256xf32>
    %c1_19 = arith.constant 1 : index
    %c0_20 = arith.constant 0 : index
    %c4_21 = arith.constant 4 : index
    %c0_22 = arith.constant 0 : index
    %17 = vector.load %arg1[%c1_19, %c0_20, %c4_21, %c0_22] : memref<2x1x24x640xbf16, #tpu.memory_space<vmem>>, vector<1x1x16x640xbf16>
    %18 = vector.shape_cast %17 : vector<1x1x16x640xbf16> to vector<16x640xbf16>
    %c3 = arith.constant 3 : index
    %c0_23 = arith.constant 0 : index
    %c0_24 = arith.constant 0 : index
    %19 = vector.load %arg2[%c3, %c0_23, %c0_24] : memref<5x640x256xbf16, #tpu.memory_space<vmem>>, vector<1x640x256xbf16>
    %20 = vector.shape_cast %19 : vector<1x640x256xbf16> to vector<640x256xbf16>
    %cst_25 = arith.constant dense<0.000000e+00> : vector<16x256xf32>
    %21 = tpu.matmul %18, %20, %cst_25 {dimension_numbers = #tpu.dot_dimension_numbers<[1], [0], [0], [1], [0, 0, 1, 1], [], []>} : vector<16x640xbf16>, vector<640x256xbf16>, vector<16x256xf32> -> vector<16x256xf32>
    %22 = arith.addf %16, %21 : vector<16x256xf32>
    %c0_26 = arith.constant 0 : index
    %c0_27 = arith.constant 0 : index
    %c8 = arith.constant 8 : index
    %c0_28 = arith.constant 0 : index
    %23 = vector.load %arg1[%c0_26, %c0_27, %c8, %c0_28] : memref<2x1x24x640xbf16, #tpu.memory_space<vmem>>, vector<1x1x16x640xbf16>
    %24 = vector.shape_cast %23 : vector<1x1x16x640xbf16> to vector<16x640xbf16>
    %c4_29 = arith.constant 4 : index
    %c0_30 = arith.constant 0 : index
    %c0_31 = arith.constant 0 : index
    %25 = vector.load %arg2[%c4_29, %c0_30, %c0_31] : memref<5x640x256xbf16, #tpu.memory_space<vmem>>, vector<1x640x256xbf16>
    %26 = vector.shape_cast %25 : vector<1x640x256xbf16> to vector<640x256xbf16>
    %cst_32 = arith.constant dense<0.000000e+00> : vector<16x256xf32>
    %27 = tpu.matmul %24, %26, %cst_32 {dimension_numbers = #tpu.dot_dimension_numbers<[1], [0], [0], [1], [0, 0, 1, 1], [], []>} : vector<16x640xbf16>, vector<640x256xbf16>, vector<16x256xf32> -> vector<16x256xf32>
    %28 = arith.addf %22, %27 : vector<16x256xf32>
    %c0_33 = arith.constant 0 : index
    %c0_34 = arith.constant 0 : index
    %29 = vector.load %arg3[%c0_33, %c0_34] : memref<1x256xf32, #tpu.memory_space<vmem>>, vector<1x256xf32>
    %30 = vector.broadcast %29 : vector<1x256xf32> to vector<16x256xf32>
    %31 = arith.addf %28, %30 : vector<16x256xf32>
    %cst_35 = arith.constant 0.000000e+00 : f32
    %32 = vector.broadcast %cst_35 : f32 to vector<16x256xf32>
    %33 = arith.maximumf %31, %32 : vector<16x256xf32>
    %c0_36 = arith.constant 0 : index
    %c0_37 = arith.constant 0 : index
    %34 = vector.load %arg4[%c0_36, %c0_37] : memref<16x256xf32, #tpu.memory_space<vmem>>, vector<16x256xf32>
    tpu.vector_store %arg4[%c0_36, %c0_37], %33 {strides = array<i32>} : memref<16x256xf32, #tpu.memory_space<vmem>>, vector<16x256xf32>,
    return
  }
  func.func @transform_0(%arg0: i32) -> (i32, i32, i32, i32) {
    %c0_i32 = arith.constant 0 : i32
    %c0_i32_0 = arith.constant 0 : i32
    %c0_i32_1 = arith.constant 0 : i32
    %c0_i32_2 = arith.constant 0 : i32
    return %c0_i32, %arg0, %c0_i32_0, %c0_i32_1 : i32, i32, i32, i32
  }
  func.func @transform_1(%arg0: i32) -> (i32, i32, i32) {
    %c0_i32 = arith.constant 0 : i32
    %c0_i32_0 = arith.constant 0 : i32
    %c0_i32_1 = arith.constant 0 : i32
    %c0_i32_2 = arith.constant 0 : i32
    return %c0_i32, %c0_i32_0, %c0_i32_1 : i32, i32, i32
  }
  func.func @transform_2(%arg0: i32) -> (i32, i32) {
    %c0_i32 = arith.constant 0 : i32
    %c0_i32_0 = arith.constant 0 : i32
    %c0_i32_1 = arith.constant 0 : i32
    return %c0_i32, %c0_i32_0 : i32, i32
  }
  func.func @transform_3(%arg0: i32) -> (i32, i32) {
    %c0_i32 = arith.constant 0 : i32
    %c0_i32_0 = arith.constant 0 : i32
    return %arg0, %c0_i32 : i32, i32
  }
}

</mosaic_0001>

<bundles_post_ra>
// kernel: dtn_base_forward.3
= control target key start
LH: loop header
LB: loop body
LE: loop exit
PB: predicated region body
PF: predicated region fallthrough
CT: control target
= control target key end

     0   :  { %s3283_s12 = smov 0   ;;  %s3285_s13 = smov 0   ;;  %s3973_s0 = inlined_call_operand.vmem [shape: bf16[2,2,288,15], index: 0, kind: input, shape index: {}]   ;;  %s3974_s1 = inlined_call_operand.vmem [shape: bf16[5,15,64], index: 1, kind: input, shape index: {}]   ;;  %s3975_s2 = inlined_call_operand.vmem [shape: f32[1,64], index: 2, kind: input, shape index: {}]   ;;  %s3976_s3 = inlined_call_operand.vmem [shape: bf16[512,64], index: 3, kind: output, shape index: {}]  }
   0x1   :  { %s3287_s14 = smov 0  }
   0x2 LB: > { %s2556_s15 = sadd.s32 4294967295, %s3260_s14   ;;  %s3300_s16 = sadd.s32 1, %s3260_s14   ;;  %s3260_s14 = sphi %s3287_s14, %s4061_s14   ;;  %s3256_s13 = sphi %s3285_s13, %s4060_s13   ;;  %s3252_s12 = sphi %s3283_s12, %s4059_s12  }
   0x3   : > { %s17_s17 = ssub.s32 %s3260_s14, %s3300_s16  ;;  %s20_s18 = sadd.s32 1, %s3256_s13 }
   0x4   : > { %p18_p0 = scmp.eq.s32.totalorder %s17_s17, 0  ;;  %p27_p1 = scmp.ne.s32.totalorder %s3256_s13, %s3252_s12 }
   0x5   : > { %p28_p2 = scmp.eq.s32.totalorder %s3260_s14, 0  ;;  %p2559_p4 = scmp.ge.s32.totalorder %s3260_s14, 2 }
   0x6   : > { %s3309_s19 = scalar_select %p18_p0, %s3256_s13, %s20_s18  }
   0x7   : > { %p29_p3 = por %p28_p2, %p27_p1  ;;  %127 = sbr.rel (%p2559_p4) target bundleno = 35 (0x23), region = 24 }
   0xc   : > { %130 = sbr.rel (!%p29_p3) target bundleno = 35 (0x23), region = 28  ;;  %s132_s20 = sand.u32 (%p29_p3), 1, %s3256_s13  }
   0xd   : > { %s3126_s21 = smul.u32 (%p29_p3), 144, %s3260_s14 }
   0xe   : > { %s3125_s22 = smul.u32 (%p29_p3), 288, %s132_s20 }
   0xf   : > { %s3317_s25 = scalar_lea.vmem (%p29_p3), %s3973_s0, %s3126_s21 }
  0x10   : > { %v154_v0 = vld [vmem:[%s3317_s25] sm:$0xff] (%p29_p3)   ;;  %v158_v1 = vld [vmem:[%s3317_s25 + $0x8] sm:$0xff] (%p29_p3)   ;;  %v162_v2 = vld [vmem:[%s3317_s25 + $0x10] sm:$0xff] (%p29_p3)   ;;  %s3322_s26 = scalar_lea.vmem (%p29_p3), [#allocation2], %s3125_s22 }
  0x11   : > { %155 = vst [vmem:[%s3322_s26] sm:$0xff] %v154_v0   ;;  %159 = vst [vmem:[%s3322_s26 + $0x8] sm:$0xff] %v158_v1   ;;  %v166_v3 = vld [vmem:[%s3317_s25 + $0x18] sm:$0xff]   ;;  %v170_v4 = vld [vmem:[%s3317_s25 + $0x20] sm:$0xff]  }
  0x12   : > { %163 = vst [vmem:[%s3322_s26 + $0x10] sm:$0xff] %v162_v2   ;;  %v174_v5 = vld [vmem:[%s3317_s25 + $0x28] sm:$0xff]   ;;  %167 = vst [vmem:[%s3322_s26 + $0x18] sm:$0xff] %v166_v3   ;;  %v178_v6 = vld [vmem:[%s3317_s25 + $0x30] sm:$0xff]  }
  0x13   : > { %171 = vst [vmem:[%s3322_s26 + $0x20] sm:$0xff] %v170_v4   ;;  %175 = vst [vmem:[%s3322_s26 + $0x28] sm:$0xff] %v174_v5   ;;  %v182_v7 = vld [vmem:[%s3317_s25 + $0x38] sm:$0xff]   ;;  %v186_v8 = vld [vmem:[%s3317_s25 + $0x40] sm:$0xff]  }
  0x14   : > { %179 = vst [vmem:[%s3322_s26 + $0x30] sm:$0xff] %v178_v6   ;;  %183 = vst [vmem:[%s3322_s26 + $0x38] sm:$0xff] %v182_v7   ;;  %v190_v9 = vld [vmem:[%s3317_s25 + $0x48] sm:$0xff]   ;;  %v194_v10 = vld [vmem:[%s3317_s25 + $0x50] sm:$0xff]  }
  0x15   : > { %187 = vst [vmem:[%s3322_s26 + $0x40] sm:$0xff] %v186_v8   ;;  %v198_v11 = vld [vmem:[%s3317_s25 + $0x58] sm:$0xff]   ;;  %191 = vst [vmem:[%s3322_s26 + $0x48] sm:$0xff] %v190_v9   ;;  %v202_v12 = vld [vmem:[%s3317_s25 + $0x60] sm:$0xff]  }
  0x16   : > { %195 = vst [vmem:[%s3322_s26 + $0x50] sm:$0xff] %v194_v10   ;;  %199 = vst [vmem:[%s3322_s26 + $0x58] sm:$0xff] %v198_v11   ;;  %v206_v13 = vld [vmem:[%s3317_s25 + $0x68] sm:$0xff]   ;;  %v210_v14 = vld [vmem:[%s3317_s25 + $0x70] sm:$0xff]  }
  0x17   : > { %203 = vst [vmem:[%s3322_s26 + $0x60] sm:$0xff] %v202_v12   ;;  %207 = vst [vmem:[%s3322_s26 + $0x68] sm:$0xff] %v206_v13   ;;  %v214_v15 = vld [vmem:[%s3317_s25 + $0x78] sm:$0xff]   ;;  %v218_v16 = vld [vmem:[%s3317_s25 + $0x80] sm:$0xff]  }
  0x18   : > { %211 = vst [vmem:[%s3322_s26 + $0x70] sm:$0xff] %v210_v14   ;;  %v222_v17 = vld [vmem:[%s3317_s25 + $0x88] sm:$0xff]   ;;  %215 = vst [vmem:[%s3322_s26 + $0x78] sm:$0xff] %v214_v15   ;;  %v226_v18 = vld [vmem:[%s3317_s25 + $0x120] sm:$0xff]  }
  0x19   : > { %219 = vst [vmem:[%s3322_s26 + $0x80] sm:$0xff] %v218_v16   ;;  %223 = vst [vmem:[%s3322_s26 + $0x88] sm:$0xff] %v222_v17   ;;  %v230_v19 = vld [vmem:[%s3317_s25 + $0x128] sm:$0xff]   ;;  %v234_v20 = vld [vmem:[%s3317_s25 + $0x130] sm:$0xff]  }
  0x1a   : > { %227 = vst [vmem:[%s3322_s26 + $0x90] sm:$0xff] %v226_v18   ;;  %231 = vst [vmem:[%s3322_s26 + $0x98] sm:$0xff] %v230_v19   ;;  %v238_v21 = vld [vmem:[%s3317_s25 + $0x138] sm:$0xff]   ;;  %v242_v22 = vld [vmem:[%s3317_s25 + $0x140] sm:$0xff]  }
  0x1b   : > { %235 = vst [vmem:[%s3322_s26 + $0xa0] sm:$0xff] %v234_v20   ;;  %v246_v23 = vld [vmem:[%s3317_s25 + $0x148] sm:$0xff]   ;;  %239 = vst [vmem:[%s3322_s26 + $0xa8] sm:$0xff] %v238_v21   ;;  %v250_v24 = vld [vmem:[%s3317_s25 + $0x150] sm:$0xff]  }
  0x1c   : > { %243 = vst [vmem:[%s3322_s26 + $0xb0] sm:$0xff] %v242_v22   ;;  %247 = vst [vmem:[%s3322_s26 + $0xb8] sm:$0xff] %v246_v23   ;;  %v254_v25 = vld [vmem:[%s3317_s25 + $0x158] sm:$0xff]   ;;  %v258_v26 = vld [vmem:[%s3317_s25 + $0x160] sm:$0xff]  }
  0x1d   : > { %251 = vst [vmem:[%s3322_s26 + $0xc0] sm:$0xff] %v250_v24   ;;  %255 = vst [vmem:[%s3322_s26 + $0xc8] sm:$0xff] %v254_v25   ;;  %v262_v27 = vld [vmem:[%s3317_s25 + $0x168] sm:$0xff]   ;;  %v266_v28 = vld [vmem:[%s3317_s25 + $0x170] sm:$0xff]  }
  0x1e   : > { %259 = vst [vmem:[%s3322_s26 + $0xd0] sm:$0xff] %v258_v26   ;;  %v270_v29 = vld [vmem:[%s3317_s25 + $0x178] sm:$0xff]   ;;  %263 = vst [vmem:[%s3322_s26 + $0xd8] sm:$0xff] %v262_v27   ;;  %v274_v30 = vld [vmem:[%s3317_s25 + $0x180] sm:$0xff]  }
  0x1f   : > { %267 = vst [vmem:[%s3322_s26 + $0xe0] sm:$0xff] %v266_v28   ;;  %271 = vst [vmem:[%s3322_s26 + $0xe8] sm:$0xff] %v270_v29   ;;  %v278_v31 = vld [vmem:[%s3317_s25 + $0x188] sm:$0xff]   ;;  %v282_v32 = vld [vmem:[%s3317_s25 + $0x190] sm:$0xff]  }
  0x20   : > { %275 = vst [vmem:[%s3322_s26 + $0xf0] sm:$0xff] %v274_v30   ;;  %279 = vst [vmem:[%s3322_s26 + $0xf8] sm:$0xff] %v278_v31   ;;  %v286_v33 = vld [vmem:[%s3317_s25 + $0x198] sm:$0xff]   ;;  %v290_v34 = vld [vmem:[%s3317_s25 + $0x1a0] sm:$0xff]  }
  0x21   : > { %283 = vst [vmem:[%s3322_s26 + $0x100] sm:$0xff] %v282_v32   ;;  %v294_v35 = vld [vmem:[%s3317_s25 + $0x1a8] sm:$0xff]   ;;  %287 = vst [vmem:[%s3322_s26 + $0x108] sm:$0xff] %v286_v33  }
  0x22   : > { %291 = vst [vmem:[%s3322_s26 + $0x110] sm:$0xff] %v290_v34   ;;  %295 = vst [vmem:[%s3322_s26 + $0x118] sm:$0xff] %v294_v35  }
  0x23 PF: > { %p2561_p5 = scmp.ge.s32.totalorder %s3260_s14, 1  ;;  %p464_p6 = scmp.lt.s32.totalorder %s3260_s14, 3 }
  0x25   : > { %p465_p7 = pnand %p2561_p5, %p464_p6 }
  0x27   : > { %468 = sbr.rel (%p465_p7) target bundleno = 415 (0x19f), region = 69 }
  0x2c   : > { %v3153_v36 = vld [vmem:[%s3974_s1 + $0x8] sm:$0xff]   ;;  %vm705_vm0 = vcmask 1046528   ;;  %vm706_vm1 = vcmask 1047552   ;;  %s471_s29 = sand.u32 1, %s3252_s12   ;;  %v3262_v37 = vmov 65535   ;;  %v3158_v39 = vld [vmem:[%s3974_s1] sm:$0xff]  }
  0x2d   : > { %v707_v38 = vsel %vm705_vm0, 4294967295, %v3262_v37  ;;  %s3127_s30 = smul.u32 288, %s471_s29  ;;  %v3159_v40 = vld [vmem:[%s3974_s1 + $0x10] sm:$0xff]   ;;  %v3176_v42 = vld [vmem:[%s3974_s1 + $0x18] sm:$0xff]   ;;  %v3177_v44 = vld [vmem:[%s3974_s1 + $0x20] sm:$0xff]   ;;  %vm656_vm2 = vcmask 121856  }
  0x2e   : > { %v708_v41 = vsel %vm706_vm1, %v707_v38, 0  ;;  %s2562_s17 = sshll.u32 %s2556_s15, 5  ;;  %vm2461_vm3 = vcmask 519168  }
  0x2f   : > { %v710_v43 = vand.u32 %v3153_v36, %v708_v41  ;;  %s3411_s12 = scalar_lea.vmem [#allocation2], %s3127_s30  ;;  %v1007_v46 = vand.u32 %v3158_v39, %v708_v41  ;;  %v1339_v47 = vand.u32 %v3159_v40, %v708_v41  ;;  %v1703_v52 = vand.u32 %v3176_v42, %v708_v41  ;;  %p495_p8 = scmp.lt.s32.totalorder %s2562_s17, 63 }
  0x30   : > { %v3154_v45 = vld [vmem:[%s3411_s12 + $0x90] sm:$0xff]   ;;  %v3156_v49 = vld [vmem:[%s3411_s12 + $0x98] sm:$0xff]   ;;  %v3160_v51 = vld [vmem:[%s3411_s12 + $0xa0] sm:$0xff]   ;;  %v2067_v53 = vand.u32 %v3177_v44, %v708_v41 }
  0x31   : > { %2953 = vmatprep.subr.bf16.mxu0 %v710_v43  ;;  %3123 = vmatprep.subr.bf16.mxu1 %v710_v43  ;;  %v3155_v48 = vld [vmem:[%s3411_s12 + $0xd0] sm:$0xff]   ;;  %v3157_v50 = vld [vmem:[%s3411_s12 + $0xd8] sm:$0xff]   ;;  %v3161_v54 = vld [vmem:[%s3411_s12 + $0xe0] sm:$0xff]   ;;  %s4063_s17 = smov (!%p495_p8, %s2562_s17), 63 }
  0x32   : > { %2954 = vmatpush3.bf16.msra.mxu0 %v710_v43  ;;  %3124 = vmatpush3.bf16.msra.mxu1 %v710_v43  ;;  %v3162_v55 = vld [vmem:[%s3411_s12 + $0xa8] sm:$0xff]   ;;  %v3164_v57 = vld [vmem:[%s3411_s12 + $0xb0] sm:$0xff]   ;;  %v3166_v59 = vld [vmem:[%s3411_s12 + $0xb8] sm:$0xff]   ;;  %s2563_s18 = sshll.u32 %s4063_s17, 2 }
  0x33   : > { %2955 = vmatprep.mubr.msk.bf16.mxu0 %vm656_vm2, %v3154_v45  ;;  %2971 = vmatprep.mubr.msk.bf16.mxu1 %vm656_vm2, %v3155_v48  ;;  %v3163_v56 = vld [vmem:[%s3411_s12 + $0xe8] sm:$0xff]   ;;  %v3165_v58 = vld [vmem:[%s3411_s12 + $0xf0] sm:$0xff]   ;;  %v3167_v60 = vld [vmem:[%s3411_s12 + $0xf8] sm:$0xff]   ;;  %s3793_s22 = scalar_lea.vmem %s3976_s3, %s2563_s18 }
  0x34   : > { %2987 = vmatprep.subr.bf16.mxu1 %v1007_v46  ;;  %3021 = vmatprep.subr.bf16.mxu0 %v1339_v47  ;;  %v3168_v61 = vld [vmem:[%s3411_s12 + $0xc0] sm:$0xff]   ;;  %v3170_v63 = vld [vmem:[%s3411_s12 + $0xc8] sm:$0xff]   ;;  %v3175_v4 = vld [vmem:[%s3411_s12 + $0x10] sm:$0xff]  }
  0x35   : > { %2956 = vmatmul.mubr.msk.bf16.vlgmr.msra.gmra.mxu0 %vm656_vm2, %v3156_v49  ;;  %2972 = vmatmul.mubr.msk.bf16.vlgmr.msra.gmra.mxu1 %vm656_vm2, %v3157_v50  ;;  %v3169_v62 = vld [vmem:[%s3411_s12 + $0x100] sm:$0xff]   ;;  %v3171_v0 = vld [vmem:[%s3411_s12 + $0x108] sm:$0xff]   ;;  %v3178_v5 = vld [vmem:[%s3411_s12 + $0x10] sm:$0xff]  }
  0x36   : > { %2988 = vmatpush3.bf16.msra.mxu1 %v1007_v46  ;;  %3022 = vmatpush3.bf16.msra.mxu0 %v1339_v47  ;;  %v3172_v1 = vld [vmem:[%s3411_s12] sm:$0xff]   ;;  %v3173_v2 = vld [vmem:[%s3411_s12 + $0x8] sm:$0xff]   ;;  %v3179_v6 = vld [vmem:[%s3411_s12 + $0x18] sm:$0xff]  }
  0x37   : > { %2959 = vmatprep.mubr.msk.bf16.mxu0 %vm656_vm2, %v3160_v51  ;;  %2975 = vmatprep.mubr.msk.bf16.mxu1 %vm656_vm2, %v3161_v54  ;;  %v3174_v3 = vld [vmem:[%s3411_s12 + $0x8] sm:$0xff]   ;;  %v3180_v7 = vld [vmem:[%s3411_s12 + $0x18] sm:$0xff]   ;;  %v3181_v8 = vld [vmem:[%s3411_s12 + $0x20] sm:$0xff]  }
  0x38   : > { %3055 = vmatprep.subr.bf16.mxu1 %v1703_v52  ;;  %3089 = vmatprep.subr.bf16.mxu0 %v2067_v53  ;;  %v3182_v9 = vld [vmem:[%s3411_s12 + $0x20] sm:$0xff]   ;;  %v3183_v10 = vld [vmem:[%s3411_s12 + $0x28] sm:$0xff]   ;;  %v3185_v12 = vld [vmem:[%s3411_s12 + $0x30] sm:$0xff]  }
  0x39   : > { %v3184_v11 = vld [vmem:[%s3411_s12 + $0x28] sm:$0xff]   ;;  %v3186_v13 = vld [vmem:[%s3411_s12 + $0x30] sm:$0xff]   ;;  %v3187_v14 = vld [vmem:[%s3411_s12 + $0x38] sm:$0xff]  }
  0x3a   : > { %v3188_v15 = vld [vmem:[%s3411_s12 + $0x38] sm:$0xff]   ;;  %v3189_v16 = vld [vmem:[%s3411_s12 + $0x40] sm:$0xff]   ;;  %v3191_v18 = vld [vmem:[%s3411_s12 + $0x48] sm:$0xff]  }
  0x3b   : > { %v3190_v17 = vld [vmem:[%s3411_s12 + $0x40] sm:$0xff]   ;;  %v3192_v19 = vld [vmem:[%s3411_s12 + $0x48] sm:$0xff]   ;;  %v3193_v20 = vld [vmem:[%s3411_s12 + $0x50] sm:$0xff]  }
  0x3c   : > { %v3194_v21 = vld [vmem:[%s3411_s12 + $0x50] sm:$0xff]   ;;  %v3195_v22 = vld [vmem:[%s3411_s12 + $0x58] sm:$0xff]   ;;  %v3197_v24 = vld [vmem:[%s3411_s12 + $0x60] sm:$0xff]  }
  0x3d   : > { %2960 = vmatmul.mubr.msk.bf16.gmra.mxu0 %vm656_vm2, %v3162_v55  ;;  %2976 = vmatmul.mubr.msk.bf16.gmra.mxu1 %vm656_vm2, %v3163_v56  ;;  %v3196_v23 = vld [vmem:[%s3411_s12 + $0x58] sm:$0xff]   ;;  %v3198_v25 = vld [vmem:[%s3411_s12 + $0x60] sm:$0xff]   ;;  %v3199_v26 = vld [vmem:[%s3411_s12 + $0x68] sm:$0xff]  }
  0x3e   : > { %2963 = vmatprep.mubr.msk.bf16.mxu0 %vm656_vm2, %v3164_v57  ;;  %2979 = vmatprep.mubr.msk.bf16.mxu1 %vm656_vm2, %v3165_v58  ;;  %v3200_v27 = vld [vmem:[%s3411_s12 + $0x68] sm:$0xff]   ;;  %v3201_v28 = vld [vmem:[%s3411_s12 + $0x70] sm:$0xff]   ;;  %v3203_v30 = vld [vmem:[%s3411_s12 + $0x78] sm:$0xff]  }
  0x3f   : > { %v3202_v29 = vld [vmem:[%s3411_s12 + $0x70] sm:$0xff]   ;;  %v3204_v31 = vld [vmem:[%s3411_s12 + $0x78] sm:$0xff]   ;;  %v3205_v32 = vld [vmem:[%s3411_s12 + $0x80] sm:$0xff]  }
  0x40   : > { %v3206_v33 = vld [vmem:[%s3411_s12 + $0x98] sm:$0xff]   ;;  %v3207_v34 = vld [vmem:[%s3411_s12 + $0x10] sm:$0xff]   ;;  %v3208_v35 = vld [vmem:[%s3411_s12 + $0xa0] sm:$0xff]  }
  0x41   : > { %v3209_v36 = vld [vmem:[%s3411_s12 + $0x18] sm:$0xff]   ;;  %v3210_v37 = vld [vmem:[%s3411_s12 + $0xa8] sm:$0xff]   ;;  %v3211_v38 = vld [vmem:[%s3411_s12 + $0x20] sm:$0xff]  }
  0x42   : > { %v3212_v39 = vld [vmem:[%s3411_s12 + $0xb0] sm:$0xff]   ;;  %v3213_v40 = vld [vmem:[%s3411_s12 + $0x28] sm:$0xff]   ;;  %v3214_v41 = vld [vmem:[%s3411_s12 + $0xb8] sm:$0xff]  }
  0x43   : > { %v3215_v42 = vld [vmem:[%s3411_s12 + $0x30] sm:$0xff]   ;;  %v3216_v43 = vld [vmem:[%s3411_s12 + $0xc0] sm:$0xff]   ;;  %v3217_v44 = vld [vmem:[%s3411_s12 + $0x38] sm:$0xff]  }
  0x44   : > { %v3218_v45 = vld [vmem:[%s3411_s12 + $0xc8] sm:$0xff]   ;;  %v3219_v46 = vld [vmem:[%s3411_s12 + $0x40] sm:$0xff]   ;;  %v3220_v47 = vld [vmem:[%s3411_s12 + $0xd0] sm:$0xff]  }
  0x45   : > { %2964 = vmatmul.mubr.msk.bf16.gmra.mxu0 %vm656_vm2, %v3166_v59  ;;  %2980 = vmatmul.mubr.msk.bf16.gmra.mxu1 %vm656_vm2, %v3167_v60  ;;  %v3221_v48 = vld [vmem:[%s3411_s12 + $0x48] sm:$0xff]   ;;  %v3222_v49 = vld [vmem:[%s3411_s12 + $0xd8] sm:$0xff]   ;;  %v3223_v50 = vld [vmem:[%s3411_s12 + $0x50] sm:$0xff]  }
  0x46   : > { %2967 = vmatprep.mubr.msk.bf16.mxu0 %vm656_vm2, %v3168_v61  ;;  %2983 = vmatprep.mubr.msk.bf16.mxu1 %vm656_vm2, %v3169_v62  ;;  %v3224_v51 = vld [vmem:[%s3411_s12 + $0xe0] sm:$0xff]   ;;  %v3228_v55 = vld [vmem:[%s3411_s12 + $0xf0] sm:$0xff]   ;;  %v3229_v56 = vld [vmem:[%s3411_s12 + $0x68] sm:$0xff]  }
  0x47   : > { %v3227_v54 = vld [vmem:[%s3411_s12 + $0x60] sm:$0xff]   ;;  %v3230_v57 = vld [vmem:[%s3411_s12 + $0xf8] sm:$0xff]   ;;  %v3231_v58 = vld [vmem:[%s3411_s12 + $0x70] sm:$0xff]  }
  0x48   : > { %v3232_v59 = vld [vmem:[%s3411_s12 + $0x100] sm:$0xff]   ;;  %v3233_v60 = vld [vmem:[%s3411_s12 + $0x78] sm:$0xff]   ;;  %v3234_v61 = vld [vmem:[%s3411_s12 + $0x108] sm:$0xff]  }
  0x49   : > { %v3235_v62 = vld [vmem:[%s3411_s12 + $0x80] sm:$0xff]  }
  0x4d   : > { %2968 = vmatmul.mubr.msk.bf16.gmra.mxu0 %vm656_vm2, %v3170_v63  ;;  %2984 = vmatmul.mubr.msk.bf16.gmra.mxu1 %vm656_vm2, %v3171_v0  ;;  %v3236_v63 = vld [vmem:[%s3411_s12 + $0x110] sm:$0xff]   ;;  %v3237_v0 = vld [vmem:[%s3411_s12 + $0x88] sm:$0xff]  }
  0x4e   : > { %2989 = vmatprep.mubr.msk.bf16.mxu1 %vm656_vm2, %v3172_v1  ;;  %3023 = vmatprep.mubr.msk.bf16.mxu0 %vm656_vm2, %v3173_v2 }
  0x55   : > { %2990 = vmatmul.mubr.msk.bf16.vlgmr.msra.gmra.mxu1 %vm656_vm2, %v3174_v3  ;;  %3024 = vmatmul.mubr.msk.bf16.vlgmr.msra.gmra.mxu0 %vm656_vm2, %v3175_v4 }
  0x56   : > { %3056 = vmatpush3.bf16.msra.mxu1 %v1703_v52  ;;  %3090 = vmatpush3.bf16.msra.mxu0 %v2067_v53  ;;  %v3225_v52 = vld [vmem:[%s3411_s12 + $0x58] sm:$0xff]   ;;  %v3226_v53 = vld [vmem:[%s3411_s12 + $0xe8] sm:$0xff]  }
  0x57   : > { %2993 = vmatprep.mubr.msk.bf16.mxu1 %vm656_vm2, %v3178_v5  ;;  %3027 = vmatprep.mubr.msk.bf16.mxu0 %vm656_vm2, %v3179_v6 }
  0x5d   : > { %2994 = vmatmul.mubr.msk.bf16.gmra.mxu1 %vm656_vm2, %v3180_v7  ;;  %3028 = vmatmul.mubr.msk.bf16.gmra.mxu0 %vm656_vm2, %v3181_v8 }
  0x5e   : > { %2997 = vmatprep.mubr.msk.bf16.mxu1 %vm656_vm2, %v3182_v9  ;;  %3031 = vmatprep.mubr.msk.bf16.mxu0 %vm656_vm2, %v3183_v10 }
  0x65   : > { %2998 = vmatmul.mubr.msk.bf16.gmra.mxu1 %vm656_vm2, %v3184_v11  ;;  %3032 = vmatmul.mubr.msk.bf16.gmra.mxu0 %vm656_vm2, %v3185_v12 }
  0x66   : > { %3001 = vmatprep.mubr.msk.bf16.mxu1 %vm656_vm2, %v3186_v13  ;;  %3035 = vmatprep.mubr.msk.bf16.mxu0 %vm656_vm2, %v3187_v14 }
  0x6d   : > { %3002 = vmatmul.mubr.msk.bf16.gmra.mxu1 %vm656_vm2, %v3188_v15  ;;  %3036 = vmatmul.mubr.msk.bf16.gmra.mxu0 %vm656_vm2, %v3189_v16 }
  0x6e   : > { %3005 = vmatprep.mubr.msk.bf16.mxu1 %vm656_vm2, %v3190_v17  ;;  %3039 = vmatprep.mubr.msk.bf16.mxu0 %vm656_vm2, %v3191_v18 }
  0x75   : > { %3006 = vmatmul.mubr.msk.bf16.gmra.mxu1 %vm656_vm2, %v3192_v19  ;;  %3040 = vmatmul.mubr.msk.bf16.gmra.mxu0 %vm656_vm2, %v3193_v20 }
  0x76   : > { %3009 = vmatprep.mubr.msk.bf16.mxu1 %vm656_vm2, %v3194_v21  ;;  %3043 = vmatprep.mubr.msk.bf16.mxu0 %vm656_vm2, %v3195_v22 }
  0x7d   : > { %3010 = vmatmul.mubr.msk.bf16.gmra.mxu1 %vm656_vm2, %v3196_v23  ;;  %3044 = vmatmul.mubr.msk.bf16.gmra.mxu0 %vm656_vm2, %v3197_v24 }
  0x7e   : > { %3013 = vmatprep.mubr.msk.bf16.mxu1 %vm656_vm2, %v3198_v25  ;;  %3047 = vmatprep.mubr.msk.bf16.mxu0 %vm656_vm2, %v3199_v26 }
  0x85   : > { %3014 = vmatmul.mubr.msk.bf16.gmra.mxu1 %vm656_vm2, %v3200_v27  ;;  %3048 = vmatmul.mubr.msk.bf16.gmra.mxu0 %vm656_vm2, %v3201_v28 }
  0x86   : > { %3017 = vmatprep.mubr.msk.bf16.mxu1 %vm656_vm2, %v3202_v29  ;;  %3051 = vmatprep.mubr.msk.bf16.mxu0 %vm656_vm2, %v3203_v30 }
  0x8d   : > { %3018 = vmatmul.mubr.msk.bf16.gmra.mxu1 %vm656_vm2, %v3204_v31  ;;  %3052 = vmatmul.mubr.msk.bf16.gmra.mxu0 %vm656_vm2, %v3205_v32 }
  0x8e   : > { %3057 = vmatprep.mubr.msk.bf16.mxu1 %vm656_vm2, %v3206_v33  ;;  %3091 = vmatprep.mubr.msk.bf16.mxu0 %vm656_vm2, %v3207_v34 }
  0x95   : > { %3058 = vmatmul.mubr.msk.bf16.vlgmr.msra.gmra.mxu1 %vm656_vm2, %v3208_v35  ;;  %3092 = vmatmul.mubr.msk.bf16.vlgmr.msra.gmra.mxu0 %vm656_vm2, %v3209_v36 }
  0x96   : > { %3061 = vmatprep.mubr.msk.bf16.mxu1 %vm656_vm2, %v3210_v37  ;;  %3095 = vmatprep.mubr.msk.bf16.mxu0 %vm656_vm2, %v3211_v38 }
  0x9d   : > { %3062 = vmatmul.mubr.msk.bf16.gmra.mxu1 %vm656_vm2, %v3212_v39  ;;  %3096 = vmatmul.mubr.msk.bf16.gmra.mxu0 %vm656_vm2, %v3213_v40 }
  0x9e   : > { %3065 = vmatprep.mubr.msk.bf16.mxu1 %vm656_vm2, %v3214_v41  ;;  %3099 = vmatprep.mubr.msk.bf16.mxu0 %vm656_vm2, %v3215_v42 }
  0xa5   : > { %3066 = vmatmul.mubr.msk.bf16.gmra.mxu1 %vm656_vm2, %v3216_v43  ;;  %3100 = vmatmul.mubr.msk.bf16.gmra.mxu0 %vm656_vm2, %v3217_v44 }
  0xa6   : > { %3069 = vmatprep.mubr.msk.bf16.mxu1 %vm656_vm2, %v3218_v45  ;;  %3103 = vmatprep.mubr.msk.bf16.mxu0 %vm656_vm2, %v3219_v46 }
  0xad   : > { %3070 = vmatmul.mubr.msk.bf16.gmra.mxu1 %vm656_vm2, %v3220_v47  ;;  %3104 = vmatmul.mubr.msk.bf16.gmra.mxu0 %vm656_vm2, %v3221_v48 }
  0xae   : > { %3073 = vmatprep.mubr.msk.bf16.mxu1 %vm656_vm2, %v3222_v49  ;;  %3107 = vmatprep.mubr.msk.bf16.mxu0 %vm656_vm2, %v3223_v50 }
  0xb5   : > { %3074 = vmatmul.mubr.msk.bf16.gmra.mxu1 %vm656_vm2, %v3224_v51  ;;  %3108 = vmatmul.mubr.msk.bf16.gmra.mxu0 %vm656_vm2, %v3225_v52 }
  0xb6   : > { %3077 = vmatprep.mubr.msk.bf16.mxu1 %vm656_vm2, %v3226_v53  ;;  %3111 = vmatprep.mubr.msk.bf16.mxu0 %vm656_vm2, %v3227_v54 }
  0xbd   : > { %3078 = vmatmul.mubr.msk.bf16.gmra.mxu1 %vm656_vm2, %v3228_v55  ;;  %3112 = vmatmul.mubr.msk.bf16.gmra.mxu0 %vm656_vm2, %v3229_v56 }
  0xbe   : > { %3081 = vmatprep.mubr.msk.bf16.mxu1 %vm656_vm2, %v3230_v57  ;;  %3115 = vmatprep.mubr.msk.bf16.mxu0 %vm656_vm2, %v3231_v58 }
  0xc5   : > { %3082 = vmatmul.mubr.msk.bf16.gmra.mxu1 %vm656_vm2, %v3232_v59  ;;  %3116 = vmatmul.mubr.msk.bf16.gmra.mxu0 %vm656_vm2, %v3233_v60 }
  0xc6   : > { %3085 = vmatprep.mubr.msk.bf16.mxu1 %vm656_vm2, %v3234_v61  ;;  %3119 = vmatprep.mubr.msk.bf16.mxu0 %vm656_vm2, %v3235_v62 }
  0xcd   : > { %3086 = vmatmul.mubr.msk.bf16.gmra.mxu1 %vm656_vm2, %v3236_v63  ;;  %3120 = vmatmul.mubr.msk.bf16.gmra.mxu0 %vm656_vm2, %v3237_v0 }
  0xf5   : > { %v3573_v1 = vpop.f32.mrf.mxu0  ;;  %v3575_v2 = vpop.f32.mrf.mxu1 }
  0xf7   : > { %v3577_v3 = vpop.f32.mrf.mxu0  ;;  %v3579_v4 = vpop.f32.mrf.mxu1 }
  0xf9   : > { %v3581_v5 = vpop.f32.mrf.mxu0  ;;  %v3583_v6 = vpop.f32.mrf.mxu1 }
  0xfa   : > { %3977 = vst [vmem:[#allocation3_spill] sm:$0xff] %v3583_v6 }
  0xfb   : > { %v3585_v7 = vpop.f32.mrf.mxu0  ;;  %v3587_v8 = vpop.f32.mrf.mxu1 }
  0xfc   : > { %3978 = vst [vmem:[#allocation4_spill] sm:$0xff] %v3587_v8 }
  0xfd   : > { %v3589_v9 = vpop.f32.mrf.mxu0  ;;  %v3591_v10 = vpop.f32.mrf.mxu1 }
  0xfe   : > { %3979 = vst [vmem:[#allocation5_spill] sm:$0xff] %v3591_v10 }
  0xff   : > { %v3593_v11 = vpop.f32.mrf.mxu0  ;;  %v3595_v12 = vpop.f32.mrf.mxu1 }
 0x100   : > { %3980 = vst [vmem:[#allocation6_spill] sm:$0xff] %v3595_v12 }
 0x101   : > { %v3597_v13 = vpop.f32.mrf.mxu0  ;;  %v3599_v14 = vpop.f32.mrf.mxu1 }
 0x102   : > { %3981 = vst [vmem:[#allocation7_spill] sm:$0xff] %v3599_v14 }
 0x103   : > { %v3601_v15 = vpop.f32.mrf.mxu0  ;;  %v3603_v16 = vpop.f32.mrf.mxu1 }
 0x104   : > { %3982 = vst [vmem:[#allocation8_spill] sm:$0xff] %v3603_v16 }
 0x105   : > { %v3605_v17 = vpop.f32.mrf.mxu0  ;;  %v3607_v18 = vpop.f32.mrf.mxu1 }
 0x106   : > { %3983 = vst [vmem:[#allocation9_spill] sm:$0xff] %v3607_v18 }
 0x107   : > { %v3609_v19 = vpop.f32.mrf.mxu0  ;;  %v3611_v20 = vpop.f32.mrf.mxu1 }
 0x108   : > { %3984 = vst [vmem:[#allocation10_spill] sm:$0xff] %v3611_v20 }
 0x109   : > { %v3613_v21 = vpop.f32.mrf.mxu0  ;;  %v3615_v22 = vpop.f32.mrf.mxu1 }
 0x10a   : > { %3985 = vst [vmem:[#allocation11_spill] sm:$0xff] %v3615_v22 }
 0x10b   : > { %v3617_v23 = vpop.f32.mrf.mxu0  ;;  %v3619_v24 = vpop.f32.mrf.mxu1 }
 0x10c   : > { %3986 = vst [vmem:[#allocation12_spill] sm:$0xff] %v3619_v24 }
 0x10d   : > { %v3621_v25 = vpop.f32.mrf.mxu0  ;;  %v3623_v26 = vpop.f32.mrf.mxu1 }
 0x10e   : > { %3987 = vst [vmem:[#allocation13_spill] sm:$0xff] %v3623_v26 }
 0x10f   : > { %v3625_v27 = vpop.f32.mrf.mxu0  ;;  %v3627_v28 = vpop.f32.mrf.mxu1 }
 0x110   : > { %3988 = vst [vmem:[#allocation14_spill] sm:$0xff] %v3627_v28 }
 0x111   : > { %v3629_v29 = vpop.f32.mrf.mxu0  ;;  %v3631_v30 = vpop.f32.mrf.mxu1 }
 0x112   : > { %3989 = vst [vmem:[#allocation15_spill] sm:$0xff] %v3631_v30 }
 0x113   : > { %v3633_v31 = vpop.f32.mrf.mxu0  ;;  %v3635_v32 = vpop.f32.mrf.mxu1 }
 0x114   : > { %3990 = vst [vmem:[#allocation16_spill] sm:$0xff] %v3635_v32 }
 0x115   : > { %v2991_v33 = vpop.f32.mrf.mxu1  ;;  %v3637_v34 = vpop.f32.mrf.mxu0 }
 0x117   : > { %v1043_v35 = vpop.f32.mrf.mxu1  ;;  %v3639_v36 = vpop.f32.mrf.mxu0 }
 0x119   : > { %v3641_v37 = vpop.f32.mrf.mxu1  ;;  %v3643_v38 = vpop.f32.mrf.mxu0 }
 0x11b   : > { %v3645_v39 = vpop.f32.mrf.mxu1  ;;  %v3647_v40 = vpop.f32.mrf.mxu0 }
 0x11d   : > { %v3649_v41 = vpop.f32.mrf.mxu1  ;;  %v3651_v42 = vpop.f32.mrf.mxu0 }
 0x11f   : > { %v3653_v43 = vpop.f32.mrf.mxu1  ;;  %v3655_v44 = vpop.f32.mrf.mxu0 }
 0x121   : > { %v3657_v45 = vpop.f32.mrf.mxu1  ;;  %v3659_v46 = vpop.f32.mrf.mxu0 }
 0x123   : > { %v3661_v47 = vpop.f32.mrf.mxu1  ;;  %v3663_v48 = vpop.f32.mrf.mxu0 }
 0x125   : > { %v3665_v49 = vpop.f32.mrf.mxu1  ;;  %v3667_v50 = vpop.f32.mrf.mxu0 }
 0x127   : > { %v3669_v51 = vpop.f32.mrf.mxu1  ;;  %v3671_v52 = vpop.f32.mrf.mxu0 }
 0x129   : > { %v3673_v53 = vpop.f32.mrf.mxu1  ;;  %v3675_v54 = vpop.f32.mrf.mxu0 }
 0x12b   : > { %v3677_v55 = vpop.f32.mrf.mxu1  ;;  %v3679_v56 = vpop.f32.mrf.mxu0 }
 0x12d   : > { %v3681_v57 = vpop.f32.mrf.mxu1  ;;  %v3683_v58 = vpop.f32.mrf.mxu0 }
 0x12f   : > { %v3685_v59 = vpop.f32.mrf.mxu1  ;;  %v3687_v60 = vpop.f32.mrf.mxu0 }
 0x131   : > { %v3689_v61 = vpop.f32.mrf.mxu1  ;;  %v3691_v62 = vpop.f32.mrf.mxu0 }
 0x133   : > { %v3693_v63 = vpop.f32.mrf.mxu1  ;;  %v3695_v0 = vpop.f32.mrf.mxu0 }
 0x135   : > { %v3697_v32 = vpop.f32.mrf.mxu1  ;;  %v3699_v30 = vpop.f32.mrf.mxu0 }
 0x137   : > { %v3701_v28 = vpop.f32.mrf.mxu1  ;;  %v3703_v26 = vpop.f32.mrf.mxu0 }
 0x138   : > { %3991 = vst [vmem:[#allocation17_spill] sm:$0xff] %v3703_v26 }
 0x139   : > { %v3705_v24 = vpop.f32.mrf.mxu1  ;;  %v3707_v22 = vpop.f32.mrf.mxu0 }
 0x13a   : > { %3992 = vst [vmem:[#allocation18_spill] sm:$0xff] %v3705_v24  ;;  %3993 = vst [vmem:[#allocation19_spill] sm:$0xff] %v3707_v22 }
 0x13b   : > { %v3709_v20 = vpop.f32.mrf.mxu1  ;;  %v3711_v18 = vpop.f32.mrf.mxu0 }
 0x13c   : > { %3994 = vst [vmem:[#allocation20_spill] sm:$0xff] %v3709_v20  ;;  %3995 = vst [vmem:[#allocation21_spill] sm:$0xff] %v3711_v18 }
 0x13d   : > { %v3713_v16 = vpop.f32.mrf.mxu1  ;;  %v3715_v14 = vpop.f32.mrf.mxu0 }
 0x13e   : > { %3996 = vst [vmem:[#allocation22_spill] sm:$0xff] %v3713_v16  ;;  %3997 = vst [vmem:[#allocation23_spill] sm:$0xff] %v3715_v14 }
 0x13f   : > { %v3717_v12 = vpop.f32.mrf.mxu1  ;;  %v3719_v10 = vpop.f32.mrf.mxu0 }
 0x140   : > { %3998 = vst [vmem:[#allocation24_spill] sm:$0xff] %v3717_v12  ;;  %3999 = vst [vmem:[#allocation25_spill] sm:$0xff] %v3719_v10 }
 0x141   : > { %v3721_v8 = vpop.f32.mrf.mxu1  ;;  %v3723_v26 = vpop.f32.mrf.mxu0 }
 0x142   : > { %4000 = vst [vmem:[#allocation26_spill] sm:$0xff] %v3721_v8  ;;  %4001 = vst [vmem:[#allocation27_spill] sm:$0xff] %v3723_v26 }
 0x143   : > { %v3725_v24 = vpop.f32.mrf.mxu1  ;;  %v3727_v22 = vpop.f32.mrf.mxu0 }
 0x144   : > { %4002 = vst [vmem:[#allocation28_spill] sm:$0xff] %v3725_v24  ;;  %4003 = vst [vmem:[#allocation29_spill] sm:$0xff] %v3727_v22 }
 0x145   : > { %v3729_v20 = vpop.f32.mrf.mxu1  ;;  %v3731_v18 = vpop.f32.mrf.mxu0 }
 0x146   : > { %4004 = vst [vmem:[#allocation30_spill] sm:$0xff] %v3729_v20  ;;  %4005 = vst [vmem:[#allocation31_spill] sm:$0xff] %v3731_v18 }
 0x147   : > { %v3733_v16 = vpop.f32.mrf.mxu1  ;;  %v3735_v14 = vpop.f32.mrf.mxu0 }
 0x148   : > { %4006 = vst [vmem:[#allocation32_spill] sm:$0xff] %v3735_v14  ;;  %v1052_v14 = vadd.f32 %v2991_v33, %v3573_v1  ;;  %v1047_v33 = vadd.f32 %v3645_v39, %v3585_v7 }
 0x149   : > { %v3737_v12 = vpop.f32.mrf.mxu1  ;;  %v3739_v10 = vpop.f32.mrf.mxu0 }
 0x14a   : > { %4007 = vst [vmem:[#allocation33_spill] sm:$0xff] %v3737_v12  ;;  %4008 = vst [vmem:[#allocation34_spill] sm:$0xff] %v3739_v10  ;;  %v1044_v10 = vadd.f32 %v1043_v35, %v3577_v3  ;;  %v3774_v3 = vld [vmem:[%s3975_s2] ss:$0 sm:$0xff] }
 0x14b   : > { %v3741_v8 = vpop.f32.mrf.mxu1  ;;  %v3743_v6 = vpop.f32.mrf.mxu0 }
 0x14c   : > { %4009 = vst [vmem:[#allocation35_spill] sm:$0xff] %v3741_v8  ;;  %4010 = vst [vmem:[#allocation36_spill] sm:$0xff] %v3743_v6  ;;  %v1502_v1 = vadd.f32 %v3639_v36, %v1044_v10  ;;  %v1060_v10 = vadd.f32 %v3653_v43, %v3593_v11 }
 0x14d   : > { %v3745_v26 = vpop.f32.mrf.mxu1  ;;  %v3747_v24 = vpop.f32.mrf.mxu0 }
 0x14e   : > { %4011 = vst [vmem:[#allocation37_spill] sm:$0xff] %v3745_v26  ;;  %4012 = vst [vmem:[#allocation38_spill] sm:$0xff] %v3747_v24  ;;  %v1504_v24 = vadd.f32 %v3637_v34, %v1052_v14  ;;  %v1506_v43 = vadd.f32 %v3655_v44, %v1060_v10 }
 0x14f   : > { %v3749_v22 = vpop.f32.mrf.mxu1  ;;  %v3751_v20 = vpop.f32.mrf.mxu0 }
 0x150   : > { %4013 = vst [vmem:[#allocation39_spill] sm:$0xff] %v3749_v22  ;;  %4014 = vst [vmem:[#allocation40_spill] sm:$0xff] %v3751_v20  ;;  %v1055_v20 = vadd.f32 %v3641_v37, %v3581_v5  ;;  %v1068_v37 = vadd.f32 %v3649_v41, %v3589_v9 }
 0x151   : > { %v3756_v18 = vpop.f32.mrf.mxu1  ;;  %v3758_v12 = vpop.f32.mrf.mxu0 }
 0x152   : > { %4015 = vst [vmem:[#allocation41_spill] sm:$0xff] %v3758_v12  ;;  %v1505_v14 = vadd.f32 %v3643_v38, %v1055_v20  ;;  %v1071_v20 = vadd.f32 %v3657_v45, %v3597_v13  ;;  %v1508_v11 = vadd.f32 %v3651_v42, %v1068_v37 }
 0x153   : > { %v3761_v6 = vpop.f32.mrf.mxu1  ;;  %v3763_v26 = vpop.f32.mrf.mxu0 }
 0x154   : > { %4016 = vst [vmem:[#allocation42_spill] sm:$0xff] %v3761_v6  ;;  %4017 = vst [vmem:[#allocation43_spill] sm:$0xff] %v3763_v26  ;;  %v1509_v44 = vadd.f32 %v3659_v46, %v1071_v20 }
 0x155   : > { %v3059_v22 = vpop.f32.mrf.mxu1  ;;  %v3093_v8 = vpop.f32.mrf.mxu0 }
 0x156   : > { %v1868_v12 = vadd.f32 %v3059_v22, %v1504_v24  ;;  %v1503_v24 = vadd.f32 %v3647_v40, %v1047_v33  ;;  %v1063_v40 = vadd.f32 %v3661_v47, %v3601_v15  ;;  %v1084_v15 = vadd.f32 %v3665_v49, %v3605_v17 }
 0x157   : > { %v1739_v35 = vpop.f32.mrf.mxu1  ;;  %v2103_v26 = vpop.f32.mrf.mxu0 }
 0x158   : > { %v2232_v34 = vadd.f32 %v3093_v8, %v1868_v12  ;;  %v1866_v5 = vadd.f32 %v1739_v35, %v1502_v1  ;;  %v1512_v20 = vadd.f32 %v3667_v50, %v1084_v15  ;;  %v1079_v50 = vadd.f32 %v3677_v55, %v3617_v23 }
 0x159   : > { %v3060_v7 = vpop.f32.mrf.mxu1  ;;  %v3094_v22 = vpop.f32.mrf.mxu0 }
 0x15a   : > { %v2271_v36 = vadd.f32 %v3774_v3, %v2232_v34  ;;  %v2230_v39 = vadd.f32 %v2103_v26, %v1866_v5  ;;  %v1869_v6 = vadd.f32 %v3060_v7, %v1505_v14  ;;  %v1507_v7 = vadd.f32 %v3663_v48, %v1063_v40 }
 0x15b   : > { %v1742_v8 = vpop.f32.mrf.mxu1  ;;  %v2106_v12 = vpop.f32.mrf.mxu0 }
 0x15c   : > { %v2303_v38 = vmax.f32 %v2271_v36, 0.0  ;;  %v2269_v9 = vadd.f32 %v3774_v3, %v2230_v39  ;;  %v2233_v41 = vadd.f32 %v3094_v22, %v1869_v6  ;;  %v1867_v1 = vadd.f32 %v1742_v8, %v1503_v24 }
 0x15d   : > { %v3063_v13 = vpop.f32.mrf.mxu1  ;;  %v3097_v26 = vpop.f32.mrf.mxu0  ;;  %v1076_v8 = vadd.f32 %v3669_v51, %v3609_v19 }
 0x15e   : > { %v2838_v45 = vpack.c.bf16 %v2303_v38, %v2303_v38  ;;  %v2301_v33 = vmax.f32 %v2269_v9, 0.0  ;;  %v2272_v6 = vadd.f32 %v3774_v3, %v2233_v41  ;;  %v2231_v42 = vadd.f32 %v2106_v12, %v1867_v1 }
 0x15f   : > { %v1872_v47 = vadd.f32 %v3063_v13, %v1508_v11  ;;  %v1755_v35 = vpop.f32.mrf.mxu1  ;;  %v2119_v14 = vpop.f32.mrf.mxu0  ;;  %v1087_v12 = vadd.f32 %v3673_v53, %v3613_v21 }
 0x160   : > { %2464 = vst.msk [vmem:[%s3793_s22 + $0x8] sm:$0xf] %vm2461_vm3, %v2838_v45  ;;  %v2836_v34 = vpack.c.bf16 %v2301_v33, %v2301_v33  ;;  %v2304_v5 = vmax.f32 %v2272_v6, 0.0  ;;  %v2270_v37 = vadd.f32 %v3774_v3, %v2231_v42  ;;  %v1870_v10 = vadd.f32 %v1755_v35, %v1506_v43 }
 0x161   : > { %v2236_v22 = vadd.f32 %v3097_v26, %v1872_v47  ;;  %v3064_v24 = vpop.f32.mrf.mxu1  ;;  %v3098_v36 = vpop.f32.mrf.mxu0  ;;  %v1510_v45 = vadd.f32 %v3671_v52, %v1076_v8  ;;  %v1513_v33 = vadd.f32 %v3675_v54, %v1087_v12  ;;  %v1100_v6 = vadd.f32 %v3681_v57, %v3621_v25 }
 0x162   : > { %2462 = vst.msk [vmem:[%s3793_s22] sm:$0xf] %vm2461_vm3, %v2836_v34  ;;  %v2839_v46 = vpack.c.bf16 %v2304_v5, %v2304_v5  ;;  %v2302_v17 = vmax.f32 %v2270_v37, 0.0  ;;  %v2234_v49 = vadd.f32 %v2119_v14, %v1870_v10  ;;  %v1873_v39 = vadd.f32 %v3064_v24, %v1509_v44 }
 0x163   : > { %v2275_v48 = vadd.f32 %v3774_v3, %v2236_v22  ;;  %v1758_v38 = vpop.f32.mrf.mxu1  ;;  %v2122_v9 = vpop.f32.mrf.mxu0  ;;  %v1511_v14 = vadd.f32 %v3679_v56, %v1079_v50  ;;  %v1092_v52 = vadd.f32 %v3685_v59, %v3625_v27 }
 0x164   : > { %2465 = vst.msk [vmem:[%s3793_s22 + $0xc] sm:$0xf] %vm2461_vm3, %v2839_v46  ;;  %v2837_v41 = vpack.c.bf16 %v2302_v17, %v2302_v17  ;;  %v2273_v1 = vadd.f32 %v3774_v3, %v2234_v49  ;;  %v2237_v11 = vadd.f32 %v3098_v36, %v1873_v39  ;;  %v1871_v43 = vadd.f32 %v1758_v38, %v1507_v7 }
 0x165   : > { %v2307_v40 = vmax.f32 %v2275_v48, 0.0  ;;  %v3067_v13 = vpop.f32.mrf.mxu1  ;;  %v3101_v19 = vpop.f32.mrf.mxu0  ;;  %v1516_v7 = vadd.f32 %v3683_v58, %v1100_v6  ;;  %v1514_v17 = vadd.f32 %v3687_v60, %v1092_v52  ;;  %v1103_v49 = vadd.f32 %v3689_v61, %v3629_v29 }
 0x166   : > { %2463 = vst.msk [vmem:[%s3793_s22 + $0x4] sm:$0xf] %vm2461_vm3, %v2837_v41  ;;  %v2305_v21 = vmax.f32 %v2273_v1, 0.0  ;;  %v2276_v51 = vadd.f32 %v3774_v3, %v2237_v11  ;;  %v2235_v53 = vadd.f32 %v2122_v9, %v1871_v43  ;;  %v1876_v26 = vadd.f32 %v3067_v13, %v1512_v20 }
 0x167   : > { %v2842_v23 = vpack.c.bf16 %v2307_v40, %v2307_v40  ;;  %v1771_v55 = vpop.f32.mrf.mxu1  ;;  %v2135_v42 = vpop.f32.mrf.mxu0  ;;  %v1095_v39 = vadd.f32 %v3693_v63, %v3633_v31  ;;  %v1116_v60 = vadd.f32 %v3697_v32, %v3575_v2  ;;  %v1517_v43 = vadd.f32 %v3691_v62, %v1103_v49 }
 0x168   : > { %v2840_v44 = vpack.c.bf16 %v2305_v21, %v2305_v21  ;;  %v2308_v15 = vmax.f32 %v2276_v51, 0.0  ;;  %v2274_v47 = vadd.f32 %v3774_v3, %v2235_v53  ;;  %v2240_v35 = vadd.f32 %v3101_v19, %v1876_v26 }
 0x169   : > { %2468 = vst.msk [vmem:[%s3793_s22 + $0x18] sm:$0xf] %vm2461_vm3, %v2842_v23  ;;  %v1874_v54 = vadd.f32 %v1771_v55, %v1510_v45  ;;  %v3068_v34 = vpop.f32.mrf.mxu1  ;;  %v3102_v5 = vpop.f32.mrf.mxu0  ;;  %v1515_v50 = vadd.f32 %v3695_v0, %v1095_v39  ;;  %v1108_v40 = vadd.f32 %v3701_v28, %v3579_v4  ;;  %v1520_v26 = vadd.f32 %v3699_v30, %v1116_v60  ;;  %v4018_v45 = vld [vmem:[#allocation3_spill] sm:$0xff]  ;;  %v4026_v39 = vld [vmem:[#allocation6_spill] sm:$0xff] }
 0x16a   : > { %2466 = vst.msk [vmem:[%s3793_s22 + $0x10] sm:$0xf] %vm2461_vm3, %v2840_v44  ;;  %v2843_v25 = vpack.c.bf16 %v2308_v15, %v2308_v15  ;;  %v2306_v57 = vmax.f32 %v2274_v47, 0.0  ;;  %v2279_v37 = vadd.f32 %v3774_v3, %v2240_v35  ;;  %v1877_v10 = vadd.f32 %v3068_v34, %v1513_v33  ;;  %v4019_v33 = vld [vmem:[#allocation18_spill] sm:$0xff]  ;;  %v4020_v44 = vld [vmem:[#allocation17_spill] sm:$0xff] }
 0x16b   : > { %v2238_v22 = vadd.f32 %v2135_v42, %v1874_v54  ;;  %v1774_v56 = vpop.f32.mrf.mxu1  ;;  %v2138_v24 = vpop.f32.mrf.mxu0  ;;  %v1119_v62 = vadd.f32 %v4019_v33, %v4018_v45  ;;  %v1518_v15 = vadd.f32 %v4020_v44, %v1108_v40  ;;  %v4034_v45 = vld [vmem:[#allocation28_spill] sm:$0xff] }
 0x16c   : > { %2469 = vst.msk [vmem:[%s3793_s22 + $0x1c] sm:$0xf] %vm2461_vm3, %v2843_v25  ;;  %v2841_v27 = vpack.c.bf16 %v2306_v57, %v2306_v57  ;;  %v2311_v59 = vmax.f32 %v2279_v37, 0.0  ;;  %v2241_v36 = vadd.f32 %v3102_v5, %v1877_v10  ;;  %v1875_v46 = vadd.f32 %v1774_v56, %v1511_v14  ;;  %v4021_v5 = vld [vmem:[#allocation19_spill] sm:$0xff]  ;;  %v4022_v57 = vld [vmem:[#allocation4_spill] sm:$0xff] }
 0x16d   : > { %v2277_v58 = vadd.f32 %v3774_v3, %v2238_v22  ;;  %v3071_v20 = vpop.f32.mrf.mxu1  ;;  %v3105_v8 = vpop.f32.mrf.mxu0  ;;  %v1521_v25 = vadd.f32 %v4021_v5, %v1119_v62  ;;  %v4023_v37 = vld [vmem:[#allocation20_spill] sm:$0xff]  ;;  %v4025_v22 = vld [vmem:[#allocation22_spill] sm:$0xff] }
 0x16e   : > { %2467 = vst.msk [vmem:[%s3793_s22 + $0x14] sm:$0xf] %vm2461_vm3, %v2841_v27  ;;  %v2846_v12 = vpack.c.bf16 %v2311_v59, %v2311_v59  ;;  %v2280_v48 = vadd.f32 %v3774_v3, %v2241_v36  ;;  %v2239_v38 = vadd.f32 %v2138_v24, %v1875_v46  ;;  %v1880_v9 = vadd.f32 %v3071_v20, %v1516_v7  ;;  %v4024_v7 = vld [vmem:[#allocation5_spill] sm:$0xff] }
 0x16f   : > { %v2309_v41 = vmax.f32 %v2277_v58, 0.0  ;;  %v1787_v1 = vpop.f32.mrf.mxu1  ;;  %v2151_v29 = vpop.f32.mrf.mxu0  ;;  %v1111_v10 = vadd.f32 %v4023_v37, %v4022_v57  ;;  %v1132_v56 = vadd.f32 %v4025_v22, %v4024_v7  ;;  %v4027_v58 = vld [vmem:[#allocation24_spill] sm:$0xff]  ;;  %v4038_v57 = vld [vmem:[#allocation30_spill] sm:$0xff] }
 0x170   : > { %2472 = vst.msk [vmem:[%s3793_s22 + $0x28] sm:$0xf] %vm2461_vm3, %v2846_v12  ;;  %v2312_v31 = vmax.f32 %v2280_v48, 0.0  ;;  %v2278_v61 = vadd.f32 %v3774_v3, %v2239_v38  ;;  %v2244_v63 = vadd.f32 %v3105_v8, %v1880_v9  ;;  %v1878_v11 = vadd.f32 %v1787_v1, %v1514_v17  ;;  %v4028_v1 = vld [vmem:[#allocation21_spill] sm:$0xff] }
 0x171   : > { %v2844_v2 = vpack.c.bf16 %v2309_v41, %v2309_v41  ;;  %v3072_v32 = vpop.f32.mrf.mxu1  ;;  %v3106_v13 = vpop.f32.mrf.mxu0  ;;  %v1124_v20 = vadd.f32 %v4027_v58, %v4026_v39 }
 0x172   : > { %v2847_v19 = vpack.c.bf16 %v2312_v31, %v2312_v31  ;;  %v2310_v21 = vmax.f32 %v2278_v61, 0.0  ;;  %v2283_v51 = vadd.f32 %v3774_v3, %v2244_v63  ;;  %v2242_v53 = vadd.f32 %v2151_v29, %v1878_v11  ;;  %v4029_v31 = vld [vmem:[#allocation23_spill] sm:$0xff]  ;;  %v4031_v11 = vld [vmem:[#allocation26_spill] sm:$0xff] }
 0x173   : > { %2470 = vst.msk [vmem:[%s3793_s22 + $0x20] sm:$0xf] %vm2461_vm3, %v2844_v2  ;;  %v1881_v0 = vadd.f32 %v3072_v32, %v1517_v43  ;;  %v1790_v6 = vpop.f32.mrf.mxu1  ;;  %v2154_v23 = vpop.f32.mrf.mxu0  ;;  %v1519_v29 = vadd.f32 %v4028_v1, %v1111_v10  ;;  %v1524_v61 = vadd.f32 %v4029_v31, %v1132_v56  ;;  %v4030_v63 = vld [vmem:[#allocation7_spill] sm:$0xff]  ;;  %v4039_v10 = vld [vmem:[#allocation10_spill] sm:$0xff] }
 0x174   : > { %2473 = vst.msk [vmem:[%s3793_s22 + $0x2c] sm:$0xf] %vm2461_vm3, %v2847_v19  ;;  %v2845_v4 = vpack.c.bf16 %v2310_v21, %v2310_v21  ;;  %v2315_v28 = vmax.f32 %v2283_v51, 0.0  ;;  %v2281_v55 = vadd.f32 %v3774_v3, %v2242_v53  ;;  %v1879_v42 = vadd.f32 %v1790_v6, %v1515_v50  ;;  %v4032_v51 = vld [vmem:[#allocation25_spill] sm:$0xff]  ;;  %v4045_v31 = vld [vmem:[#allocation35_spill] sm:$0xff] }
 0x175   : > { %v2245_v47 = vadd.f32 %v3106_v13, %v1881_v0  ;;  %v3075_v30 = vpop.f32.mrf.mxu1  ;;  %v3109_v35 = vpop.f32.mrf.mxu0  ;;  %v1135_v43 = vadd.f32 %v4031_v11, %v4030_v63  ;;  %v1522_v53 = vadd.f32 %v4032_v51, %v1124_v20  ;;  %v1140_v7 = vadd.f32 %v3733_v16, %v4039_v10  ;;  %v4048_v51 = vld [vmem:[#allocation37_spill] sm:$0xff] }
 0x176   : > { %2471 = vst.msk [vmem:[%s3793_s22 + $0x24] sm:$0xf] %vm2461_vm3, %v2845_v4  ;;  %v2850_v14 = vpack.c.bf16 %v2315_v28, %v2315_v28  ;;  %v2313_v52 = vmax.f32 %v2281_v55, 0.0  ;;  %v2243_v54 = vadd.f32 %v2154_v23, %v1879_v42  ;;  %v1884_v34 = vadd.f32 %v3075_v30, %v1520_v26  ;;  %v4033_v26 = vld [vmem:[#allocation8_spill] sm:$0xff]  ;;  %v4035_v42 = vld [vmem:[#allocation27_spill] sm:$0xff] }
 0x177   : > { %v2284_v24 = vadd.f32 %v3774_v3, %v2245_v47  ;;  %v1803_v27 = vpop.f32.mrf.mxu1  ;;  %v2167_v59 = vpop.f32.mrf.mxu0  ;;  %v1127_v33 = vadd.f32 %v4034_v45, %v4033_v26  ;;  %v1525_v44 = vadd.f32 %v4035_v42, %v1135_v43 }
 0x178   : > { %2476 = vst.msk [vmem:[%s3793_s22 + $0x38] sm:$0xf] %vm2461_vm3, %v2850_v14  ;;  %v2848_v36 = vpack.c.bf16 %v2313_v52, %v2313_v52  ;;  %v2282_v46 = vadd.f32 %v3774_v3, %v2243_v54  ;;  %v2248_v17 = vadd.f32 %v3109_v35, %v1884_v34  ;;  %v1882_v49 = vadd.f32 %v1803_v27, %v1518_v15  ;;  %v4036_v34 = vld [vmem:[#allocation29_spill] sm:$0xff] }
 0x179   : > { %v2316_v8 = vmax.f32 %v2284_v24, 0.0  ;;  %v3076_v12 = vpop.f32.mrf.mxu1  ;;  %v3110_v48 = vpop.f32.mrf.mxu0  ;;  %v1523_v5 = vadd.f32 %v4036_v34, %v1127_v33  ;;  %v4052_v34 = vld [vmem:[#allocation39_spill] sm:$0xff] }
 0x17a   : > { %2474 = vst.msk [vmem:[%s3793_s22 + $0x30] sm:$0xf] %vm2461_vm3, %v2848_v36  ;;  %v2314_v38 = vmax.f32 %v2282_v46, 0.0  ;;  %v2287_v9 = vadd.f32 %v3774_v3, %v2248_v17  ;;  %v2246_v60 = vadd.f32 %v2167_v59, %v1882_v49  ;;  %v1885_v41 = vadd.f32 %v3076_v12, %v1521_v25  ;;  %v4037_v25 = vld [vmem:[#allocation9_spill] sm:$0xff]  ;;  %v4040_v17 = vld [vmem:[#allocation11_spill] sm:$0xff] }
 0x17b   : > { %v2851_v50 = vpack.c.bf16 %v2316_v8, %v2316_v8  ;;  %v1806_v40 = vpop.f32.mrf.mxu1  ;;  %v2170_v2 = vpop.f32.mrf.mxu0  ;;  %v1148_v37 = vadd.f32 %v4038_v57, %v4037_v25  ;;  %v4041_v49 = vld [vmem:[#allocation33_spill] sm:$0xff]  ;;  %v4053_v25 = vld [vmem:[#allocation15_spill] sm:$0xff] }
 0x17c   : > { %v2849_v32 = vpack.c.bf16 %v2314_v38, %v2314_v38  ;;  %v2319_v13 = vmax.f32 %v2287_v9, 0.0  ;;  %v2285_v19 = vadd.f32 %v3774_v3, %v2246_v60  ;;  %v2249_v21 = vadd.f32 %v3110_v48, %v1885_v41  ;;  %v4042_v9 = vld [vmem:[#allocation31_spill] sm:$0xff]  ;;  %v4043_v41 = vld [vmem:[#allocation32_spill] sm:$0xff] }
 0x17d   : > { %2477 = vst.msk [vmem:[%s3793_s22 + $0x3c] sm:$0xf] %vm2461_vm3, %v2851_v50  ;;  %v1883_v62 = vadd.f32 %v1806_v40, %v1519_v29  ;;  %v3079_v0 = vpop.f32.mrf.mxu1  ;;  %v3113_v6 = vpop.f32.mrf.mxu0  ;;  %v1151_v39 = vadd.f32 %v4041_v49, %v4040_v17  ;;  %v1528_v60 = vadd.f32 %v4042_v9, %v1148_v37  ;;  %v1526_v1 = vadd.f32 %v4043_v41, %v1140_v7  ;;  %v4044_v29 = vld [vmem:[#allocation12_spill] sm:$0xff] }
 0x17e   : > { %2475 = vst.msk [vmem:[%s3793_s22 + $0x34] sm:$0xf] %vm2461_vm3, %v2849_v32  ;;  %v2854_v23 = vpack.c.bf16 %v2319_v13, %v2319_v13  ;;  %v2317_v4 = vmax.f32 %v2285_v19, 0.0  ;;  %v2288_v28 = vadd.f32 %v3774_v3, %v2249_v21  ;;  %v1888_v55 = vadd.f32 %v3079_v0, %v1524_v61  ;;  %v4046_v13 = vld [vmem:[#allocation34_spill] sm:$0xff]  ;;  %v4047_v21 = vld [vmem:[#allocation13_spill] sm:$0xff] }
 0x17f   : > { %v2247_v15 = vadd.f32 %v2170_v2, %v1883_v62  ;;  %v1819_v47 = vpop.f32.mrf.mxu1  ;;  %v2183_v30 = vpop.f32.mrf.mxu0  ;;  %v1143_v61 = vadd.f32 %v4045_v31, %v4044_v29  ;;  %v1529_v19 = vadd.f32 %v4046_v13, %v1151_v39  ;;  %v1167_v57 = vadd.f32 %v3756_v18, %v4053_v25 }
 0x180   : > { %2480 = vst.msk [vmem:[%s3793_s22 + $0x48] sm:$0xf] %vm2461_vm3, %v2854_v23  ;;  %v2852_v35 = vpack.c.bf16 %v2317_v4, %v2317_v4  ;;  %v2320_v14 = vmax.f32 %v2288_v28, 0.0  ;;  %v2252_v52 = vadd.f32 %v3113_v6, %v1888_v55  ;;  %v1886_v54 = vadd.f32 %v1819_v47, %v1522_v53  ;;  %v4049_v4 = vld [vmem:[#allocation36_spill] sm:$0xff] }
 0x181   : > { %v2286_v22 = vadd.f32 %v3774_v3, %v2247_v15  ;;  %v3080_v56 = vpop.f32.mrf.mxu1  ;;  %v3114_v24 = vpop.f32.mrf.mxu0  ;;  %v1164_v53 = vadd.f32 %v4048_v51, %v4047_v21  ;;  %v1527_v28 = vadd.f32 %v4049_v4, %v1143_v61 }
 0x182   : > { %2478 = vst.msk [vmem:[%s3793_s22 + $0x40] sm:$0xf] %vm2461_vm3, %v2852_v35  ;;  %v2855_v27 = vpack.c.bf16 %v2320_v14, %v2320_v14  ;;  %v2291_v59 = vadd.f32 %v3774_v3, %v2252_v52  ;;  %v2250_v36 = vadd.f32 %v2183_v30, %v1886_v54  ;;  %v1889_v46 = vadd.f32 %v3080_v56, %v1525_v44  ;;  %v4050_v14 = vld [vmem:[#allocation38_spill] sm:$0xff] }
 0x183   : > { %v2318_v58 = vmax.f32 %v2286_v22, 0.0  ;;  %v1822_v20 = vpop.f32.mrf.mxu1  ;;  %v2186_v8 = vpop.f32.mrf.mxu0  ;;  %v1532_v52 = vadd.f32 %v4050_v14, %v1164_v53  ;;  %v4051_v54 = vld [vmem:[#allocation14_spill] sm:$0xff] }
 0x184   : > { %2481 = vst.msk [vmem:[%s3793_s22 + $0x4c] sm:$0xf] %vm2461_vm3, %v2855_v27  ;;  %v2323_v16 = vmax.f32 %v2291_v59, 0.0  ;;  %v2289_v12 = vadd.f32 %v3774_v3, %v2250_v36  ;;  %v2253_v48 = vadd.f32 %v3114_v24, %v1889_v46  ;;  %v1887_v38 = vadd.f32 %v1822_v20, %v1523_v5  ;;  %v4054_v59 = vld [vmem:[#allocation16_spill] sm:$0xff]  ;;  %v4055_v36 = vld [vmem:[#allocation42_spill] sm:$0xff] }
 0x185   : > { %v2853_v63 = vpack.c.bf16 %v2318_v58, %v2318_v58  ;;  %v3083_v11 = vpop.f32.mrf.mxu1  ;;  %v3117_v43 = vpop.f32.mrf.mxu0  ;;  %v1156_v5 = vadd.f32 %v4052_v34, %v4051_v54  ;;  %v1159_v46 = vadd.f32 %v4055_v36, %v4054_v59 }
 0x186   : > { %v2858_v50 = vpack.c.bf16 %v2323_v16, %v2323_v16  ;;  %v2321_v40 = vmax.f32 %v2289_v12, 0.0  ;;  %v2292_v2 = vadd.f32 %v3774_v3, %v2253_v48  ;;  %v2251_v32 = vadd.f32 %v2186_v8, %v1887_v38  ;;  %v4056_v16 = vld [vmem:[#allocation40_spill] sm:$0xff]  ;;  %v4057_v48 = vld [vmem:[#allocation41_spill] sm:$0xff] }
 0x187   : > { %2479 = vst.msk [vmem:[%s3793_s22 + $0x44] sm:$0xf] %vm2461_vm3, %v2853_v63  ;;  %v1892_v26 = vadd.f32 %v3083_v11, %v1528_v60  ;;  %v1835_v45 = vpop.f32.mrf.mxu1  ;;  %v2199_v33 = vpop.f32.mrf.mxu0  ;;  %v1530_v12 = vadd.f32 %v4056_v16, %v1156_v5  ;;  %v1533_v38 = vadd.f32 %v4057_v48, %v1167_v57  ;;  %v4058_v63 = vld [vmem:[#allocation43_spill] sm:$0xff] }
 0x188   : > { %2484 = vst.msk [vmem:[%s3793_s22 + $0x58] sm:$0xf] %vm2461_vm3, %v2858_v50  ;;  %v2856_v62 = vpack.c.bf16 %v2321_v40, %v2321_v40  ;;  %v2324_v0 = vmax.f32 %v2292_v2, 0.0  ;;  %v2290_v6 = vadd.f32 %v3774_v3, %v2251_v32  ;;  %v1890_v23 = vadd.f32 %v1835_v45, %v1526_v1 }
 0x189   : > { %v2256_v55 = vadd.f32 %v3117_v43, %v1892_v26  ;;  %v3084_v42 = vpop.f32.mrf.mxu1  ;;  %v3118_v44 = vpop.f32.mrf.mxu0  ;;  %v1531_v11 = vadd.f32 %v4058_v63, %v1159_v46 }
 0x18a   : > { %2482 = vst.msk [vmem:[%s3793_s22 + $0x50] sm:$0xf] %vm2461_vm3, %v2856_v62  ;;  %v2859_v15 = vpack.c.bf16 %v2324_v0, %v2324_v0  ;;  %v2322_v47 = vmax.f32 %v2290_v6, 0.0  ;;  %v2254_v30 = vadd.f32 %v2199_v33, %v1890_v23  ;;  %v1893_v35 = vadd.f32 %v3084_v42, %v1529_v19 }
 0x18b   : > { %v2295_v37 = vadd.f32 %v3774_v3, %v2256_v55  ;;  %v1838_v10 = vpop.f32.mrf.mxu1  ;;  %v2202_v7 = vpop.f32.mrf.mxu0 }
 0x18c   : > { %2485 = vst.msk [vmem:[%s3793_s22 + $0x5c] sm:$0xf] %vm2461_vm3, %v2859_v15  ;;  %v2857_v22 = vpack.c.bf16 %v2322_v47, %v2322_v47  ;;  %v2293_v56 = vadd.f32 %v3774_v3, %v2254_v30  ;;  %v2257_v24 = vadd.f32 %v3118_v44, %v1893_v35  ;;  %v1891_v27 = vadd.f32 %v1838_v10, %v1527_v28 }
 0x18d   : > { %v2327_v17 = vmax.f32 %v2295_v37, 0.0  ;;  %v3087_v49 = vpop.f32.mrf.mxu1  ;;  %v3121_v39 = vpop.f32.mrf.mxu0 }
 0x18e   : > { %2483 = vst.msk [vmem:[%s3793_s22 + $0x54] sm:$0xf] %vm2461_vm3, %v2857_v22  ;;  %v2325_v18 = vmax.f32 %v2293_v56, 0.0  ;;  %v2296_v58 = vadd.f32 %v3774_v3, %v2257_v24  ;;  %v2255_v20 = vadd.f32 %v2202_v7, %v1891_v27  ;;  %v1896_v8 = vadd.f32 %v3087_v49, %v1532_v52 }
 0x18f   : > { %v2862_v9 = vpack.c.bf16 %v2327_v17, %v2327_v17  ;;  %v1851_v60 = vpop.f32.mrf.mxu1  ;;  %v2215_v41 = vpop.f32.mrf.mxu0 }
 0x190   : > { %v2860_v1 = vpack.c.bf16 %v2325_v18, %v2325_v18  ;;  %v2328_v29 = vmax.f32 %v2296_v58, 0.0  ;;  %v2294_v31 = vadd.f32 %v3774_v3, %v2255_v20  ;;  %v2260_v61 = vadd.f32 %v3121_v39, %v1896_v8 }
 0x191   : > { %2488 = vst.msk [vmem:[%s3793_s22 + $0x68] sm:$0xf] %vm2461_vm3, %v2862_v9  ;;  %v1894_v43 = vadd.f32 %v1851_v60, %v1530_v12  ;;  %v3088_v50 = vpop.f32.mrf.mxu1  ;;  %v3122_v40 = vpop.f32.mrf.mxu0 }
 0x192   : > { %2486 = vst.msk [vmem:[%s3793_s22 + $0x60] sm:$0xf] %vm2461_vm3, %v2860_v1  ;;  %v2863_v2 = vpack.c.bf16 %v2328_v29, %v2328_v29  ;;  %v2326_v32 = vmax.f32 %v2294_v31, 0.0  ;;  %v2299_v13 = vadd.f32 %v3774_v3, %v2260_v61  ;;  %v1897_v19 = vadd.f32 %v3088_v50, %v1533_v38 }
 0x193   : > { %v2258_v21 = vadd.f32 %v2215_v41, %v1894_v43  ;;  %v1854_v51 = vpop.f32.mrf.mxu1  ;;  %v2218_v0 = vpop.f32.mrf.mxu0 }
 0x194   : > { %2489 = vst.msk [vmem:[%s3793_s22 + $0x6c] sm:$0xf] %vm2461_vm3, %v2863_v2  ;;  %v2861_v53 = vpack.c.bf16 %v2326_v32, %v2326_v32  ;;  %v2331_v26 = vmax.f32 %v2299_v13, 0.0  ;;  %v2261_v45 = vadd.f32 %v3122_v40, %v1897_v19  ;;  %v1895_v33 = vadd.f32 %v1854_v51, %v1531_v11 }
 0x195   : > { %v2297_v62 = vadd.f32 %v3774_v3, %v2258_v21 }
 0x196   : > { %2487 = vst.msk [vmem:[%s3793_s22 + $0x64] sm:$0xf] %vm2461_vm3, %v2861_v53  ;;  %v2866_v6 = vpack.c.bf16 %v2331_v26, %v2331_v26  ;;  %v2300_v23 = vadd.f32 %v3774_v3, %v2261_v45  ;;  %v2259_v4 = vadd.f32 %v2218_v0, %v1895_v33 }
 0x197   : > { %v2329_v28 = vmax.f32 %v2297_v62, 0.0 }
 0x198   : > { %2492 = vst.msk [vmem:[%s3793_s22 + $0x78] sm:$0xf] %vm2461_vm3, %v2866_v6  ;;  %v2332_v55 = vmax.f32 %v2300_v23, 0.0  ;;  %v2298_v42 = vadd.f32 %v3774_v3, %v2259_v4 }
 0x199   : > { %v2864_v44 = vpack.c.bf16 %v2329_v28, %v2329_v28 }
 0x19a   : > { %v2867_v15 = vpack.c.bf16 %v2332_v55, %v2332_v55  ;;  %v2330_v47 = vmax.f32 %v2298_v42, 0.0 }
 0x19b   : > { %2490 = vst.msk [vmem:[%s3793_s22 + $0x70] sm:$0xf] %vm2461_vm3, %v2864_v44 }
 0x19c   : > { %2493 = vst.msk [vmem:[%s3793_s22 + $0x7c] sm:$0xf] %vm2461_vm3, %v2867_v15  ;;  %v2865_v30 = vpack.c.bf16 %v2330_v47, %v2330_v47 }
 0x19e   : > { %2491 = vst.msk [vmem:[%s3793_s22 + $0x74] sm:$0xf] %vm2461_vm3, %v2865_v30 }
 0x19f PF: > { %p10_p9 = scmp.ge.s32.totalorder %s3300_s16, 4   ;;  %s4059_s12 = smov %s3256_s13 }
 0x1a0   : > { %s4060_s13 = smov %s3309_s19  ;;  %s4061_s14 = smov %s3300_s16 }
 0x1a1   :  { %12 = sbr.rel (!%p10_p9) target bundleno = 2 (0x2), region = 113 }

// kernel: dtn_base_forward.4
= control target key start
LH: loop header
LB: loop body
LE: loop exit
PB: predicated region body
PF: predicated region fallthrough
CT: control target
= control target key end

     0   :  { %s3337_s12 = smov 0   ;;  %s3339_s13 = smov 0   ;;  %s4075_s0 = inlined_call_operand.vmem [shape: bf16[2,2,80,320], index: 0, kind: input, shape index: {}]   ;;  %s4076_s1 = inlined_call_operand.vmem [shape: bf16[5,320,128], index: 1, kind: input, shape index: {}]   ;;  %s4077_s2 = inlined_call_operand.vmem [shape: f32[1,128], index: 2, kind: input, shape index: {}]   ;;  %s4078_s3 = inlined_call_operand.vmem [shape: bf16[128,128], index: 3, kind: output, shape index: {}]  }
   0x1   :  { %s3341_s14 = smov 0  }
   0x2 LB: > { %s2330_s15 = sadd.s32 4294967295, %s3315_s14   ;;  %s3354_s16 = sadd.s32 1, %s3315_s14   ;;  %s3315_s14 = sphi %s3341_s14, %s4097_s14   ;;  %s3311_s13 = sphi %s3339_s13, %s4096_s13   ;;  %s3307_s12 = sphi %s3337_s12, %s4095_s12  }
   0x3   : > { %s17_s17 = ssub.s32 %s3315_s14, %s3354_s16  ;;  %s20_s18 = sadd.s32 1, %s3311_s13 }
   0x4   : > { %p18_p0 = scmp.eq.s32.totalorder %s17_s17, 0  ;;  %p27_p1 = scmp.ne.s32.totalorder %s3311_s13, %s3307_s12 }
   0x5   : > { %p28_p2 = scmp.eq.s32.totalorder %s3315_s14, 0  ;;  %p2333_p4 = scmp.ge.s32.totalorder %s3315_s14, 2 }
   0x6   : > { %s3363_s19 = scalar_select %p18_p0, %s3311_s13, %s20_s18  }
   0x7   : > { %p29_p3 = por %p28_p2, %p27_p1  ;;  %127 = sbr.rel (%p2333_p4) target bundleno = 40 (0x28), region = 24 }
   0xc   : > { %130 = sbr.rel (!%p29_p3) target bundleno = 40 (0x28), region = 28  ;;  %s132_s20 = sand.u32 (%p29_p3), 1, %s3311_s13  }
   0xd   : > { %s3113_s21 = smul.u32 (%p29_p3), 120, %s3315_s14 }
   0xe   : > { %s3112_s22 = smul.u32 (%p29_p3), 240, %s132_s20 }
   0xf   : > { %s3371_s25 = scalar_lea.vmem (%p29_p3), %s4075_s0, %s3113_s21 }
  0x10   : > { %v152_v0 = vld [vmem:[%s3371_s25] sm:$0xff] (%p29_p3)  ;;  %v154_v1 = vld [vmem:[%s3371_s25 + $0xc] sm:$0xff] (%p29_p3)  ;;  %v156_v2 = vld [vmem:[%s3371_s25 + $0x18] sm:$0xff] (%p29_p3)  ;;  %s3376_s26 = scalar_lea.vmem (%p29_p3), [#allocation2], %s3112_s22 }
  0x11   : > { %153 = vst [vmem:[%s3376_s26] sm:$0xff] %v152_v0  ;;  %155 = vst [vmem:[%s3376_s26 + $0xc] sm:$0xff] %v154_v1  ;;  %v158_v3 = vld [vmem:[%s3371_s25 + $0x24] sm:$0xff]  ;;  %v160_v4 = vld [vmem:[%s3371_s25 + $0x30] sm:$0xff] }
  0x12   : > { %157 = vst [vmem:[%s3376_s26 + $0x18] sm:$0xff] %v156_v2  ;;  %v162_v5 = vld [vmem:[%s3371_s25 + $0x3c] sm:$0xff]  ;;  %159 = vst [vmem:[%s3376_s26 + $0x24] sm:$0xff] %v158_v3  ;;  %v164_v6 = vld [vmem:[%s3371_s25 + $0x48] sm:$0xff] }
  0x13   : > { %161 = vst [vmem:[%s3376_s26 + $0x30] sm:$0xff] %v160_v4  ;;  %163 = vst [vmem:[%s3376_s26 + $0x3c] sm:$0xff] %v162_v5  ;;  %v166_v7 = vld [vmem:[%s3371_s25 + $0x54] sm:$0xff]  ;;  %v168_v8 = vld [vmem:[%s3371_s25 + $0x60] sm:$0xff] }
  0x14   : > { %165 = vst [vmem:[%s3376_s26 + $0x48] sm:$0xff] %v164_v6  ;;  %167 = vst [vmem:[%s3376_s26 + $0x54] sm:$0xff] %v166_v7  ;;  %v170_v9 = vld [vmem:[%s3371_s25 + $0x6c] sm:$0xff]  ;;  %v174_v11 = vld [vmem:[%s3371_s25 + $0xfc] sm:$0xff] }
  0x15   : > { %169 = vst [vmem:[%s3376_s26 + $0x60] sm:$0xff] %v168_v8  ;;  %v172_v10 = vld [vmem:[%s3371_s25 + $0xf0] sm:$0xff]  ;;  %171 = vst [vmem:[%s3376_s26 + $0x6c] sm:$0xff] %v170_v9  ;;  %v176_v12 = vld [vmem:[%s3371_s25 + $0x108] sm:$0xff] }
  0x16   : > { %173 = vst [vmem:[%s3376_s26 + $0x78] sm:$0xff] %v172_v10  ;;  %175 = vst [vmem:[%s3376_s26 + $0x84] sm:$0xff] %v174_v11  ;;  %v178_v13 = vld [vmem:[%s3371_s25 + $0x114] sm:$0xff]  ;;  %v180_v14 = vld [vmem:[%s3371_s25 + $0x120] sm:$0xff] }
  0x17   : > { %177 = vst [vmem:[%s3376_s26 + $0x90] sm:$0xff] %v176_v12  ;;  %179 = vst [vmem:[%s3376_s26 + $0x9c] sm:$0xff] %v178_v13  ;;  %v182_v15 = vld [vmem:[%s3371_s25 + $0x12c] sm:$0xff]  ;;  %v184_v16 = vld [vmem:[%s3371_s25 + $0x138] sm:$0xff] }
  0x18   : > { %181 = vst [vmem:[%s3376_s26 + $0xa8] sm:$0xff] %v180_v14  ;;  %v186_v17 = vld [vmem:[%s3371_s25 + $0x144] sm:$0xff]  ;;  %183 = vst [vmem:[%s3376_s26 + $0xb4] sm:$0xff] %v182_v15  ;;  %v188_v18 = vld [vmem:[%s3371_s25 + $0x150] sm:$0xff] }
  0x19   : > { %185 = vst [vmem:[%s3376_s26 + $0xc0] sm:$0xff] %v184_v16  ;;  %187 = vst [vmem:[%s3376_s26 + $0xcc] sm:$0xff] %v186_v17  ;;  %v190_v19 = vld [vmem:[%s3371_s25 + $0x15c] sm:$0xff]  ;;  %v2335_v20 = vld [vmem:[%s3371_s25 + $0x8] sm:$0xf] }
  0x1a   : > { %189 = vst [vmem:[%s3376_s26 + $0xd8] sm:$0xff] %v188_v18  ;;  %191 = vst [vmem:[%s3376_s26 + $0xe4] sm:$0xff] %v190_v19  ;;  %v2337_v21 = vld [vmem:[%s3371_s25 + $0x14] sm:$0xf]  ;;  %v2339_v22 = vld [vmem:[%s3371_s25 + $0x20] sm:$0xf] }
  0x1b   : > { %2336 = vst [vmem:[%s3376_s26 + $0x8] sm:$0xf] %v2335_v20  ;;  %v2341_v23 = vld [vmem:[%s3371_s25 + $0x2c] sm:$0xf]  ;;  %2338 = vst [vmem:[%s3376_s26 + $0x14] sm:$0xf] %v2337_v21 }
  0x1c   : > { %2340 = vst [vmem:[%s3376_s26 + $0x20] sm:$0xf] %v2339_v22  ;;  %2342 = vst [vmem:[%s3376_s26 + $0x2c] sm:$0xf] %v2341_v23  ;;  %v2343_v24 = vld [vmem:[%s3371_s25 + $0x38] sm:$0xf] }
  0x1d   : > { %v2345_v25 = vld [vmem:[%s3371_s25 + $0x44] sm:$0xf]  ;;  %v2347_v26 = vld [vmem:[%s3371_s25 + $0x50] sm:$0xf]  ;;  %2344 = vst [vmem:[%s3376_s26 + $0x38] sm:$0xf] %v2343_v24 }
  0x1e   : > { %2346 = vst [vmem:[%s3376_s26 + $0x44] sm:$0xf] %v2345_v25  ;;  %2348 = vst [vmem:[%s3376_s26 + $0x50] sm:$0xf] %v2347_v26  ;;  %v2349_v27 = vld [vmem:[%s3371_s25 + $0x5c] sm:$0xf] }
  0x1f   : > { %v2351_v28 = vld [vmem:[%s3371_s25 + $0x68] sm:$0xf]  ;;  %v2353_v29 = vld [vmem:[%s3371_s25 + $0x74] sm:$0xf]  ;;  %2350 = vst [vmem:[%s3376_s26 + $0x5c] sm:$0xf] %v2349_v27 }
  0x20   : > { %2352 = vst [vmem:[%s3376_s26 + $0x68] sm:$0xf] %v2351_v28  ;;  %2354 = vst [vmem:[%s3376_s26 + $0x74] sm:$0xf] %v2353_v29  ;;  %v2355_v30 = vld [vmem:[%s3371_s25 + $0xf8] sm:$0xf] }
  0x21   : > { %v2357_v31 = vld [vmem:[%s3371_s25 + $0x104] sm:$0xf]  ;;  %v2359_v32 = vld [vmem:[%s3371_s25 + $0x110] sm:$0xf]  ;;  %2356 = vst [vmem:[%s3376_s26 + $0x80] sm:$0xf] %v2355_v30 }
  0x22   : > { %2358 = vst [vmem:[%s3376_s26 + $0x8c] sm:$0xf] %v2357_v31  ;;  %2360 = vst [vmem:[%s3376_s26 + $0x98] sm:$0xf] %v2359_v32  ;;  %v2361_v33 = vld [vmem:[%s3371_s25 + $0x11c] sm:$0xf] }
  0x23   : > { %v2363_v34 = vld [vmem:[%s3371_s25 + $0x128] sm:$0xf]  ;;  %v2365_v35 = vld [vmem:[%s3371_s25 + $0x134] sm:$0xf]  ;;  %2362 = vst [vmem:[%s3376_s26 + $0xa4] sm:$0xf] %v2361_v33 }
  0x24   : > { %2364 = vst [vmem:[%s3376_s26 + $0xb0] sm:$0xf] %v2363_v34  ;;  %2366 = vst [vmem:[%s3376_s26 + $0xbc] sm:$0xf] %v2365_v35  ;;  %v2367_v36 = vld [vmem:[%s3371_s25 + $0x140] sm:$0xf] }
  0x25   : > { %v2369_v37 = vld [vmem:[%s3371_s25 + $0x14c] sm:$0xf]  ;;  %v2371_v38 = vld [vmem:[%s3371_s25 + $0x158] sm:$0xf]  ;;  %2368 = vst [vmem:[%s3376_s26 + $0xc8] sm:$0xf] %v2367_v36 }
  0x26   : > { %2370 = vst [vmem:[%s3376_s26 + $0xd4] sm:$0xf] %v2369_v37  ;;  %2372 = vst [vmem:[%s3376_s26 + $0xe0] sm:$0xf] %v2371_v38  ;;  %v2373_v39 = vld [vmem:[%s3371_s25 + $0x164] sm:$0xf] }
  0x27   : > { %2374 = vst [vmem:[%s3376_s26 + $0xec] sm:$0xf] %v2373_v39 }
  0x28 PF: > { %p2375_p5 = scmp.ge.s32.totalorder %s3315_s14, 1  ;;  %p244_p6 = scmp.lt.s32.totalorder %s3315_s14, 3 }
  0x2a   : > { %p245_p7 = pnand %p2375_p5, %p244_p6 }
  0x2c   : > { %248 = sbr.rel (%p245_p7) target bundleno = 415 (0x19f), region = 54 }
  0x31   : > { %v3139_v40 = vld [vmem:[%s4076_s1 + $0x118] sm:$0xff]   ;;  %s251_s6 = sand.u32 1, %s3307_s12   ;;  %v3142_v43 = vld [vmem:[%s4076_s1 + $0x110] sm:$0xff]   ;;  %v3145_v46 = vld [vmem:[%s4076_s1 + $0x108] sm:$0xff]   ;;  %vm575_vm0 = vcmask 523264  }
  0x32   : > { %v3140_v41 = vld [vmem:[%s4076_s1 + $0x138] sm:$0xff]   ;;  %2792 = vmatprep.subr.bf16.mxu0 %v3139_v40  ;;  %v3143_v44 = vld [vmem:[%s4076_s1 + $0x130] sm:$0xff]   ;;  %s3114_s18 = smul.u32 240, %s251_s6  ;;  %v3146_v47 = vld [vmem:[%s4076_s1 + $0x128] sm:$0xff]  }
  0x33   : > { %v3141_v42 = vld [vmem:[%s4076_s1 + $0xd8] sm:$0xff]   ;;  %3032 = vmatprep.subr.bf16.mxu1 %v3140_v41  ;;  %v3144_v45 = vld [vmem:[%s4076_s1 + $0xd0] sm:$0xff]   ;;  %v3147_v48 = vld [vmem:[%s4076_s1 + $0xc8] sm:$0xff]  }
  0x34   : > { %2793 = vmatpush3.bf16.msra.mxu0 %v3141_v42  ;;  %3033 = vmatpush3.bf16.msra.mxu1 %v3140_v41  ;;  %v3148_v49 = vld [vmem:[%s4076_s1 + $0x100] sm:$0xff]   ;;  %s3494_s4 = scalar_lea.vmem [#allocation2], %s3114_s18  ;;  %v3152_v53 = vld [vmem:[%s4076_s1 + $0xf8] sm:$0xff]   ;;  %v3157_v58 = vld [vmem:[%s4076_s1 + $0xf0] sm:$0xff]  }
  0x35   : > { %2794 = vmatprep.subr.bf16.mxu0 %v3142_v43  ;;  %3034 = vmatprep.subr.bf16.mxu1 %v3143_v44  ;;  %v3149_v50 = vld [vmem:[%s4076_s1 + $0x120] sm:$0xff]   ;;  %v3154_v55 = vld [vmem:[%s4076_s1 + $0x78] sm:$0xff]   ;;  %v3158_v59 = vld [vmem:[%s4076_s1 + $0x70] sm:$0xff]  }
  0x36   : > { %v3150_v51 = vld [vmem:[%s4076_s1 + $0xc0] sm:$0xff]   ;;  %v3155_v56 = vld [vmem:[%s4076_s1 + $0xb8] sm:$0xff]   ;;  %v3159_v60 = vld [vmem:[%s4076_s1 + $0xb0] sm:$0xff]  }
  0x37   : > { %v3151_v52 = vld [vmem:[%s3494_s4 + $0x80] ss:$12 sps:$4 sm:$0xff]   ;;  %v3153_v54 = vld [vmem:[%s3494_s4 + $0x98] ss:$12 sps:$4 sm:$0xff]   ;;  %v3174_v13 = vld [vmem:[%s3494_s4 + $0xb0] ss:$12 sps:$4 sm:$0xff]  }
  0x38   : > { %2795 = vmatpush3.bf16.msra.mxu0 %v3144_v45  ;;  %3035 = vmatpush3.bf16.msra.mxu1 %v3143_v44  ;;  %v3156_v57 = vld [vmem:[%s4076_s1 + $0x38] sm:$0xff]   ;;  %v3160_v61 = vld [vmem:[%s4076_s1 + $0x30] sm:$0xff]   ;;  %v3161_v62 = vld [vmem:[%s4076_s1 + $0xe8] sm:$0xff]  }
  0x39   : > { %2796 = vmatprep.subr.bf16.mxu0 %v3145_v46  ;;  %3036 = vmatprep.subr.bf16.mxu1 %v3146_v47  ;;  %v3162_v63 = vld [vmem:[%s4076_s1 + $0x68] sm:$0xff]   ;;  %v3165_v2 = vld [vmem:[%s4076_s1 + $0xe0] sm:$0xff]   ;;  %v3171_v10 = vld [vmem:[%s4076_s1 + $0x58] sm:$0xff]  }
  0x3a   : > { %3040 = vmatprep.mubr.msk.bf16.mxu1 %vm575_vm0, %v3151_v52  ;;  %v3163_v0 = vld [vmem:[%s4076_s1 + $0xa8] sm:$0xff]   ;;  %v3166_v3 = vld [vmem:[%s4076_s1 + $0x60] sm:$0xff]   ;;  %v3172_v11 = vld [vmem:[%s4076_s1 + $0x98] sm:$0xff]  }
  0x3b   : > { %v3164_v1 = vld [vmem:[%s4076_s1 + $0x28] sm:$0xff]   ;;  %v3167_v4 = vld [vmem:[%s4076_s1 + $0xa0] sm:$0xff]   ;;  %v3173_v12 = vld [vmem:[%s4076_s1 + $0x18] sm:$0xff]  }
  0x3c   : > { %2797 = vmatpush3.bf16.msra.mxu0 %v3147_v48  ;;  %3037 = vmatpush3.bf16.msra.mxu1 %v3146_v47  ;;  %v3168_v5 = vld [vmem:[%s4076_s1 + $0x20] sm:$0xff]   ;;  %v2378_v6 = vld [vmem:[%s3494_s4 + $0x78] sm:$0xff]  ;;  %v3176_v15 = vld [vmem:[%s4076_s1 + $0x50] sm:$0xff]  }
  0x3d   : > { %2798 = vmatprep.subr.bf16.mxu0 %v3148_v49  ;;  %3038 = vmatprep.subr.bf16.mxu1 %v3149_v50  ;;  %v3550_v7 = vld [vmem:[%s3494_s4 + $0x84] sm:$0xff]  ;;  %v3573_v17 = vld [vmem:[%s3494_s4 + $0x90] sm:$0xff]  ;;  %v3577_v18 = vld [vmem:[%s3494_s4 + $0x9c] sm:$0xff] }
  0x3e   : > { %v2434_v8 = vcombine.low %v2378_v6, %v3550_v7  ;;  %v2435_v9 = vcombine.high %v2378_v6, %v3550_v7  ;;  %v3175_v14 = vld [vmem:[%s3494_s4 + $0xc8] ss:$12 sps:$4 sm:$0xff]   ;;  %v2438_v19 = vcombine.high %v3573_v17, %v3577_v18  ;;  %v2437_v20 = vcombine.low %v3573_v17, %v3577_v18  ;;  %v281_v29 = vld [vmem:[%s3494_s4] sm:$0xff]  ;;  %v3608_v30 = vld [vmem:[%s3494_s4 + $0xc] sm:$0xff] }
  0x3f   : > { %v3177_v16 = vld [vmem:[%s4076_s1 + $0x10] sm:$0xff]   ;;  %v3180_v21 = vld [vmem:[%s4076_s1 + $0x48] sm:$0xff]   ;;  %v3183_v24 = vld [vmem:[%s4076_s1 + $0x40] sm:$0xff]   ;;  %v2471_v31 = vcombine.high %v281_v29, %v3608_v30  ;;  %v2470_v34 = vcombine.low %v281_v29, %v3608_v30 }
  0x40   : > { %2799 = vmatpush3.bf16.msra.mxu0 %v3150_v51  ;;  %3039 = vmatpush3.bf16.msra.mxu1 %v3149_v50  ;;  %v3181_v22 = vld [vmem:[%s4076_s1 + $0x90] sm:$0xff]   ;;  %v3182_v23 = vld [vmem:[%s4076_s1 + $0x8] sm:$0xff]   ;;  %v3184_v25 = vld [vmem:[%s4076_s1] sm:$0xff]  }
  0x41   : > { %2800 = vmatprep.subr.bf16.mxu0 %v3152_v53  ;;  %2840 = vmatprep.subr.bf16.mxu1 %v3154_v55  ;;  %v3599_v26 = vld [vmem:[%s3494_s4 + $0xa8] sm:$0xff]  ;;  %v3602_v27 = vld [vmem:[%s3494_s4 + $0xb4] sm:$0xff]  ;;  %v3627_v38 = vld [vmem:[%s3494_s4 + $0xc0] sm:$0xff] }
  0x42   : > { %620 = vmatprep.mubr.bf16.mxu0 %v2435_v9  ;;  %v2441_v28 = vcombine.high %v3599_v26, %v3602_v27  ;;  %v3189_v32 = vld [vmem:[%s4076_s1 + $0x88] sm:$0xff]   ;;  %v3190_v33 = vld [vmem:[%s4076_s1 + $0x1b8] sm:$0xff]   ;;  %v2440_v35 = vcombine.low %v3599_v26, %v3602_v27  ;;  %v3192_v37 = vld [vmem:[%s4076_s1 + $0x1b0] sm:$0xff]  }
  0x43   : > { %3041 = vmatmul.mubr.msk.bf16.vlgmr.msra.gmra.mxu1 %vm575_vm0, %v3153_v54  ;;  %v3191_v36 = vld [vmem:[%s4076_s1 + $0x178] sm:$0xff]   ;;  %v3198_v44 = vld [vmem:[%s4076_s1 + $0x80] sm:$0xff]   ;;  %v3193_v45 = vld [vmem:[%s4076_s1 + $0x170] sm:$0xff]  }
  0x44   : > { %2801 = vmatpush3.bf16.msra.mxu0 %v3155_v56  ;;  %2841 = vmatpush3.bf16.msra.mxu1 %v3156_v57  ;;  %v3630_v39 = vld [vmem:[%s3494_s4 + $0xcc] sm:$0xff]  ;;  %v3633_v40 = vld [vmem:[%s3494_s4 + $0x18] sm:$0xff]  ;;  %v3636_v41 = vld [vmem:[%s3494_s4 + $0x24] sm:$0xff] }
  0x45   : > { %2802 = vmatprep.subr.bf16.mxu0 %v3157_v58  ;;  %2842 = vmatprep.subr.bf16.mxu1 %v3158_v59  ;;  %v2444_v42 = vcombine.high %v3627_v38, %v3630_v39  ;;  %v3642_v43 = vcombine.high %v3633_v40, %v3636_v41  ;;  %v3199_v46 = vld [vmem:[%s4076_s1 + $0x1a8] sm:$0xff]   ;;  %v2443_v48 = vcombine.low %v3627_v38, %v3630_v39  ;;  %v3201_v50 = vld [vmem:[%s4076_s1 + $0x1a0] sm:$0xff]   ;;  %v3205_v55 = vld [vmem:[%s4076_s1 + $0x258] sm:$0xff]  }
  0x46   : > { %3044 = vmatprep.mubr.msk.bf16.mxu1 %vm575_vm0, %v3174_v13  ;;  %v3200_v47 = vld [vmem:[%s4076_s1 + $0x168] sm:$0xff]   ;;  %v3661_v49 = vcombine.low %v3633_v40, %v3636_v41  ;;  %v3667_v51 = vld [vmem:[%s3494_s4 + $0x30] sm:$0xff]  ;;  %v3208_v58 = vld [vmem:[%s4076_s1 + $0x198] sm:$0xff]  }
  0x47   : > { %v3670_v52 = vld [vmem:[%s3494_s4 + $0x3c] sm:$0xff]  ;;  %v3204_v54 = vld [vmem:[%s3494_s4 + $0x8] ss:$12 sps:$4 sm:$0xff]  }
  0x48   : > { %2803 = vmatpush3.bf16.msra.mxu0 %v3159_v60  ;;  %2843 = vmatpush3.bf16.msra.mxu1 %v3160_v61  ;;  %v3674_v53 = vcombine.high %v3667_v51, %v3670_v52  ;;  %v3202_v56 = vld [vmem:[%s4076_s1 + $0x160] sm:$0xff]   ;;  %v3209_v59 = vld [vmem:[%s4076_s1 + $0x218] sm:$0xff]   ;;  %v3695_v60 = vcombine.low %v3667_v51, %v3670_v52  ;;  %v3217_v6 = vld [vmem:[%s4076_s1 + $0x248] sm:$0xff]  }
  0x49   : > { %2804 = vmatprep.subr.bf16.mxu0 %v3161_v62  ;;  %2844 = vmatprep.subr.bf16.mxu1 %v3162_v63  ;;  %v3207_v57 = vld [vmem:[%s3494_s4 + $0x20] ss:$12 sps:$4 sm:$0xff]  }
  0x4a   : > { %v3210_v61 = vld [vmem:[%s4076_s1 + $0x158] sm:$0xff]   ;;  %v3211_v62 = vld [vmem:[%s4076_s1 + $0x250] sm:$0xff]   ;;  %v3223_v13 = vld [vmem:[%s4076_s1 + $0x240] sm:$0xff]  }
  0x4b   : > { %3045 = vmatmul.mubr.msk.bf16.gmra.mxu1 %vm575_vm0, %v3175_v14  ;;  %v3212_v63 = vld [vmem:[%s4076_s1 + $0x190] sm:$0xff]   ;;  %v2547_v14 = vcombine.high %v3608_v30, %v3633_v40 }
  0x4c   : > { %2805 = vmatpush3.bf16.msra.mxu0 %v3163_v0  ;;  %2845 = vmatpush3.bf16.msra.mxu1 %v3164_v1  ;;  %v3213_v0 = vld [vmem:[%s4076_s1 + $0x210] sm:$0xff]  }
  0x4d   : > { %2806 = vmatprep.subr.bf16.mxu0 %v3165_v2  ;;  %2846 = vmatprep.subr.bf16.mxu1 %v3166_v3  ;;  %v3214_v1 = vld [vmem:[%s4076_s1 + $0x150] sm:$0xff]   ;;  %v3713_v2 = vld [vmem:[%s3494_s4 + $0x48] sm:$0xff] }
  0x4e   : > { %942 = vmatprep.mubr.bf16.mxu1 %v2471_v31  ;;  %v3718_v3 = vld [vmem:[%s3494_s4 + $0x54] sm:$0xff] }
  0x4f   : > { %v3733_v9 = vcombine.low %v3713_v2, %v3718_v3  ;;  %v3233_v29 = vld [vmem:[%s4076_s1 + $0x1f0] sm:$0xff]  }
  0x50   : > { %2807 = vmatpush3.bf16.msra.mxu0 %v3167_v4  ;;  %2847 = vmatpush3.bf16.msra.mxu1 %v3168_v5  ;;  %v3722_v4 = vcombine.high %v3713_v2, %v3718_v3  ;;  %v3216_v5 = vld [vmem:[%s3494_s4 + $0x38] ss:$12 sps:$4 sm:$0xff]  }
  0x51   : > { %2848 = vmatprep.subr.bf16.mxu1 %v3171_v10  ;;  %3048 = vmatprep.subr.bf16.mxu0 %v3172_v11  ;;  %v3220_v10 = vld [vmem:[%s4076_s1 + $0x188] sm:$0xff]   ;;  %v3238_v31 = vld [vmem:[%s4076_s1 + $0x1d0] sm:$0xff]  }
  0x53   : > { %621 = vmatmul.mubr.bf16.vlgmr.msra.gmra.mxu0 %v2434_v8  ;;  %v3219_v8 = vld [vmem:[%s3494_s4 + $0x50] ss:$12 sps:$4 sm:$0xff]  }
  0x54   : > { %2849 = vmatpush3.bf16.msra.mxu1 %v3173_v12  ;;  %3049 = vmatpush3.bf16.msra.mxu0 %v3172_v11  ;;  %v3221_v11 = vld [vmem:[%s4076_s1 + $0x208] sm:$0xff]  }
  0x55   : > { %2850 = vmatprep.subr.bf16.mxu1 %v3176_v15  ;;  %628 = vmatprep.mubr.bf16.mxu0 %v2438_v19  ;;  %v3222_v12 = vld [vmem:[%s4076_s1 + $0x148] sm:$0xff]   ;;  %v2639_v15 = vcombine.high %v3550_v7, %v3573_v17  ;;  %v3225_v19 = vld [vmem:[%s4076_s1 + $0x200] sm:$0xff]  }
  0x56   : > { %3050 = vmatprep.subr.bf16.mxu0 %v3181_v22 }
  0x58   : > { %2851 = vmatpush3.bf16.msra.mxu1 %v3177_v16  ;;  %3051 = vmatpush3.bf16.msra.mxu0 %v3181_v22  ;;  %v3224_v16 = vld [vmem:[%s4076_s1 + $0x180] sm:$0xff]   ;;  %v2546_v22 = vcombine.low %v3608_v30, %v3633_v40  ;;  %v3235_v30 = vld [vmem:[%s4076_s1 + $0x228] sm:$0xff]   ;;  %v3244_v40 = vld [vmem:[%s4076_s1 + $0x2f8] sm:$0xff]  }
  0x59   : > { %2852 = vmatprep.subr.bf16.mxu1 %v3180_v21  ;;  %3052 = vmatprep.subr.bf16.mxu0 %v3189_v32  ;;  %v3229_v21 = vld [vmem:[%s4076_s1 + $0x238] sm:$0xff]  }
  0x5b   : > { %629 = vmatmul.mubr.bf16.gmra.mxu0 %v2437_v20  ;;  %v3226_v20 = vld [vmem:[%s4076_s1 + $0x140] sm:$0xff]  }
  0x5c   : > { %2853 = vmatpush3.bf16.msra.mxu1 %v3182_v23  ;;  %636 = vmatprep.mubr.bf16.mxu0 %v2441_v28  ;;  %v3230_v23 = vld [vmem:[%s4076_s1 + $0x1f8] sm:$0xff]   ;;  %v2550_v28 = vcombine.high %v3636_v41, %v3667_v51 }
  0x5d   : > { %2854 = vmatprep.subr.bf16.mxu1 %v3183_v24  ;;  %3053 = vmatpush3.bf16.msra.mxu0 %v3189_v32  ;;  %v3231_v24 = vld [vmem:[%s4076_s1 + $0x1d8] sm:$0xff]   ;;  %v2549_v32 = vcombine.low %v3636_v41, %v3667_v51  ;;  %v3807_v41 = vld [vmem:[%s3494_s4 + $0x60] sm:$0xff] }
  0x5e   : > { %3054 = vmatprep.subr.bf16.mxu0 %v3198_v44  ;;  %v3264_v51 = vld [vmem:[%s4076_s1 + $0x278] sm:$0xff]  }
  0x60   : > { %2855 = vmatpush3.bf16.msra.mxu1 %v3184_v25  ;;  %v3232_v25 = vld [vmem:[%s4076_s1 + $0x230] sm:$0xff]  }
  0x61   : > { %2888 = vmatprep.subr.bf16.mxu1 %v3190_v33  ;;  %3055 = vmatpush3.bf16.msra.mxu0 %v3198_v44  ;;  %v3237_v33 = vld [vmem:[%s4076_s1 + $0x1e8] sm:$0xff]   ;;  %v2552_v44 = vcombine.low %v3670_v52, %v3713_v2 }
  0x62   : > { %2936 = vmatprep.subr.bf16.mxu0 %v3205_v55  ;;  %v3255_v55 = vld [vmem:[%s4076_s1 + $0x2a8] sm:$0xff]  }
  0x63   : > { %637 = vmatmul.mubr.bf16.gmra.mxu0 %v2440_v35  ;;  %943 = vmatmul.mubr.bf16.vlgmr.msra.gmra.mxu1 %v2470_v34  ;;  %v2553_v34 = vcombine.high %v3670_v52, %v3713_v2  ;;  %v3239_v35 = vld [vmem:[%s4076_s1 + $0x220] sm:$0xff]   ;;  %v2641_v52 = vcombine.low %v3577_v18, %v3599_v26 }
  0x64   : > { %2889 = vmatpush3.bf16.msra.mxu1 %v3191_v36  ;;  %644 = vmatprep.mubr.bf16.mxu0 %v2444_v42  ;;  %v3247_v36 = vld [vmem:[%s4076_s1 + $0x1c8] sm:$0xff]   ;;  %v2638_v42 = vcombine.low %v3550_v7, %v3573_v17  ;;  %v3248_v7 = vld [vmem:[%s4076_s1 + $0x2f0] sm:$0xff]   ;;  %v2556_v17 = vcombine.high %v3718_v3, %v3807_v41 }
  0x65   : > { %2890 = vmatprep.subr.bf16.mxu1 %v3192_v37  ;;  %950 = vmatprep.mubr.bf16.mxu1 %v3642_v43  ;;  %v3240_v37 = vld [vmem:[%s4076_s1 + $0x1e0] sm:$0xff]  }
  0x68   : > { %2891 = vmatpush3.bf16.msra.mxu1 %v3193_v45  ;;  %v3256_v45 = vld [vmem:[%s4076_s1 + $0x1c0] sm:$0xff]  }
  0x69   : > { %2892 = vmatprep.subr.bf16.mxu1 %v3199_v46  ;;  %v3246_v46 = vld [vmem:[%s4076_s1 + $0x2b8] sm:$0xff]  }
  0x6b   : > { %645 = vmatmul.mubr.bf16.gmra.mxu0 %v2443_v48  ;;  %951 = vmatmul.mubr.bf16.gmra.mxu1 %v3661_v49  ;;  %v3249_v48 = vld [vmem:[%s4076_s1 + $0x2b0] sm:$0xff]  }
  0x6c   : > { %2893 = vmatpush3.bf16.msra.mxu1 %v3200_v47  ;;  %958 = vmatprep.mubr.bf16.mxu1 %v3674_v53  ;;  %v2642_v47 = vcombine.high %v3577_v18, %v3599_v26  ;;  %v3260_v18 = vld [vmem:[%s3494_s4 + $0x14] ss:$12 sps:$4 sm:$0xff]  }
  0x6d   : > { %2894 = vmatprep.subr.bf16.mxu1 %v3201_v50  ;;  %3056 = vmatprep.mubr.msk.bf16.mxu0 %vm575_vm0, %v3204_v54  ;;  %v3253_v50 = vld [vmem:[%s4076_s1 + $0x2e8] sm:$0xff]   ;;  %v2555_v54 = vcombine.low %v3718_v3, %v3807_v41  ;;  %v3258_v26 = vld [vmem:[%s4076_s1 + $0x2a0] sm:$0xff]  }
  0x6e   : > { %v3270_v3 = vld [vmem:[%s3494_s4 + $0x44] ss:$12 sps:$4 sm:$0xff]  }
  0x70   : > { %2895 = vmatpush3.bf16.msra.mxu1 %v3202_v56  ;;  %v2645_v56 = vcombine.high %v3602_v27, %v3627_v38 }
  0x71   : > { %2896 = vmatprep.subr.bf16.mxu1 %v3208_v58  ;;  %v3262_v58 = vld [vmem:[%s4076_s1 + $0x2d8] sm:$0xff]  }
  0x73   : > { %959 = vmatmul.mubr.bf16.gmra.mxu1 %v3695_v60  ;;  %3057 = vmatmul.mubr.msk.bf16.vlgmr.msra.gmra.mxu0 %vm575_vm0, %v3207_v57  ;;  %v3257_v57 = vld [vmem:[%s4076_s1 + $0x2e0] sm:$0xff]  }
  0x74   : > { %2937 = vmatpush3.bf16.msra.mxu0 %v3209_v59  ;;  %2897 = vmatpush3.bf16.msra.mxu1 %v3210_v61  ;;  %v3263_v59 = vld [vmem:[%s3494_s4 + $0x2c] ss:$12 sps:$4 sm:$0xff]  }
  0x75   : > { %2938 = vmatprep.subr.bf16.mxu0 %v3211_v62  ;;  %2898 = vmatprep.subr.bf16.mxu1 %v3212_v63  ;;  %v3265_v61 = vld [vmem:[%s4076_s1 + $0x298] sm:$0xff]   ;;  %v2644_v62 = vcombine.low %v3602_v27, %v3627_v38  ;;  %v3268_v27 = vld [vmem:[%s4076_s1 + $0x290] sm:$0xff]   ;;  %v3272_v38 = vld [vmem:[%s4076_s1 + $0x2c8] sm:$0xff]  }
  0x76   : > { %966 = vmatprep.mubr.bf16.mxu1 %v3722_v4  ;;  %3060 = vmatprep.mubr.msk.bf16.mxu0 %vm575_vm0, %v3216_v5  ;;  %v2596_v63 = vld [vmem:[%s3494_s4 + $0xd8] sm:$0xff] }
  0x77   : > { %v2648_v2 = vcombine.high %v3630_v39, %v2596_v63  ;;  %v3274_v5 = vld [vmem:[%s4076_s1 + $0x268] sm:$0xff]  }
  0x78   : > { %2939 = vmatpush3.bf16.msra.mxu0 %v3213_v0  ;;  %2899 = vmatpush3.bf16.msra.mxu1 %v3214_v1  ;;  %v3266_v0 = vld [vmem:[%s4076_s1 + $0x2d0] sm:$0xff]  }
  0x79   : > { %2940 = vmatprep.subr.bf16.mxu0 %v3217_v6  ;;  %2900 = vmatprep.subr.bf16.mxu1 %v3220_v10  ;;  %v3267_v1 = vld [vmem:[%s4076_s1 + $0x270] sm:$0xff]   ;;  %v3273_v6 = vld [vmem:[%s3494_s4 + $0x5c] ss:$12 sps:$4 sm:$0xff]  }
  0x7a   : > { %v3275_v10 = vld [vmem:[%s4076_s1 + $0x288] sm:$0xff]  }
  0x7b   : > { %967 = vmatmul.mubr.bf16.gmra.mxu1 %v3733_v9  ;;  %3061 = vmatmul.mubr.msk.bf16.gmra.mxu0 %vm575_vm0, %v3219_v8  ;;  %v2647_v8 = vcombine.low %v3630_v39, %v2596_v63  ;;  %v3278_v39 = vld [vmem:[%s4076_s1 + $0x280] sm:$0xff]  }
  0x7c   : > { %2941 = vmatpush3.bf16.msra.mxu0 %v3221_v11  ;;  %2901 = vmatpush3.bf16.msra.mxu1 %v3222_v12  ;;  %v3276_v11 = vld [vmem:[%s4076_s1 + $0x2c0] sm:$0xff]  }
  0x7d   : > { %2942 = vmatprep.subr.bf16.mxu0 %v3223_v13  ;;  %2902 = vmatprep.subr.bf16.mxu1 %v3224_v16  ;;  %v3277_v12 = vld [vmem:[%s4076_s1 + $0x260] sm:$0xff]   ;;  %v3279_v13 = vld [vmem:[%s3494_s4 + $0x8c] ss:$12 sps:$4 sm:$0xff]   ;;  %v3282_v16 = vld [vmem:[%s4076_s1 + $0x310] sm:$0xff]  }
  0x7e   : > { %1321 = vmatprep.mubr.bf16.mxu1 %v2547_v14  ;;  %1708 = vmatprep.mubr.bf16.mxu0 %v2639_v15  ;;  %v3281_v14 = vld [vmem:[%s4076_s1 + $0x318] sm:$0xff]   ;;  %v3280_v15 = vld [vmem:[%s3494_s4 + $0xa4] ss:$12 sps:$4 sm:$0xff]  }
  0x80   : > { %2943 = vmatpush3.bf16.msra.mxu0 %v3225_v19  ;;  %2903 = vmatpush3.bf16.msra.mxu1 %v3226_v20  ;;  %v3283_v19 = vld [vmem:[%s3494_s4 + $0xbc] ss:$12 sps:$4 sm:$0xff]   ;;  %v3284_v20 = vld [vmem:[%s3494_s4 + $0xd4] ss:$12 sps:$4 sm:$0xff]  }
  0x81   : > { %2944 = vmatprep.subr.bf16.mxu0 %v3229_v21  ;;  %3064 = vmatprep.subr.bf16.mxu1 %v3231_v24  ;;  %v3287_v21 = vld [vmem:[%s3494_s4 + $0x20] ss:$12 sps:$4 sm:$0xff]  }
  0x83   : > { %1322 = vmatmul.mubr.bf16.vlgmr.msra.gmra.mxu1 %v2546_v22  ;;  %v3288_v22 = vld [vmem:[%s3494_s4 + $0x38] ss:$12 sps:$4 sm:$0xff]  }
  0x84   : > { %2945 = vmatpush3.bf16.msra.mxu0 %v3230_v23  ;;  %3065 = vmatpush3.bf16.msra.mxu1 %v3231_v24  ;;  %v3291_v24 = vld [vmem:[%s3494_s4 + $0x50] ss:$12 sps:$4 sm:$0xff]  }
  0x85   : > { %2946 = vmatprep.subr.bf16.mxu0 %v3232_v25  ;;  %1329 = vmatprep.mubr.bf16.mxu1 %v2550_v28  ;;  %v3292_v25 = vld [vmem:[%s3494_s4 + $0x68] ss:$12 sps:$4 sm:$0xff]  }
  0x86   : > { %3066 = vmatprep.subr.bf16.mxu1 %v3238_v31 }
  0x88   : > { %2947 = vmatpush3.bf16.msra.mxu0 %v3233_v29  ;;  %3067 = vmatpush3.bf16.msra.mxu1 %v3238_v31 }
  0x89   : > { %2948 = vmatprep.subr.bf16.mxu0 %v3235_v30  ;;  %3068 = vmatprep.subr.bf16.mxu1 %v3247_v36 }
  0x8b   : > { %1330 = vmatmul.mubr.bf16.gmra.mxu1 %v2549_v32 }
  0x8c   : > { %2949 = vmatpush3.bf16.msra.mxu0 %v3237_v33  ;;  %1337 = vmatprep.mubr.bf16.mxu1 %v2553_v34 }
  0x8d   : > { %2950 = vmatprep.subr.bf16.mxu0 %v3239_v35  ;;  %3069 = vmatpush3.bf16.msra.mxu1 %v3247_v36 }
  0x8e   : > { %3070 = vmatprep.subr.bf16.mxu1 %v3256_v45 }
  0x90   : > { %2951 = vmatpush3.bf16.msra.mxu0 %v3240_v37 }
  0x91   : > { %2984 = vmatprep.subr.bf16.mxu0 %v3244_v40  ;;  %3071 = vmatpush3.bf16.msra.mxu1 %v3256_v45 }
  0x92   : > { %3080 = vmatprep.subr.bf16.mxu1 %v3264_v51 }
  0x93   : > { %1709 = vmatmul.mubr.bf16.vlgmr.msra.gmra.mxu0 %v2638_v42  ;;  %1338 = vmatmul.mubr.bf16.gmra.mxu1 %v2552_v44 }
  0x94   : > { %2985 = vmatpush3.bf16.msra.mxu0 %v3246_v46  ;;  %1716 = vmatprep.mubr.bf16.mxu0 %v2642_v47 }
  0x95   : > { %2986 = vmatprep.subr.bf16.mxu0 %v3248_v7  ;;  %1345 = vmatprep.mubr.bf16.mxu1 %v2556_v17 }
  0x98   : > { %2987 = vmatpush3.bf16.msra.mxu0 %v3249_v48 }
  0x99   : > { %2988 = vmatprep.subr.bf16.mxu0 %v3253_v50 }
  0x9b   : > { %1717 = vmatmul.mubr.bf16.gmra.mxu0 %v2641_v52  ;;  %1346 = vmatmul.mubr.bf16.gmra.mxu1 %v2555_v54 }
  0x9c   : > { %2989 = vmatpush3.bf16.msra.mxu0 %v3255_v55  ;;  %1724 = vmatprep.mubr.bf16.mxu0 %v2645_v56 }
  0x9d   : > { %2990 = vmatprep.subr.bf16.mxu0 %v3257_v57  ;;  %3072 = vmatprep.mubr.msk.bf16.mxu1 %vm575_vm0, %v3260_v18 }
  0xa0   : > { %2991 = vmatpush3.bf16.msra.mxu0 %v3258_v26 }
  0xa1   : > { %2992 = vmatprep.subr.bf16.mxu0 %v3262_v58 }
  0xa3   : > { %1725 = vmatmul.mubr.bf16.gmra.mxu0 %v2644_v62  ;;  %3073 = vmatmul.mubr.msk.bf16.vlgmr.msra.gmra.mxu1 %vm575_vm0, %v3263_v59 }
  0xa4   : > { %2993 = vmatpush3.bf16.msra.mxu0 %v3265_v61  ;;  %3081 = vmatpush3.bf16.msra.mxu1 %v3264_v51 }
  0xa5   : > { %2994 = vmatprep.subr.bf16.mxu0 %v3266_v0  ;;  %3082 = vmatprep.subr.bf16.mxu1 %v3267_v1 }
  0xa6   : > { %1732 = vmatprep.mubr.bf16.mxu0 %v2648_v2  ;;  %3076 = vmatprep.mubr.msk.bf16.mxu1 %vm575_vm0, %v3270_v3 }
  0xa8   : > { %2995 = vmatpush3.bf16.msra.mxu0 %v3268_v27  ;;  %3083 = vmatpush3.bf16.msra.mxu1 %v3267_v1 }
  0xa9   : > { %2996 = vmatprep.subr.bf16.mxu0 %v3272_v38  ;;  %3084 = vmatprep.subr.bf16.mxu1 %v3274_v5 }
  0xab   : > { %1733 = vmatmul.mubr.bf16.gmra.mxu0 %v2647_v8  ;;  %3077 = vmatmul.mubr.msk.bf16.gmra.mxu1 %vm575_vm0, %v3273_v6 }
  0xac   : > { %2997 = vmatpush3.bf16.msra.mxu0 %v3275_v10  ;;  %3085 = vmatpush3.bf16.msra.mxu1 %v3274_v5 }
  0xad   : > { %2998 = vmatprep.subr.bf16.mxu0 %v3276_v11  ;;  %3086 = vmatprep.subr.bf16.mxu1 %v3277_v12 }
  0xae   : > { %2095 = vmatprep.mubr.bf16.mxu0 %v3642_v43  ;;  %3088 = vmatprep.mubr.msk.bf16.mxu1 %vm575_vm0, %v3279_v13  ;;  %v3285_v43 = vld [vmem:[%s4076_s1 + $0x308] sm:$0xff]  }
  0xb0   : > { %2999 = vmatpush3.bf16.msra.mxu0 %v3278_v39  ;;  %3087 = vmatpush3.bf16.msra.mxu1 %v3277_v12 }
  0xb1   : > { %3096 = vmatprep.subr.bf16.mxu1 %v3281_v14 }
  0xb3   : > { %2096 = vmatmul.mubr.bf16.vlgmr.msra.gmra.mxu0 %v3661_v49  ;;  %3089 = vmatmul.mubr.msk.bf16.vlgmr.msra.gmra.mxu1 %vm575_vm0, %v3280_v15  ;;  %v3286_v49 = vld [vmem:[%s4076_s1 + $0x300] sm:$0xff]  }
  0xb4   : > { %3097 = vmatpush3.bf16.msra.mxu1 %v3281_v14  ;;  %2103 = vmatprep.mubr.bf16.mxu0 %v3674_v53  ;;  %v1828_v53 = vld [vmem:[%s3494_s4 + $0x6c] sm:$0xff]  ;;  %s4004_s4 = sshll.u32 %s2330_s15, 3 }
  0xb5   : > { %3098 = vmatprep.subr.bf16.mxu1 %v3282_v16  ;;  %3092 = vmatprep.mubr.msk.bf16.mxu1 %vm575_vm0, %v3283_v19  ;;  %v2724_v23 = vcombine.high %v3807_v41, %v1828_v53  ;;  %p275_p8 = scmp.lt.s32.totalorder %s4004_s4, 15 }
  0xb7   : > { %s4099_s4 = smov (!%p275_p8, %s4004_s4), 15 }
  0xb8   : > { %3099 = vmatpush3.bf16.msra.mxu1 %v3282_v16  ;;  %s2377_s18 = sshll.u32 %s4099_s4, 2 }
  0xb9   : > { %3100 = vmatprep.subr.bf16.mxu1 %v3285_v43  ;;  %s4053_s21 = scalar_lea.vmem %s4078_s3, %s2377_s18 }
  0xbb   : > { %2104 = vmatmul.mubr.bf16.gmra.mxu0 %v3695_v60  ;;  %3093 = vmatmul.mubr.msk.bf16.gmra.mxu1 %vm575_vm0, %v3284_v20  ;;  %v2723_v60 = vcombine.low %v3807_v41, %v1828_v53 }
  0xbc   : > { %3101 = vmatpush3.bf16.msra.mxu1 %v3285_v43  ;;  %2111 = vmatprep.mubr.bf16.mxu0 %v3722_v4 }
  0xbd   : > { %3102 = vmatprep.subr.bf16.mxu1 %v3286_v49  ;;  %3104 = vmatprep.mubr.msk.bf16.mxu1 %vm575_vm0, %v3287_v21 }
  0xc0   : > { %3103 = vmatpush3.bf16.msra.mxu1 %v3286_v49 }
  0xc3   : > { %2112 = vmatmul.mubr.bf16.gmra.mxu0 %v3733_v9  ;;  %3105 = vmatmul.mubr.msk.bf16.vlgmr.msra.gmra.mxu1 %vm575_vm0, %v3288_v22 }
  0xc4   : > { %2119 = vmatprep.mubr.bf16.mxu0 %v2724_v23  ;;  %3108 = vmatprep.mubr.msk.bf16.mxu1 %vm575_vm0, %v3291_v24 }
  0xcb   : > { %2120 = vmatmul.mubr.bf16.gmra.mxu0 %v2723_v60  ;;  %3109 = vmatmul.mubr.msk.bf16.gmra.mxu1 %vm575_vm0, %v3292_v25 }
 0x103   : > { %v3042_v4 = vpop.f32.mrf.mxu1 }
 0x105   : > { %v687_v28 = vpop.f32.mrf.mxu1 }
 0x107   : > { %v3043_v29 = vpop.f32.mrf.mxu1 }
 0x109   : > { %v690_v31 = vpop.f32.mrf.mxu1 }
 0x10b   : > { %v3046_v34 = vpop.f32.mrf.mxu1 }
 0x10d   : > { %v703_v37 = vpop.f32.mrf.mxu1 }
 0x10f   : > { %v3047_v41 = vpop.f32.mrf.mxu1 }
 0x111   : > { %v706_v17 = vpop.f32.mrf.mxu1 }
 0x113   : > { %v2808_v30 = vpop.f32.mrf.mxu0 }
 0x115   : > { %v2809_v32 = vpop.f32.mrf.mxu0 }
 0x116   : > { %v2810_v33 = vadd.f32 %v2809_v32, %v2808_v30 }
 0x117   : > { %v2811_v9 = vpop.f32.mrf.mxu0 }
 0x118   : > { %v688_v35 = vadd.f32 %v2810_v33, %v687_v28 }
 0x119   : > { %v2812_v36 = vpop.f32.mrf.mxu0 }
 0x11a   : > { %v2813_v40 = vadd.f32 %v2812_v36, %v2811_v9 }
 0x11b   : > { %v2814_v42 = vpop.f32.mrf.mxu0 }
 0x11c   : > { %v691_v44 = vadd.f32 %v2813_v40, %v690_v31 }
 0x11d   : > { %v2815_v45 = vpop.f32.mrf.mxu0 }
 0x11e   : > { %v2816_v46 = vadd.f32 %v2815_v45, %v2814_v42 }
 0x11f   : > { %v2817_v47 = vpop.f32.mrf.mxu0 }
 0x120   : > { %v696_v7 = vadd.f32 %v3042_v4, %v2816_v46 }
 0x121   : > { %v2818_v48 = vpop.f32.mrf.mxu0 }
 0x122   : > { %v2819_v50 = vadd.f32 %v2818_v48, %v2817_v47 }
 0x123   : > { %v2820_v51 = vpop.f32.mrf.mxu0  ;;  %v2856_v52 = vpop.f32.mrf.mxu1 }
 0x124   : > { %v699_v54 = vadd.f32 %v3043_v29, %v2819_v50 }
 0x125   : > { %v2821_v55 = vpop.f32.mrf.mxu0  ;;  %v2857_v56 = vpop.f32.mrf.mxu1 }
 0x126   : > { %v2822_v57 = vadd.f32 %v2821_v55, %v2820_v51  ;;  %v2858_v18 = vadd.f32 %v2857_v56, %v2856_v52 }
 0x127   : > { %v2823_v26 = vpop.f32.mrf.mxu0  ;;  %v2859_v58 = vpop.f32.mrf.mxu1 }
 0x128   : > { %v704_v59 = vadd.f32 %v2822_v57, %v703_v37  ;;  %v945_v61 = vadd.f32 %v2858_v18, %v688_v35 }
 0x129   : > { %v2824_v62 = vpop.f32.mrf.mxu0  ;;  %v2860_v63 = vpop.f32.mrf.mxu1 }
 0x12a   : > { %v2825_v0 = vadd.f32 %v2824_v62, %v2823_v26  ;;  %v2861_v1 = vadd.f32 %v2860_v63, %v2859_v58 }
 0x12b   : > { %v2826_v2 = vpop.f32.mrf.mxu0  ;;  %v2862_v3 = vpop.f32.mrf.mxu1 }
 0x12c   : > { %v707_v27 = vadd.f32 %v2825_v0, %v706_v17  ;;  %v3933_v38 = vadd.f32 %v2861_v1, %v691_v44 }
 0x12d   : > { %v2827_v5 = vpop.f32.mrf.mxu0  ;;  %v2863_v6 = vpop.f32.mrf.mxu1 }
 0x12e   : > { %v2828_v8 = vadd.f32 %v2827_v5, %v2826_v2  ;;  %v2864_v10 = vadd.f32 %v2863_v6, %v2862_v3 }
 0x12f   : > { %v2829_v11 = vpop.f32.mrf.mxu0  ;;  %v2865_v12 = vpop.f32.mrf.mxu1 }
 0x130   : > { %v712_v13 = vadd.f32 %v3046_v34, %v2828_v8  ;;  %v953_v39 = vadd.f32 %v2864_v10, %v696_v7 }
 0x131   : > { %v2830_v14 = vpop.f32.mrf.mxu0  ;;  %v2866_v15 = vpop.f32.mrf.mxu1 }
 0x132   : > { %v2831_v16 = vadd.f32 %v2830_v14, %v2829_v11  ;;  %v2867_v19 = vadd.f32 %v2866_v15, %v2865_v12 }
 0x133   : > { %v2868_v43 = vpop.f32.mrf.mxu1  ;;  %v3058_v20 = vpop.f32.mrf.mxu0 }
 0x134   : > { %v715_v49 = vadd.f32 %v3047_v41, %v2831_v16  ;;  %v3935_v21 = vadd.f32 %v3058_v20, %v953_v39  ;;  %v3937_v53 = vadd.f32 %v2867_v19, %v699_v54 }
 0x135   : > { %v2869_v22 = vpop.f32.mrf.mxu1  ;;  %v1009_v23 = vpop.f32.mrf.mxu0 }
 0x136   : > { %v2870_v24 = vadd.f32 %v2869_v22, %v2868_v43  ;;  %v1010_v60 = vadd.f32 %v1009_v23, %v945_v61 }
 0x137   : > { %v2871_v25 = vpop.f32.mrf.mxu1  ;;  %v3939_v4 = vpop.f32.mrf.mxu0 }
 0x138   : > { %v961_v28 = vadd.f32 %v2870_v24, %v704_v59 }
 0x139   : > { %v2872_v29 = vpop.f32.mrf.mxu1  ;;  %v3941_v30 = vpop.f32.mrf.mxu0 }
 0x13a   : > { %v2873_v31 = vadd.f32 %v2872_v29, %v2871_v25 }
 0x13b   : > { %v2874_v32 = vpop.f32.mrf.mxu1  ;;  %v3062_v33 = vpop.f32.mrf.mxu0 }
 0x13c   : > { %v3943_v34 = vadd.f32 %v2873_v31, %v707_v27 }
 0x13d   : > { %v2875_v9 = vpop.f32.mrf.mxu1  ;;  %v1025_v35 = vpop.f32.mrf.mxu0 }
 0x13e   : > { %v2876_v36 = vadd.f32 %v2875_v9, %v2874_v32  ;;  %v3945_v37 = vadd.f32 %v1025_v35, %v961_v28 }
 0x13f   : > { %v2877_v40 = vpop.f32.mrf.mxu1  ;;  %v3063_v7 = vpop.f32.mrf.mxu0 }
 0x140   : > { %4079 = vst [vmem:[#allocation3_spill] sm:$0xff] %v3945_v37  ;;  %v969_v42 = vadd.f32 %v2876_v36, %v712_v13 }
 0x141   : > { %v2878_v44 = vpop.f32.mrf.mxu1  ;;  %v3953_v56 = vpop.f32.mrf.mxu0 }
 0x142   : > { %v2879_v41 = vadd.f32 %v2878_v44, %v2877_v40  ;;  %v3947_v45 = vadd.f32 %v3062_v33, %v969_v42 }
 0x143   : > { %v2904_v46 = vpop.f32.mrf.mxu1 }
 0x144   : > { %4080 = vst [vmem:[#allocation4_spill] sm:$0xff] %v3947_v45  ;;  %v972_v47 = vadd.f32 %v2879_v41, %v715_v49 }
 0x145   : > { %v2905_v17 = vpop.f32.mrf.mxu1 }
 0x146   : > { %v3949_v48 = vadd.f32 %v3063_v7, %v972_v47  ;;  %v2906_v13 = vadd.f32 %v2905_v17, %v2904_v46 }
 0x147   : > { %v3951_v50 = vpop.f32.mrf.mxu1 }
 0x148   : > { %4081 = vst [vmem:[#allocation5_spill] sm:$0xff] %v3949_v48 }
 0x149   : > { %v2908_v51 = vpop.f32.mrf.mxu1 }
 0x14a   : > { %v2909_v37 = vadd.f32 %v2908_v51, %v3951_v50 }
 0x14b   : > { %v2910_v52 = vpop.f32.mrf.mxu1 }
 0x14d   : > { %v2911_v54 = vpop.f32.mrf.mxu1 }
 0x14e   : > { %v2912_v47 = vadd.f32 %v2911_v54, %v2910_v52 }
 0x14f   : > { %v2913_v55 = vpop.f32.mrf.mxu1 }
 0x151   : > { %v2914_v57 = vpop.f32.mrf.mxu1 }
 0x153   : > { %v2952_v18 = vpop.f32.mrf.mxu0  ;;  %v3955_v26 = vpop.f32.mrf.mxu1 }
 0x155   : > { %v2953_v58 = vpop.f32.mrf.mxu0  ;;  %v3957_v59 = vpop.f32.mrf.mxu1 }
 0x157   : > { %v3959_v61 = vpop.f32.mrf.mxu0  ;;  %v3961_v62 = vpop.f32.mrf.mxu1 }
 0x159   : > { %v3963_v63 = vpop.f32.mrf.mxu0  ;;  %v3965_v0 = vpop.f32.mrf.mxu1 }
 0x15b   : > { %v2958_v1 = vpop.f32.mrf.mxu0  ;;  %v2922_v2 = vpop.f32.mrf.mxu1 }
 0x15d   : > { %v2959_v3 = vpop.f32.mrf.mxu0  ;;  %v2923_v27 = vpop.f32.mrf.mxu1 }
 0x15f   : > { %v2961_v5 = vpop.f32.mrf.mxu0  ;;  %v3967_v6 = vpop.f32.mrf.mxu1 }
 0x161   : > { %v2962_v8 = vpop.f32.mrf.mxu0  ;;  %v3969_v10 = vpop.f32.mrf.mxu1 }
 0x163   : > { %v3971_v11 = vpop.f32.mrf.mxu0  ;;  %v3074_v12 = vpop.f32.mrf.mxu1 }
 0x165   : > { %v3973_v39 = vpop.f32.mrf.mxu0  ;;  %v1388_v14 = vpop.f32.mrf.mxu1 }
 0x166   : > { %v1389_v15 = vadd.f32 %v2906_v13, %v1388_v14  ;;  %v2960_v13 = vadd.f32 %v2959_v3, %v2958_v1  ;;  %v1397_v14 = vadd.f32 %v3074_v12, %v2912_v47 }
 0x167   : > { %v3975_v16 = vpop.f32.mrf.mxu0  ;;  %v3075_v19 = vpop.f32.mrf.mxu1 }
 0x168   : > { %v3977_v43 = vadd.f32 %v1389_v15, %v1010_v60  ;;  %v2915_v15 = vadd.f32 %v2914_v57, %v2913_v55  ;;  %v4008_v55 = vadd.f32 %v3953_v56, %v3943_v34  ;;  %v2963_v57 = vadd.f32 %v2962_v8, %v2961_v5 }
 0x169   : > { %v3979_v20 = vpop.f32.mrf.mxu0  ;;  %v1391_v49 = vpop.f32.mrf.mxu1  ;;  %v2957_v34 = vadd.f32 %v3963_v63, %v3959_v61 }
 0x16a   : > { %v1400_v52 = vadd.f32 %v3075_v19, %v2915_v15  ;;  %v1392_v50 = vadd.f32 %v2909_v37, %v1391_v49  ;;  %v2927_v49 = vadd.f32 %v3969_v10, %v3967_v6 }
 0x16b   : > { %v3981_v22 = vpop.f32.mrf.mxu0  ;;  %v3078_v23 = vpop.f32.mrf.mxu1 }
 0x16d   : > { %v3983_v24 = vpop.f32.mrf.mxu0  ;;  %v1404_v25 = vpop.f32.mrf.mxu1 }
 0x16e   : > { %v2972_v10 = vadd.f32 %v3983_v24, %v3981_v22 }
 0x16f   : > { %v3985_v28 = vpop.f32.mrf.mxu0  ;;  %v3987_v29 = vpop.f32.mrf.mxu1 }
 0x170   : > { %4082 = vst [vmem:[#allocation6_spill] sm:$0xff] %v3985_v28  ;;  %4083 = vst [vmem:[#allocation7_spill] sm:$0xff] %v3987_v29  ;;  %v1021_v28 = vadd.f32 %v3939_v4, %v3937_v53  ;;  %v1421_v53 = vadd.f32 %v1397_v14, %v3935_v21  ;;  %v2921_v21 = vadd.f32 %v3965_v0, %v3961_v62  ;;  %v4026_v62 = vld [vmem:[%s4077_s2] ss:$0 sm:$0xff] }
 0x171   : > { %v3989_v31 = vpop.f32.mrf.mxu0  ;;  %v3991_v32 = vpop.f32.mrf.mxu1 }
 0x172   : > { %4084 = vst [vmem:[#allocation8_spill] sm:$0xff] %v3989_v31  ;;  %4085 = vst [vmem:[#allocation9_spill] sm:$0xff] %v3991_v32  ;;  %v1013_v32 = vadd.f32 %v3941_v30, %v3933_v38  ;;  %v2918_v38 = vadd.f32 %v3957_v59, %v3955_v26  ;;  %v2924_v30 = vadd.f32 %v2923_v27, %v2922_v2 }
 0x173   : > { %v3000_v33 = vpop.f32.mrf.mxu0  ;;  %v3090_v60 = vpop.f32.mrf.mxu1  ;;  %v1422_v56 = vadd.f32 %v1400_v52, %v1021_v28 }
 0x174   : > { %v1784_v29 = vadd.f32 %v3090_v60, %v2960_v13  ;;  %v1413_v5 = vadd.f32 %v3078_v23, %v2924_v30  ;;  %v1405_v26 = vadd.f32 %v2918_v38, %v1404_v25  ;;  %v1420_v25 = vadd.f32 %v1392_v50, %v1013_v32 }
 0x175   : > { %v3001_v9 = vpop.f32.mrf.mxu0  ;;  %v1775_v35 = vpop.f32.mrf.mxu1 }
 0x176   : > { %v1808_v1 = vadd.f32 %v1784_v29, %v1421_v53  ;;  %v3002_v3 = vadd.f32 %v3001_v9, %v3000_v33  ;;  %v2966_v29 = vadd.f32 %v3973_v39, %v3971_v11  ;;  %v4087_v9 = vld [vmem:[#allocation4_spill] sm:$0xff] }
 0x177   : > { %v3003_v36 = vpop.f32.mrf.mxu0  ;;  %v3091_v40 = vpop.f32.mrf.mxu1 }
 0x178   : > { %v1787_v12 = vadd.f32 %v3091_v40, %v2963_v57  ;;  %v4088_v40 = vld [vmem:[#allocation3_spill] sm:$0xff] }
 0x179   : > { %v3004_v42 = vpop.f32.mrf.mxu0  ;;  %v1778_v44 = vpop.f32.mrf.mxu1  ;;  %v4089_v32 = vld [vmem:[#allocation9_spill] sm:$0xff]  ;;  %v4093_v14 = vld [vmem:[#allocation8_spill] sm:$0xff] }
 0x17a   : > { %v1779_v63 = vadd.f32 %v2957_v34, %v1778_v44  ;;  %v1809_v28 = vadd.f32 %v1787_v12, %v1422_v56  ;;  %v3005_v11 = vadd.f32 %v3004_v42, %v3003_v36  ;;  %v1423_v44 = vadd.f32 %v1405_v26, %v4088_v40  ;;  %v4091_v36 = vld [vmem:[#allocation7_spill] sm:$0xff]  ;;  %v4094_v26 = vld [vmem:[#allocation5_spill] sm:$0xff] }
 0x17b   : > { %v3006_v41 = vpop.f32.mrf.mxu0  ;;  %v3993_v46 = vpop.f32.mrf.mxu1  ;;  %v1416_v42 = vadd.f32 %v4091_v36, %v2927_v49 }
 0x17c   : > { %4086 = vst [vmem:[#allocation10_spill] sm:$0xff] %v3993_v46  ;;  %v2954_v46 = vadd.f32 %v2953_v58, %v2952_v18 }
 0x17d   : > { %v3007_v7 = vpop.f32.mrf.mxu0  ;;  %v1791_v17 = vpop.f32.mrf.mxu1 }
 0x17e   : > { %v3008_v4 = vadd.f32 %v3007_v7, %v3006_v41  ;;  %v1776_v51 = vadd.f32 %v2954_v46, %v1775_v35  ;;  %v1792_v39 = vadd.f32 %v2966_v29, %v1791_v17  ;;  %v1425_v35 = vadd.f32 %v1413_v5, %v4087_v9  ;;  %v4092_v17 = vld [vmem:[#allocation6_spill] sm:$0xff] }
 0x17f   : > { %v3009_v48 = vpop.f32.mrf.mxu0  ;;  %v3995_v31 = vpop.f32.mrf.mxu1  ;;  %v1408_v41 = vadd.f32 %v2921_v21, %v4089_v32  ;;  %v1807_v46 = vadd.f32 %v1779_v63, %v1420_v25  ;;  %v2975_v15 = vadd.f32 %v4093_v14, %v4092_v17 }
 0x180   : > { %v1806_v61 = vadd.f32 %v1776_v51, %v3977_v43  ;;  %v1810_v57 = vadd.f32 %v1792_v39, %v1423_v44 }
 0x181   : > { %v3010_v54 = vpop.f32.mrf.mxu0  ;;  %v1794_v45 = vpop.f32.mrf.mxu1  ;;  %v1424_v12 = vadd.f32 %v1408_v41, %v4008_v55  ;;  %v1803_v34 = vadd.f32 %v3995_v31, %v2975_v15  ;;  %v1426_v55 = vadd.f32 %v1416_v42, %v4094_v26 }
 0x182   : > { %v3011_v59 = vadd.f32 %v3010_v54, %v3009_v48  ;;  %v2969_v48 = vadd.f32 %v3979_v20, %v3975_v16 }
 0x183   : > { %v3012_v18 = vpop.f32.mrf.mxu0  ;;  %v3106_v58 = vpop.f32.mrf.mxu1  ;;  %v4090_v47 = vld [vmem:[#allocation10_spill] sm:$0xff] }
 0x184   : > { %v2171_v19 = vadd.f32 %v3106_v58, %v3008_v4  ;;  %v1800_v7 = vadd.f32 %v4090_v47, %v2972_v10  ;;  %v1795_v53 = vadd.f32 %v2969_v48, %v1794_v45  ;;  %v1813_v48 = vadd.f32 %v1803_v34, %v1426_v55 }
 0x185   : > { %v3013_v8 = vpop.f32.mrf.mxu0  ;;  %v2162_v37 = vpop.f32.mrf.mxu1 }
 0x186   : > { %v2195_v2 = vadd.f32 %v2171_v19, %v1808_v1  ;;  %v2163_v27 = vadd.f32 %v3002_v3, %v2162_v37  ;;  %v3014_v52 = vadd.f32 %v3013_v8, %v3012_v18  ;;  %v1812_v19 = vadd.f32 %v1800_v7, %v1425_v35 }
 0x187   : > { %v3015_v0 = vpop.f32.mrf.mxu0  ;;  %v3107_v23 = vpop.f32.mrf.mxu1  ;;  %v1811_v49 = vadd.f32 %v1795_v53, %v1424_v12 }
 0x188   : > { %v2174_v6 = vadd.f32 %v3107_v23, %v3011_v59  ;;  %v2193_v43 = vadd.f32 %v2163_v27, %v1806_v61  ;;  %v2210_v16 = vadd.f32 %v4026_v62, %v2195_v2 }
 0x189   : > { %v3016_v33 = vpop.f32.mrf.mxu0  ;;  %v2165_v60 = vpop.f32.mrf.mxu1 }
 0x18a   : > { %v2196_v20 = vadd.f32 %v2174_v6, %v1809_v28  ;;  %v2166_v13 = vadd.f32 %v3005_v11, %v2165_v60  ;;  %v2208_v4 = vadd.f32 %v4026_v62, %v2193_v43  ;;  %v2218_v51 = vmax.f32 %v2210_v16, 0.0 }
 0x18b   : > { %v3018_v22 = vpop.f32.mrf.mxu0  ;;  %v3110_v24 = vpop.f32.mrf.mxu1  ;;  %v3017_v5 = vadd.f32 %v3016_v33, %v3015_v0 }
 0x18c   : > { %v2211_v54 = vadd.f32 %v4026_v62, %v2196_v20  ;;  %v2194_v38 = vadd.f32 %v2166_v13, %v1807_v46  ;;  %v2216_v59 = vmax.f32 %v2208_v4, 0.0 }
 0x18d   : > { %v3019_v30 = vpop.f32.mrf.mxu0  ;;  %v2178_v50 = vpop.f32.mrf.mxu1 }
 0x18e   : > { %v2219_v58 = vmax.f32 %v2211_v54, 0.0  ;;  %v3020_v1 = vadd.f32 %v3019_v30, %v3018_v22  ;;  %v2179_v3 = vadd.f32 %v3014_v52, %v2178_v50  ;;  %v2209_v45 = vadd.f32 %v4026_v62, %v2194_v38 }
 0x18f   : > { %v3021_v18 = vpop.f32.mrf.mxu0  ;;  %v3111_v21 = vpop.f32.mrf.mxu1 }
 0x190   : > { %v2777_v56 = vpack.c.bf16 %v2219_v58, %v2218_v51  ;;  %v2187_v8 = vadd.f32 %v3110_v24, %v3020_v1  ;;  %v2197_v37 = vadd.f32 %v2179_v3, %v1810_v57  ;;  %v2217_v2 = vmax.f32 %v2209_v45, 0.0 }
 0x191   : > { %v3022_v31 = vpop.f32.mrf.mxu0  ;;  %v2181_v27 = vpop.f32.mrf.mxu1 }
 0x192   : > { %2789 = vst [vmem:[%s4053_s21 + $0x8] sm:$0xff] %v2777_v56   ;;  %v2199_v29 = vadd.f32 %v2187_v8, %v1812_v19  ;;  %v3023_v61 = vadd.f32 %v3022_v31, %v3021_v18  ;;  %v2182_v63 = vadd.f32 %v3017_v5, %v2181_v27  ;;  %v2772_v23 = vpack.c.bf16 %v2217_v2, %v2216_v59 }
 0x193   : > { %v2212_v0 = vadd.f32 %v4026_v62, %v2197_v37 }
 0x194   : > { %v2190_v25 = vadd.f32 %v3111_v21, %v3023_v61  ;;  %v2198_v28 = vadd.f32 %v2182_v63, %v1811_v49  ;;  %2773 = vst [vmem:[%s4053_s21] sm:$0xff] %v2772_v23   ;;  %v2214_v6 = vadd.f32 %v4026_v62, %v2199_v29 }
 0x195   : > { %v2220_v39 = vmax.f32 %v2212_v0, 0.0 }
 0x196   : > { %v2200_v10 = vadd.f32 %v2190_v25, %v1813_v48  ;;  %v2213_v11 = vadd.f32 %v4026_v62, %v2198_v28  ;;  %v2222_v60 = vmax.f32 %v2214_v6, 0.0 }
 0x198   : > { %v2215_v43 = vadd.f32 %v4026_v62, %v2200_v10  ;;  %v2221_v33 = vmax.f32 %v2213_v11, 0.0 }
 0x19a   : > { %v2223_v9 = vmax.f32 %v2215_v43, 0.0  ;;  %v2782_v35 = vpack.c.bf16 %v2221_v33, %v2220_v39 }
 0x19c   : > { %v2787_v40 = vpack.c.bf16 %v2223_v9, %v2222_v60  ;;  %2790 = vst [vmem:[%s4053_s21 + $0x10] sm:$0xff] %v2782_v35  }
 0x19e   : > { %2791 = vst [vmem:[%s4053_s21 + $0x18] sm:$0xff] %v2787_v40  }
 0x19f PF: > { %p10_p9 = scmp.ge.s32.totalorder %s3354_s16, 4   ;;  %s4095_s12 = smov %s3311_s13 }
 0x1a0   : > { %s4096_s13 = smov %s3363_s19  ;;  %s4097_s14 = smov %s3354_s16 }
 0x1a1   :  { %12 = sbr.rel (!%p10_p9) target bundleno = 2 (0x2), region = 104 }

// kernel: dtn_base_forward.5
= control target key start
LH: loop header
LB: loop body
LE: loop exit
PB: predicated region body
PF: predicated region fallthrough
CT: control target
= control target key end

     0   :  { %s5113_s12 = smov 0   ;;  %s5115_s13 = smov 0   ;;  %s6542_s0 = inlined_call_operand.vmem [shape: bf16[2,2,24,640], index: 0, kind: input, shape index: {}]   ;;  %s6543_s1 = inlined_call_operand.vmem [shape: bf16[5,640,256], index: 1, kind: input, shape index: {}]   ;;  %s6544_s2 = inlined_call_operand.vmem [shape: f32[1,256], index: 2, kind: input, shape index: {}]   ;;  %s6545_s3 = inlined_call_operand.vmem [shape: f32[32,256], index: 3, kind: output, shape index: {}]  }
   0x1   :  { %s5117_s14 = smov 0  }
   0x2 LB: > { %s3605_s15 = sadd.s32 4294967295, %s5090_s14   ;;  %s5130_s16 = sadd.s32 1, %s5090_s14   ;;  %s5090_s14 = sphi %s5117_s14, %s6548_s14   ;;  %s5086_s13 = sphi %s5115_s13, %s6547_s13   ;;  %s5082_s12 = sphi %s5113_s12, %s6546_s12  }
   0x3   : > { %s17_s17 = ssub.s32 %s5090_s14, %s5130_s16  ;;  %s20_s18 = sadd.s32 1, %s5086_s13 }
   0x4   : > { %p18_p0 = scmp.eq.s32.totalorder %s17_s17, 0  ;;  %p27_p1 = scmp.ne.s32.totalorder %s5086_s13, %s5082_s12 }
   0x5   : > { %p28_p2 = scmp.eq.s32.totalorder %s5090_s14, 0  ;;  %p3608_p4 = scmp.ge.s32.totalorder %s5090_s14, 2 }
   0x6   : > { %s5139_s19 = scalar_select %p18_p0, %s5086_s13, %s20_s18  }
   0x7   : > { %p29_p3 = por %p28_p2, %p27_p1  ;;  %127 = sbr.rel (%p3608_p4) target bundleno = 27 (0x1b), region = 24 }
   0xc   : > { %130 = sbr.rel (!%p29_p3) target bundleno = 27 (0x1b), region = 28  ;;  %s132_s20 = sand.u32 (%p29_p3), 1, %s5086_s13  }
   0xd   : > { %s4400_s21 = smul.u32 (%p29_p3), 60, %s5090_s14 }
   0xe   : > { %s4399_s22 = smul.u32 (%p29_p3), 120, %s132_s20 }
   0xf   : > { %s5147_s25 = scalar_lea.vmem (%p29_p3), %s6542_s0, %s4400_s21 }
  0x10   : > { %v152_v0 = vld [vmem:[%s5147_s25] sm:$0xff] (%p29_p3)  ;;  %v154_v1 = vld [vmem:[%s5147_s25 + $0x8] sm:$0xff] (%p29_p3)  ;;  %v156_v2 = vld [vmem:[%s5147_s25 + $0x14] sm:$0xff] (%p29_p3)  ;;  %s5152_s26 = scalar_lea.vmem (%p29_p3), [#allocation2], %s4399_s22 }
  0x11   : > { %153 = vst [vmem:[%s5152_s26] sm:$0xff] %v152_v0  ;;  %155 = vst [vmem:[%s5152_s26 + $0x8] sm:$0xff] %v154_v1  ;;  %v158_v3 = vld [vmem:[%s5147_s25 + $0x1c] sm:$0xff]  ;;  %v160_v4 = vld [vmem:[%s5147_s25 + $0x28] sm:$0xff] }
  0x12   : > { %157 = vst [vmem:[%s5152_s26 + $0x14] sm:$0xff] %v156_v2  ;;  %v162_v5 = vld [vmem:[%s5147_s25 + $0x30] sm:$0xff]  ;;  %159 = vst [vmem:[%s5152_s26 + $0x1c] sm:$0xff] %v158_v3  ;;  %v164_v6 = vld [vmem:[%s5147_s25 + $0x78] sm:$0xff] }
  0x13   : > { %161 = vst [vmem:[%s5152_s26 + $0x28] sm:$0xff] %v160_v4  ;;  %163 = vst [vmem:[%s5152_s26 + $0x30] sm:$0xff] %v162_v5  ;;  %v166_v7 = vld [vmem:[%s5147_s25 + $0x80] sm:$0xff]  ;;  %v168_v8 = vld [vmem:[%s5147_s25 + $0x8c] sm:$0xff] }
  0x14   : > { %165 = vst [vmem:[%s5152_s26 + $0x3c] sm:$0xff] %v164_v6  ;;  %167 = vst [vmem:[%s5152_s26 + $0x44] sm:$0xff] %v166_v7  ;;  %v170_v9 = vld [vmem:[%s5147_s25 + $0x94] sm:$0xff]  ;;  %v172_v10 = vld [vmem:[%s5147_s25 + $0xa0] sm:$0xff] }
  0x15   : > { %169 = vst [vmem:[%s5152_s26 + $0x50] sm:$0xff] %v168_v8  ;;  %v174_v11 = vld [vmem:[%s5147_s25 + $0xa8] sm:$0xff]  ;;  %171 = vst [vmem:[%s5152_s26 + $0x58] sm:$0xff] %v170_v9  ;;  %v3610_v12 = vld [vmem:[%s5147_s25 + $0x10] sm:$0xf] }
  0x16   : > { %173 = vst [vmem:[%s5152_s26 + $0x64] sm:$0xff] %v172_v10  ;;  %175 = vst [vmem:[%s5152_s26 + $0x6c] sm:$0xff] %v174_v11  ;;  %v3612_v13 = vld [vmem:[%s5147_s25 + $0x24] sm:$0xf]  ;;  %v3614_v14 = vld [vmem:[%s5147_s25 + $0x38] sm:$0xf] }
  0x17   : > { %3611 = vst [vmem:[%s5152_s26 + $0x10] sm:$0xf] %v3610_v12  ;;  %3613 = vst [vmem:[%s5152_s26 + $0x24] sm:$0xf] %v3612_v13  ;;  %v3616_v15 = vld [vmem:[%s5147_s25 + $0x88] sm:$0xf] }
  0x18   : > { %3615 = vst [vmem:[%s5152_s26 + $0x38] sm:$0xf] %v3614_v14  ;;  %v3618_v16 = vld [vmem:[%s5147_s25 + $0x9c] sm:$0xf]  ;;  %v3620_v17 = vld [vmem:[%s5147_s25 + $0xb0] sm:$0xf] }
  0x19   : > { %3617 = vst [vmem:[%s5152_s26 + $0x4c] sm:$0xf] %v3616_v15  ;;  %3619 = vst [vmem:[%s5152_s26 + $0x60] sm:$0xf] %v3618_v16 }
  0x1a   : > { %3621 = vst [vmem:[%s5152_s26 + $0x74] sm:$0xf] %v3620_v17 }
  0x1b PF: > { %p3622_p5 = scmp.ge.s32.totalorder %s5090_s14, 1  ;;  %p200_p6 = scmp.lt.s32.totalorder %s5090_s14, 3 }
  0x1d   : > { %p201_p7 = pnand %p3622_p5, %p200_p6 }
  0x1e   : > { %s207_s18 = sand.u32 (!%p201_p7), 1, %s5082_s12  }
  0x1f   : > { %204 = sbr.rel (%p201_p7) target bundleno = 661 (0x295), region = 54 }
  0x20   : > { %s4401_s26 = smul.u32 (!%p201_p7), 120, %s207_s18 }
  0x22   : > { %s5334_s18 = scalar_lea.vmem (!%p201_p7), [#allocation2], %s4401_s26 }
  0x24   : > { %v4427_v18 = vld [vmem:[%s6543_s1 + $0x2f4] ss:$8 sps:$4 sm:$0xff]   ;;  %v4431_v20 = vld [vmem:[%s6543_s1 + $0x2f0] ss:$8 sps:$4 sm:$0xff]   ;;  %v4433_v22 = vld [vmem:[%s6543_s1 + $0x2e4] ss:$8 sps:$4 sm:$0xff]  }
  0x25   : > { %v4429_v19 = vld [vmem:[%s6543_s1 + $0x3f4] ss:$8 sps:$4 sm:$0xff]   ;;  %839 = vmatprep.subr.bf16.mxu0 %v4427_v18  ;;  %v4432_v21 = vld [vmem:[%s6543_s1 + $0x3f0] ss:$8 sps:$4 sm:$0xff]   ;;  %v4435_v23 = vld [vmem:[%s6543_s1 + $0x3e4] ss:$8 sps:$4 sm:$0xff]  }
  0x26   : > { %882 = vmatprep.subr.bf16.mxu1 %v4429_v19  ;;  %840 = vmatpush1.bf16.msra.mxu0 %v4431_v20  ;;  %v4437_v24 = vld [vmem:[%s6543_s1 + $0x2e0] ss:$8 sps:$4 sm:$0xff]   ;;  %v4439_v26 = vld [vmem:[%s6543_s1 + $0x2d4] ss:$8 sps:$4 sm:$0xff]   ;;  %v4443_v28 = vld [vmem:[%s6543_s1 + $0x2d0] ss:$8 sps:$4 sm:$0xff]  }
  0x27   : > { %883 = vmatpush1.bf16.msra.mxu1 %v4432_v21  ;;  %841 = vmatprep.subr.bf16.mxu0 %v4433_v22  ;;  %v4438_v25 = vld [vmem:[%s6543_s1 + $0x3e0] ss:$8 sps:$4 sm:$0xff]   ;;  %v4441_v27 = vld [vmem:[%s6543_s1 + $0x3d4] ss:$8 sps:$4 sm:$0xff]   ;;  %v4444_v29 = vld [vmem:[%s6543_s1 + $0x3d0] ss:$8 sps:$4 sm:$0xff]  }
  0x28   : > { %884 = vmatprep.subr.bf16.mxu1 %v4435_v23  ;;  %v4445_v30 = vld [vmem:[%s6543_s1 + $0x2c4] ss:$8 sps:$4 sm:$0xff]   ;;  %v4449_v32 = vld [vmem:[%s6543_s1 + $0x2c0] ss:$8 sps:$4 sm:$0xff]   ;;  %v4451_v34 = vld [vmem:[%s6543_s1 + $0x2b4] ss:$8 sps:$4 sm:$0xff]  }
  0x29   : > { %v4447_v31 = vld [vmem:[%s6543_s1 + $0x3c4] ss:$8 sps:$4 sm:$0xff]   ;;  %v4450_v33 = vld [vmem:[%s6543_s1 + $0x3c0] ss:$8 sps:$4 sm:$0xff]   ;;  %v4453_v35 = vld [vmem:[%s6543_s1 + $0x3b4] ss:$8 sps:$4 sm:$0xff]  }
  0x2a   : > { %842 = vmatpush1.bf16.msra.mxu0 %v4437_v24  ;;  %v4455_v36 = vld [vmem:[%s6543_s1 + $0x2b0] ss:$8 sps:$4 sm:$0xff]   ;;  %v4457_v38 = vld [vmem:[%s6543_s1 + $0x2a4] ss:$8 sps:$4 sm:$0xff]   ;;  %v4461_v40 = vld [vmem:[%s6543_s1 + $0x2a0] ss:$8 sps:$4 sm:$0xff]  }
  0x2b   : > { %885 = vmatpush1.bf16.msra.mxu1 %v4438_v25  ;;  %843 = vmatprep.subr.bf16.mxu0 %v4439_v26  ;;  %v4456_v37 = vld [vmem:[%s6543_s1 + $0x3b0] ss:$8 sps:$4 sm:$0xff]   ;;  %v4459_v39 = vld [vmem:[%s6543_s1 + $0x3a4] ss:$8 sps:$4 sm:$0xff]   ;;  %v4462_v41 = vld [vmem:[%s6543_s1 + $0x3a0] ss:$8 sps:$4 sm:$0xff]  }
  0x2c   : > { %886 = vmatprep.subr.bf16.mxu1 %v4441_v27  ;;  %v4463_v42 = vld [vmem:[%s6543_s1 + $0x294] ss:$8 sps:$4 sm:$0xff]   ;;  %v4467_v44 = vld [vmem:[%s6543_s1 + $0x290] ss:$8 sps:$4 sm:$0xff]   ;;  %v4469_v46 = vld [vmem:[%s6543_s1 + $0x284] ss:$8 sps:$4 sm:$0xff]  }
  0x2d   : > { %v4465_v43 = vld [vmem:[%s6543_s1 + $0x394] ss:$8 sps:$4 sm:$0xff]   ;;  %v4468_v45 = vld [vmem:[%s6543_s1 + $0x390] ss:$8 sps:$4 sm:$0xff]   ;;  %v4471_v47 = vld [vmem:[%s6543_s1 + $0x384] ss:$8 sps:$4 sm:$0xff]  }
  0x2e   : > { %844 = vmatpush1.bf16.msra.mxu0 %v4443_v28  ;;  %v4473_v48 = vld [vmem:[%s6543_s1 + $0x280] ss:$8 sps:$4 sm:$0xff]   ;;  %v4475_v50 = vld [vmem:[%s6543_s1 + $0x374] ss:$8 sps:$4 sm:$0xff]   ;;  %v4479_v52 = vld [vmem:[%s6543_s1 + $0x370] ss:$8 sps:$4 sm:$0xff]  }
  0x2f   : > { %887 = vmatpush1.bf16.msra.mxu1 %v4444_v29  ;;  %845 = vmatprep.subr.bf16.mxu0 %v4445_v30  ;;  %v4474_v49 = vld [vmem:[%s6543_s1 + $0x380] ss:$8 sps:$4 sm:$0xff]   ;;  %v4477_v51 = vld [vmem:[%s6543_s1 + $0x474] ss:$8 sps:$4 sm:$0xff]   ;;  %v4480_v53 = vld [vmem:[%s6543_s1 + $0x470] ss:$8 sps:$4 sm:$0xff]  }
  0x30   : > { %888 = vmatprep.subr.bf16.mxu1 %v4447_v31  ;;  %v4481_v54 = vld [vmem:[%s6543_s1 + $0x364] ss:$8 sps:$4 sm:$0xff]   ;;  %v4485_v56 = vld [vmem:[%s6543_s1 + $0x360] ss:$8 sps:$4 sm:$0xff]   ;;  %v4487_v58 = vld [vmem:[%s6543_s1 + $0x354] ss:$8 sps:$4 sm:$0xff]  }
  0x31   : > { %v4483_v55 = vld [vmem:[%s6543_s1 + $0x464] ss:$8 sps:$4 sm:$0xff]   ;;  %v4486_v57 = vld [vmem:[%s6543_s1 + $0x460] ss:$8 sps:$4 sm:$0xff]   ;;  %v4489_v59 = vld [vmem:[%s6543_s1 + $0x454] ss:$8 sps:$4 sm:$0xff]  }
  0x32   : > { %846 = vmatpush1.bf16.msra.mxu0 %v4449_v32  ;;  %v4491_v60 = vld [vmem:[%s6543_s1 + $0x350] ss:$8 sps:$4 sm:$0xff]   ;;  %v4493_v62 = vld [vmem:[%s6543_s1 + $0x344] ss:$8 sps:$4 sm:$0xff]   ;;  %v4497_v0 = vld [vmem:[%s6543_s1 + $0x340] ss:$8 sps:$4 sm:$0xff]  }
  0x33   : > { %889 = vmatpush1.bf16.msra.mxu1 %v4450_v33  ;;  %847 = vmatprep.subr.bf16.mxu0 %v4451_v34  ;;  %v4492_v61 = vld [vmem:[%s6543_s1 + $0x450] ss:$8 sps:$4 sm:$0xff]   ;;  %v4495_v63 = vld [vmem:[%s6543_s1 + $0x444] ss:$8 sps:$4 sm:$0xff]   ;;  %v4498_v1 = vld [vmem:[%s6543_s1 + $0x440] ss:$8 sps:$4 sm:$0xff]  }
  0x34   : > { %890 = vmatprep.subr.bf16.mxu1 %v4453_v35  ;;  %v4499_v2 = vld [vmem:[%s6543_s1 + $0x334] ss:$8 sps:$4 sm:$0xff]   ;;  %v4503_v6 = vld [vmem:[%s6543_s1 + $0x330] ss:$8 sps:$4 sm:$0xff]   ;;  %v4505_v8 = vld [vmem:[%s6543_s1 + $0x324] ss:$8 sps:$4 sm:$0xff]  }
  0x35   : > { %v4525_v3 = vld [vmem:[%s5334_s18 + $0x40] ss:$20 sps:$4 sm:$0xff]   ;;  %v4528_v5 = vld [vmem:[%s5334_s18 + $0x48] ss:$20 sps:$4 sm:$0xff]   ;;  %v4526_v23 = vld [vmem:[%s5334_s18 + $0x44] ss:$20 sps:$4 sm:$0xff]  }
  0x36   : > { %848 = vmatpush1.bf16.msra.mxu0 %v4455_v36  ;;  %v4501_v4 = vld [vmem:[%s6543_s1 + $0x434] ss:$8 sps:$4 sm:$0xff]   ;;  %871 = vmatprep.mubr.bf16.mxu0 %v4525_v3  ;;  %v4504_v7 = vld [vmem:[%s6543_s1 + $0x430] ss:$8 sps:$4 sm:$0xff]   ;;  %v4507_v9 = vld [vmem:[%s6543_s1 + $0x424] ss:$8 sps:$4 sm:$0xff]  }
  0x37   : > { %891 = vmatpush1.bf16.msra.mxu1 %v4456_v37  ;;  %849 = vmatprep.subr.bf16.mxu0 %v4457_v38  ;;  %v4509_v10 = vld [vmem:[%s6543_s1 + $0x320] ss:$8 sps:$4 sm:$0xff]   ;;  %v4511_v12 = vld [vmem:[%s6543_s1 + $0x314] ss:$8 sps:$4 sm:$0xff]   ;;  %v4515_v14 = vld [vmem:[%s6543_s1 + $0x310] ss:$8 sps:$4 sm:$0xff]  }
  0x38   : > { %892 = vmatprep.subr.bf16.mxu1 %v4459_v39  ;;  %914 = vmatprep.mubr.bf16.mxu1 %v4528_v5  ;;  %v4510_v11 = vld [vmem:[%s6543_s1 + $0x420] ss:$8 sps:$4 sm:$0xff]   ;;  %v4513_v13 = vld [vmem:[%s6543_s1 + $0x414] ss:$8 sps:$4 sm:$0xff]   ;;  %v4516_v15 = vld [vmem:[%s6543_s1 + $0x410] ss:$8 sps:$4 sm:$0xff]  }
  0x39   : > { %v4517_v16 = vld [vmem:[%s6543_s1 + $0x304] ss:$8 sps:$4 sm:$0xff]   ;;  %v4521_v18 = vld [vmem:[%s6543_s1 + $0x300] ss:$8 sps:$4 sm:$0xff]   ;;  %v4531_v20 = vld [vmem:[%s6543_s1 + $0x4f4] ss:$8 sps:$4 sm:$0xff]  }
  0x3a   : > { %850 = vmatpush1.bf16.msra.mxu0 %v4461_v40  ;;  %v4519_v17 = vld [vmem:[%s6543_s1 + $0x404] ss:$8 sps:$4 sm:$0xff]   ;;  %v4522_v19 = vld [vmem:[%s6543_s1 + $0x400] ss:$8 sps:$4 sm:$0xff]   ;;  %v4534_v21 = vld [vmem:[%s6543_s1 + $0x74] ss:$8 sps:$4 sm:$0xff]  }
  0x3b   : > { %893 = vmatpush1.bf16.msra.mxu1 %v4462_v41  ;;  %851 = vmatprep.subr.bf16.mxu0 %v4463_v42  ;;  %v4523_v22 = vld [vmem:[%s5334_s18 + $0x3c] ss:$20 sps:$4 sm:$0xff]   ;;  %v4537_v26 = vld [vmem:[%s6543_s1 + $0x4e4] ss:$8 sps:$4 sm:$0xff]   ;;  %v5092_v32 = vmov 0   ;;  %vm1647_vm0 = vcmask 1045504  }
  0x3c   : > { %894 = vmatprep.subr.bf16.mxu1 %v4465_v43  ;;  %v4529_v24 = vld [vmem:[%s6543_s1 + $0x4f0] ss:$8 sps:$4 sm:$0xff]   ;;  %v4540_v27 = vld [vmem:[%s6543_s1 + $0x64] ss:$8 sps:$4 sm:$0xff]   ;;  %v4535_v28 = vld [vmem:[%s6543_s1 + $0x4e0] ss:$8 sps:$4 sm:$0xff]  }
  0x3d   : > { %v4532_v25 = vld [vmem:[%s6543_s1 + $0x70] ss:$8 sps:$4 sm:$0xff]   ;;  %v4538_v29 = vld [vmem:[%s6543_s1 + $0x60] ss:$8 sps:$4 sm:$0xff]   ;;  %v4543_v30 = vld [vmem:[%s6543_s1 + $0x4d4] ss:$8 sps:$4 sm:$0xff]  }
  0x3e   : > { %852 = vmatpush1.bf16.msra.mxu0 %v4467_v44  ;;  %v4546_v31 = vld [vmem:[%s6543_s1 + $0x54] ss:$8 sps:$4 sm:$0xff]   ;;  %v4541_v33 = vld [vmem:[%s6543_s1 + $0x4d0] ss:$8 sps:$4 sm:$0xff]   ;;  %v4549_v35 = vld [vmem:[%s6543_s1 + $0x4c4] ss:$8 sps:$4 sm:$0xff]  }
  0x3f   : > { %895 = vmatpush1.bf16.msra.mxu1 %v4468_v45  ;;  %853 = vmatprep.subr.bf16.mxu0 %v4469_v46  ;;  %v4544_v34 = vld [vmem:[%s6543_s1 + $0x50] ss:$8 sps:$4 sm:$0xff]   ;;  %v4552_v36 = vld [vmem:[%s6543_s1 + $0x44] ss:$8 sps:$4 sm:$0xff]   ;;  %v4547_v37 = vld [vmem:[%s6543_s1 + $0x4c0] ss:$8 sps:$4 sm:$0xff]  }
  0x40   : > { %896 = vmatprep.subr.bf16.mxu1 %v4471_v47  ;;  %v4550_v38 = vld [vmem:[%s6543_s1 + $0x40] ss:$8 sps:$4 sm:$0xff]   ;;  %v4555_v39 = vld [vmem:[%s6543_s1 + $0x4b4] ss:$8 sps:$4 sm:$0xff]   ;;  %v4553_v41 = vld [vmem:[%s6543_s1 + $0x4b0] ss:$8 sps:$4 sm:$0xff]  }
  0x41   : > { %v4558_v40 = vld [vmem:[%s6543_s1 + $0x34] ss:$8 sps:$4 sm:$0xff]   ;;  %v4556_v42 = vld [vmem:[%s6543_s1 + $0x30] ss:$8 sps:$4 sm:$0xff]   ;;  %v4561_v43 = vld [vmem:[%s6543_s1 + $0x4a4] ss:$8 sps:$4 sm:$0xff]  }
  0x42   : > { %854 = vmatpush1.bf16.msra.mxu0 %v4473_v48  ;;  %v4564_v44 = vld [vmem:[%s6543_s1 + $0x24] ss:$8 sps:$4 sm:$0xff]   ;;  %v4559_v45 = vld [vmem:[%s6543_s1 + $0x4a0] ss:$8 sps:$4 sm:$0xff]   ;;  %v4567_v47 = vld [vmem:[%s6543_s1 + $0x494] ss:$8 sps:$4 sm:$0xff]  }
  0x43   : > { %897 = vmatpush1.bf16.msra.mxu1 %v4474_v49  ;;  %855 = vmatprep.subr.bf16.mxu0 %v4475_v50  ;;  %v4562_v46 = vld [vmem:[%s6543_s1 + $0x20] ss:$8 sps:$4 sm:$0xff]   ;;  %v4570_v48 = vld [vmem:[%s6543_s1 + $0x14] ss:$8 sps:$4 sm:$0xff]   ;;  %v4565_v49 = vld [vmem:[%s6543_s1 + $0x490] ss:$8 sps:$4 sm:$0xff]  }
  0x44   : > { %898 = vmatprep.subr.bf16.mxu1 %v4477_v51  ;;  %v4568_v50 = vld [vmem:[%s6543_s1 + $0x10] ss:$8 sps:$4 sm:$0xff]   ;;  %v4573_v51 = vld [vmem:[%s6543_s1 + $0x484] ss:$8 sps:$4 sm:$0xff]   ;;  %v4592_v3 = vld [vmem:[%s6543_s1 + $0xd4] ss:$8 sps:$4 sm:$0xff]  }
  0x45   : > { %v4590_v5 = vld [vmem:[%s6543_s1 + $0xd0] ss:$8 sps:$4 sm:$0xff]  }
  0x46   : > { %856 = vmatpush2.bf16.msra.mxu0 %v4479_v52  ;;  %v4576_v52 = vld [vmem:[%s6543_s1 + $0x4] ss:$8 sps:$4 sm:$0xff]  }
  0x47   : > { %899 = vmatpush2.bf16.msra.mxu1 %v4480_v53  ;;  %857 = vmatprep.subr.bf16.mxu0 %v4481_v54  ;;  %v5480_v53 = vld [vmem:[%s5334_s18] sm:$0xff]  ;;  %v5483_v54 = vld [vmem:[%s5334_s18 + $0x14] sm:$0xff] }
  0x48   : > { %900 = vmatprep.subr.bf16.mxu1 %v4483_v55  ;;  %v3798_v55 = vcombine.high %v5480_v53, %v5483_v54 }
  0x4a   : > { %858 = vmatpush2.bf16.msra.mxu0 %v4485_v56  ;;  %v4571_v56 = vld [vmem:[%s6543_s1 + $0x480] ss:$8 sps:$4 sm:$0xff]  }
  0x4b   : > { %901 = vmatpush2.bf16.msra.mxu1 %v4486_v57  ;;  %859 = vmatprep.subr.bf16.mxu0 %v4487_v58  ;;  %v4574_v57 = vld [vmem:[%s6543_s1] ss:$8 sps:$4 sm:$0xff]   ;;  %v4580_v58 = vld [vmem:[%s6543_s1 + $0xf4] ss:$8 sps:$4 sm:$0xff]  }
  0x4c   : > { %902 = vmatprep.subr.bf16.mxu1 %v4489_v59  ;;  %v4583_v59 = vld [vmem:[%s6543_s1 + $0x174] ss:$8 sps:$4 sm:$0xff]  }
  0x4e   : > { %860 = vmatpush2.bf16.msra.mxu0 %v4491_v60  ;;  %v4577_v60 = vld [vmem:[%s5334_s18 + $0x4c] ss:$20 sps:$4 sm:$0xff]  }
  0x4f   : > { %903 = vmatpush2.bf16.msra.mxu1 %v4492_v61  ;;  %861 = vmatprep.subr.bf16.mxu0 %v4493_v62  ;;  %v4578_v61 = vld [vmem:[%s6543_s1 + $0xf0] ss:$8 sps:$4 sm:$0xff]  }
  0x50   : > { %904 = vmatprep.subr.bf16.mxu1 %v4495_v63  ;;  %v4581_v62 = vld [vmem:[%s6543_s1 + $0x170] ss:$8 sps:$4 sm:$0xff]   ;;  %v4586_v63 = vld [vmem:[%s6543_s1 + $0xe4] ss:$8 sps:$4 sm:$0xff]  }
  0x52   : > { %862 = vmatpush2.bf16.msra.mxu0 %v4497_v0  ;;  %v4589_v0 = vld [vmem:[%s6543_s1 + $0x164] ss:$8 sps:$4 sm:$0xff]  }
  0x53   : > { %905 = vmatpush2.bf16.msra.mxu1 %v4498_v1  ;;  %863 = vmatprep.subr.bf16.mxu0 %v4499_v2  ;;  %v4584_v1 = vld [vmem:[%s6543_s1 + $0xe0] ss:$8 sps:$4 sm:$0xff]  }
  0x54   : > { %906 = vmatprep.subr.bf16.mxu1 %v4501_v4  ;;  %v4587_v2 = vld [vmem:[%s6543_s1 + $0x160] ss:$8 sps:$4 sm:$0xff]   ;;  %v4595_v4 = vld [vmem:[%s6543_s1 + $0x154] ss:$8 sps:$4 sm:$0xff]  }
  0x56   : > { %864 = vmatpush2.bf16.msra.mxu0 %v4503_v6  ;;  %v4593_v6 = vld [vmem:[%s6543_s1 + $0x150] ss:$8 sps:$4 sm:$0xff]  }
  0x57   : > { %907 = vmatpush2.bf16.msra.mxu1 %v4504_v7  ;;  %865 = vmatprep.subr.bf16.mxu0 %v4505_v8  ;;  %v4598_v7 = vld [vmem:[%s6543_s1 + $0xc4] ss:$8 sps:$4 sm:$0xff]  }
  0x58   : > { %908 = vmatprep.subr.bf16.mxu1 %v4507_v9  ;;  %v4601_v8 = vld [vmem:[%s6543_s1 + $0x144] ss:$8 sps:$4 sm:$0xff]   ;;  %v4596_v9 = vld [vmem:[%s6543_s1 + $0xc0] ss:$8 sps:$4 sm:$0xff]  }
  0x5a   : > { %866 = vmatpush2.bf16.msra.mxu0 %v4509_v10  ;;  %v4599_v10 = vld [vmem:[%s6543_s1 + $0x140] ss:$8 sps:$4 sm:$0xff]  }
  0x5b   : > { %909 = vmatpush2.bf16.msra.mxu1 %v4510_v11  ;;  %867 = vmatprep.subr.bf16.mxu0 %v4511_v12  ;;  %v4604_v11 = vld [vmem:[%s6543_s1 + $0xb4] ss:$8 sps:$4 sm:$0xff]  }
  0x5c   : > { %910 = vmatprep.subr.bf16.mxu1 %v4513_v13  ;;  %v4607_v12 = vld [vmem:[%s6543_s1 + $0x134] ss:$8 sps:$4 sm:$0xff]   ;;  %v4602_v13 = vld [vmem:[%s6543_s1 + $0xb0] ss:$8 sps:$4 sm:$0xff]  }
  0x5e   : > { %868 = vmatpush2.bf16.msra.mxu0 %v4515_v14  ;;  %v5552_v14 = vld [vmem:[%s5334_s18 + $0x8] sm:$0xff] }
  0x5f   : > { %911 = vmatpush2.bf16.msra.mxu1 %v4516_v15  ;;  %869 = vmatprep.subr.bf16.mxu0 %v4517_v16  ;;  %v5555_v15 = vld [vmem:[%s5334_s18 + $0x1c] sm:$0xff] }
  0x60   : > { %912 = vmatprep.subr.bf16.mxu1 %v4519_v17  ;;  %v4605_v16 = vld [vmem:[%s6543_s1 + $0x130] ss:$8 sps:$4 sm:$0xff]   ;;  %v4610_v17 = vld [vmem:[%s6543_s1 + $0xa4] ss:$8 sps:$4 sm:$0xff]  }
  0x62   : > { %870 = vmatpush2.bf16.msra.mxu0 %v4521_v18  ;;  %v3800_v18 = vcombine.high %v5552_v14, %v5555_v15 }
  0x63   : > { %913 = vmatpush2.bf16.msra.mxu1 %v4522_v19  ;;  %925 = vmatprep.subr.bf16.mxu0 %v4531_v20  ;;  %v4613_v19 = vld [vmem:[%s6543_s1 + $0x124] ss:$8 sps:$4 sm:$0xff]   ;;  %v4608_v20 = vld [vmem:[%s6543_s1 + $0xa0] ss:$8 sps:$4 sm:$0xff]  }
  0x64   : > { %1394 = vmatprep.subr.bf16.mxu1 %v4534_v21  ;;  %v4611_v21 = vld [vmem:[%s6543_s1 + $0x120] ss:$8 sps:$4 sm:$0xff]  }
  0x65   : > { %872 = vmatmul.mubr.bf16.vlgmr.msra.gmra.mxu0 %v4523_v22  ;;  %v4616_v22 = vld [vmem:[%s6543_s1 + $0x94] ss:$8 sps:$4 sm:$0xff]  }
  0x66   : > { %915 = vmatmul.mubr.bf16.vlgmr.msra.gmra.mxu1 %v4526_v23  ;;  %926 = vmatpush1.bf16.msra.mxu0 %v4529_v24  ;;  %v4619_v23 = vld [vmem:[%s6543_s1 + $0x114] ss:$8 sps:$4 sm:$0xff]   ;;  %v4614_v24 = vld [vmem:[%s6543_s1 + $0x90] ss:$8 sps:$4 sm:$0xff]  }
  0x67   : > { %1395 = vmatpush1.bf16.msra.mxu1 %v4532_v25  ;;  %927 = vmatprep.subr.bf16.mxu0 %v4537_v26  ;;  %v4617_v25 = vld [vmem:[%s6543_s1 + $0x110] ss:$8 sps:$4 sm:$0xff]   ;;  %v4622_v26 = vld [vmem:[%s6543_s1 + $0x84] ss:$8 sps:$4 sm:$0xff]  }
  0x68   : > { %1396 = vmatprep.subr.bf16.mxu1 %v4540_v27  ;;  %957 = vmatprep.mubr.bf16.mxu0 %v5092_v32  ;;  %v4625_v27 = vld [vmem:[%s6543_s1 + $0x104] ss:$8 sps:$4 sm:$0xff]  }
  0x69   : > { %1426 = vmatprep.mubr.bf16.mxu1 %v3798_v55  ;;  %v4658_v55 = vld [vmem:[%s6543_s1 + $0x1a0] ss:$8 sps:$4 sm:$0xff]  }
  0x6a   : > { %928 = vmatpush1.bf16.msra.mxu0 %v4535_v28  ;;  %v4620_v28 = vld [vmem:[%s6543_s1 + $0x80] ss:$8 sps:$4 sm:$0xff]  }
  0x6b   : > { %1397 = vmatpush1.bf16.msra.mxu1 %v4538_v29  ;;  %929 = vmatprep.subr.bf16.mxu0 %v4543_v30  ;;  %v4623_v29 = vld [vmem:[%s6543_s1 + $0x100] ss:$8 sps:$4 sm:$0xff]   ;;  %v4630_v30 = vld [vmem:[%s6543_s1 + $0x1f4] ss:$8 sps:$4 sm:$0xff]  }
  0x6c   : > { %1398 = vmatprep.subr.bf16.mxu1 %v4546_v31  ;;  %v4633_v31 = vld [vmem:[%s6543_s1 + $0x274] ss:$8 sps:$4 sm:$0xff]  }
  0x6e   : > { %930 = vmatpush1.bf16.msra.mxu0 %v4541_v33  ;;  %v3797_v33 = vcombine.low %v5480_v53, %v5483_v54  ;;  %v4663_v53 = vld [vmem:[%s6543_s1 + $0x224] ss:$8 sps:$4 sm:$0xff]  }
  0x6f   : > { %1399 = vmatpush1.bf16.msra.mxu1 %v4544_v34  ;;  %931 = vmatprep.subr.bf16.mxu0 %v4549_v35  ;;  %v4628_v34 = vld [vmem:[%s6543_s1 + $0x1f0] ss:$8 sps:$4 sm:$0xff]  }
  0x70   : > { %1400 = vmatprep.subr.bf16.mxu1 %v4552_v36  ;;  %v4631_v35 = vld [vmem:[%s6543_s1 + $0x270] ss:$8 sps:$4 sm:$0xff]   ;;  %v4636_v36 = vld [vmem:[%s6543_s1 + $0x1e4] ss:$8 sps:$4 sm:$0xff]  }
  0x72   : > { %932 = vmatpush1.bf16.msra.mxu0 %v4547_v37  ;;  %v4639_v37 = vld [vmem:[%s6543_s1 + $0x264] ss:$8 sps:$4 sm:$0xff]  }
  0x73   : > { %1401 = vmatpush1.bf16.msra.mxu1 %v4550_v38  ;;  %933 = vmatprep.subr.bf16.mxu0 %v4555_v39  ;;  %v4634_v38 = vld [vmem:[%s6543_s1 + $0x1e0] ss:$8 sps:$4 sm:$0xff]  }
  0x74   : > { %1402 = vmatprep.subr.bf16.mxu1 %v4558_v40  ;;  %v4637_v39 = vld [vmem:[%s6543_s1 + $0x260] ss:$8 sps:$4 sm:$0xff]   ;;  %v4642_v40 = vld [vmem:[%s6543_s1 + $0x1d4] ss:$8 sps:$4 sm:$0xff]  }
  0x76   : > { %934 = vmatpush1.bf16.msra.mxu0 %v4553_v41  ;;  %v4645_v41 = vld [vmem:[%s6543_s1 + $0x254] ss:$8 sps:$4 sm:$0xff]  }
  0x77   : > { %1403 = vmatpush1.bf16.msra.mxu1 %v4556_v42  ;;  %935 = vmatprep.subr.bf16.mxu0 %v4561_v43  ;;  %v4640_v42 = vld [vmem:[%s6543_s1 + $0x1d0] ss:$8 sps:$4 sm:$0xff]  }
  0x78   : > { %1404 = vmatprep.subr.bf16.mxu1 %v4564_v44  ;;  %v4643_v43 = vld [vmem:[%s6543_s1 + $0x250] ss:$8 sps:$4 sm:$0xff]   ;;  %v4648_v44 = vld [vmem:[%s6543_s1 + $0x1c4] ss:$8 sps:$4 sm:$0xff]  }
  0x7a   : > { %936 = vmatpush1.bf16.msra.mxu0 %v4559_v45  ;;  %v4651_v45 = vld [vmem:[%s6543_s1 + $0x244] ss:$8 sps:$4 sm:$0xff]  }
  0x7b   : > { %1405 = vmatpush1.bf16.msra.mxu1 %v4562_v46  ;;  %937 = vmatprep.subr.bf16.mxu0 %v4567_v47  ;;  %v4646_v46 = vld [vmem:[%s6543_s1 + $0x1c0] ss:$8 sps:$4 sm:$0xff]  }
  0x7c   : > { %1406 = vmatprep.subr.bf16.mxu1 %v4570_v48  ;;  %v4649_v47 = vld [vmem:[%s6543_s1 + $0x240] ss:$8 sps:$4 sm:$0xff]   ;;  %v4654_v48 = vld [vmem:[%s6543_s1 + $0x1b4] ss:$8 sps:$4 sm:$0xff]  }
  0x7e   : > { %938 = vmatpush1.bf16.msra.mxu0 %v4565_v49  ;;  %v4657_v49 = vld [vmem:[%s6543_s1 + $0x234] ss:$8 sps:$4 sm:$0xff]  }
  0x7f   : > { %1407 = vmatpush1.bf16.msra.mxu1 %v4568_v50  ;;  %939 = vmatprep.subr.bf16.mxu0 %v4573_v51  ;;  %v4652_v50 = vld [vmem:[%s6543_s1 + $0x1b0] ss:$8 sps:$4 sm:$0xff]  }
  0x80   : > { %1408 = vmatprep.subr.bf16.mxu1 %v4576_v52  ;;  %v4655_v51 = vld [vmem:[%s6543_s1 + $0x230] ss:$8 sps:$4 sm:$0xff]   ;;  %v4660_v52 = vld [vmem:[%s6543_s1 + $0x1a4] ss:$8 sps:$4 sm:$0xff]  }
  0x82   : > { %940 = vmatpush1.bf16.msra.mxu0 %v4571_v56  ;;  %v4661_v56 = vld [vmem:[%s6543_s1 + $0x220] ss:$8 sps:$4 sm:$0xff]  }
  0x83   : > { %1409 = vmatpush1.bf16.msra.mxu1 %v4574_v57  ;;  %1437 = vmatprep.subr.bf16.mxu0 %v4583_v59  ;;  %v4666_v57 = vld [vmem:[%s6543_s1 + $0x194] ss:$8 sps:$4 sm:$0xff]   ;;  %v4664_v59 = vld [vmem:[%s6543_s1 + $0x190] ss:$8 sps:$4 sm:$0xff]  }
  0x84   : > { %1410 = vmatprep.subr.bf16.mxu1 %v4580_v58  ;;  %v4669_v58 = vld [vmem:[%s6543_s1 + $0x214] ss:$8 sps:$4 sm:$0xff]  }
  0x85   : > { %958 = vmatmul.mubr.bf16.vlgmr.msra.gmra.mxu0 %v4577_v60  ;;  %v4667_v60 = vld [vmem:[%s6543_s1 + $0x210] ss:$8 sps:$4 sm:$0xff]  }
  0x86   : > { %1438 = vmatpush1.bf16.msra.mxu0 %v4581_v62  ;;  %1469 = vmatprep.mubr.bf16.mxu0 %v3800_v18  ;;  %v4675_v62 = vld [vmem:[%s6543_s1 + $0x204] ss:$8 sps:$4 sm:$0xff]  }
  0x87   : > { %1411 = vmatpush2.bf16.msra.mxu1 %v4578_v61  ;;  %1439 = vmatprep.subr.bf16.mxu0 %v4589_v0  ;;  %v4672_v61 = vld [vmem:[%s6543_s1 + $0x184] ss:$8 sps:$4 sm:$0xff]   ;;  %v4673_v0 = vld [vmem:[%s6543_s1 + $0x200] ss:$8 sps:$4 sm:$0xff]  }
  0x88   : > { %1412 = vmatprep.subr.bf16.mxu1 %v4586_v63  ;;  %v4670_v63 = vld [vmem:[%s6543_s1 + $0x180] ss:$8 sps:$4 sm:$0xff]  }
  0x8a   : > { %1440 = vmatpush1.bf16.msra.mxu0 %v4587_v2  ;;  %v5701_v2 = vld [vmem:[%s5334_s18] sm:$0xcc] }
  0x8b   : > { %1413 = vmatpush2.bf16.msra.mxu1 %v4584_v1  ;;  %1441 = vmatprep.subr.bf16.mxu0 %v4595_v4  ;;  %v4680_v1 = vld [vmem:[%s6543_s1 + $0x574] ss:$8 sps:$4 sm:$0xff]   ;;  %v3963_v4 = vcombine.high %v5701_v2, %v5483_v54 }
  0x8c   : > { %1414 = vmatprep.subr.bf16.mxu1 %v4592_v3  ;;  %v5704_v3 = vld [vmem:[%s5334_s18 + $0x28] sm:$0x33] }
  0x8e   : > { %1442 = vmatpush1.bf16.msra.mxu0 %v4593_v6  ;;  %v5711_v6 = vld [vmem:[%s5334_s18 + $0x8] sm:$0xcc] }
  0x8f   : > { %1415 = vmatpush2.bf16.msra.mxu1 %v4590_v5  ;;  %1443 = vmatprep.subr.bf16.mxu0 %v4601_v8  ;;  %v3968_v5 = vcombine.high %v5704_v3, %v5704_v3  ;;  %v4683_v8 = vld [vmem:[%s6543_s1 + $0x674] ss:$8 sps:$4 sm:$0xff]  }
  0x90   : > { %1416 = vmatprep.subr.bf16.mxu1 %v4598_v7  ;;  %v5714_v7 = vld [vmem:[%s5334_s18 + $0x30] sm:$0x33] }
  0x92   : > { %1444 = vmatpush1.bf16.msra.mxu0 %v4599_v10  ;;  %v3965_v10 = vcombine.high %v5711_v6, %v5555_v15 }
  0x93   : > { %1417 = vmatpush2.bf16.msra.mxu1 %v4596_v9  ;;  %1445 = vmatprep.subr.bf16.mxu0 %v4607_v12  ;;  %v4684_v9 = vld [vmem:[%s5334_s18 + $0x10] ss:$20 sps:$4 sm:$0xff]   ;;  %v3799_v12 = vcombine.low %v5552_v14, %v5555_v15 }
  0x94   : > { %1418 = vmatprep.subr.bf16.mxu1 %v4604_v11  ;;  %v3970_v11 = vcombine.high %v5714_v7, %v5714_v7  ;;  %v4687_v14 = vld [vmem:[%s6543_s1 + $0x564] ss:$8 sps:$4 sm:$0xff]  }
  0x96   : > { %1446 = vmatpush1.bf16.msra.mxu0 %v4605_v16  ;;  %v1652_v16 = vrot.slane %v3968_v5, 2  ;;  %v1658_v18 = vrot.slane %v3970_v11, 2  ;;  %v4748_v5 = vld [vmem:[%s6543_s1 + $0x6c0] ss:$8 sps:$4 sm:$0xff]   ;;  %v4754_v11 = vld [vmem:[%s6543_s1 + $0x6b0] ss:$8 sps:$4 sm:$0xff]  }
  0x97   : > { %1419 = vmatpush2.bf16.msra.mxu1 %v4602_v13  ;;  %1447 = vmatprep.subr.bf16.mxu0 %v4613_v19  ;;  %v1651_v13 = vrot.slane %v3963_v4, 2  ;;  %v4678_v19 = vld [vmem:[%s6543_s1 + $0x570] ss:$8 sps:$4 sm:$0xff]   ;;  %v4745_v4 = vld [vmem:[%s6543_s1 + $0x5c0] ss:$8 sps:$4 sm:$0xff]  }
  0x98   : > { %1420 = vmatprep.subr.bf16.mxu1 %v4610_v17  ;;  %v1657_v17 = vrot.slane %v3965_v10, 2  ;;  %v4751_v10 = vld [vmem:[%s6543_s1 + $0x5b0] ss:$8 sps:$4 sm:$0xff]  }
  0x9a   : > { %1448 = vmatpush1.bf16.msra.mxu0 %v4611_v21  ;;  %v4690_v21 = vld [vmem:[%s6543_s1 + $0x664] ss:$8 sps:$4 sm:$0xff]  }
  0x9b   : > { %1421 = vmatpush2.bf16.msra.mxu1 %v4608_v20  ;;  %1449 = vmatprep.subr.bf16.mxu0 %v4619_v23  ;;  %v4681_v20 = vld [vmem:[%s6543_s1 + $0x670] ss:$8 sps:$4 sm:$0xff]   ;;  %v1653_v23 = vsel %vm1647_vm0, %v1651_v13, %v1652_v16  ;;  %v4762_v13 = vld [vmem:[%s6543_s1 + $0x6a4] ss:$8 sps:$4 sm:$0xff]   ;;  %v4757_v16 = vld [vmem:[%s6543_s1 + $0x5a0] ss:$8 sps:$4 sm:$0xff]  }
  0x9c   : > { %1422 = vmatprep.subr.bf16.mxu1 %v4616_v22  ;;  %v4685_v22 = vld [vmem:[%s6543_s1 + $0x560] ss:$8 sps:$4 sm:$0xff]  }
  0x9e   : > { %1450 = vmatpush1.bf16.msra.mxu0 %v4617_v25  ;;  %v4688_v25 = vld [vmem:[%s6543_s1 + $0x660] ss:$8 sps:$4 sm:$0xff]  }
  0x9f   : > { %1423 = vmatpush2.bf16.msra.mxu1 %v4614_v24  ;;  %1451 = vmatprep.subr.bf16.mxu0 %v4625_v27  ;;  %v1659_v24 = vsel %vm1647_vm0, %v1657_v17, %v1658_v18  ;;  %v4696_v27 = vld [vmem:[%s6543_s1 + $0x654] ss:$8 sps:$4 sm:$0xff]   ;;  %v4760_v17 = vld [vmem:[%s6543_s1 + $0x6a0] ss:$8 sps:$4 sm:$0xff]  }
  0xa0   : > { %1424 = vmatprep.subr.bf16.mxu1 %v4622_v26  ;;  %v4693_v26 = vld [vmem:[%s6543_s1 + $0x554] ss:$8 sps:$4 sm:$0xff]  }
  0xa1   : > { %v4765_v18 = vld [vmem:[%s6543_s1 + $0x594] ss:$8 sps:$4 sm:$0xff]  }
  0xa2   : > { %1452 = vmatpush1.bf16.msra.mxu0 %v4623_v29  ;;  %v4694_v29 = vld [vmem:[%s6543_s1 + $0x650] ss:$8 sps:$4 sm:$0xff]  }
  0xa3   : > { %1425 = vmatpush2.bf16.msra.mxu1 %v4620_v28  ;;  %1453 = vmatprep.subr.bf16.mxu0 %v4630_v30  ;;  %v4691_v28 = vld [vmem:[%s6543_s1 + $0x550] ss:$8 sps:$4 sm:$0xff]   ;;  %v4699_v30 = vld [vmem:[%s6543_s1 + $0x544] ss:$8 sps:$4 sm:$0xff]  }
  0xa4   : > { %1480 = vmatprep.subr.bf16.mxu1 %v4633_v31  ;;  %v4702_v31 = vld [vmem:[%s6543_s1 + $0x644] ss:$8 sps:$4 sm:$0xff]  }
  0xa6   : > { %1427 = vmatmul.mubr.bf16.vlgmr.msra.gmra.mxu1 %v3797_v33  ;;  %1454 = vmatpush2.bf16.msra.mxu0 %v4628_v34  ;;  %v4697_v33 = vld [vmem:[%s6543_s1 + $0x540] ss:$8 sps:$4 sm:$0xff]  }
  0xa7   : > { %1481 = vmatpush1.bf16.msra.mxu1 %v4631_v35  ;;  %1455 = vmatprep.subr.bf16.mxu0 %v4636_v36  ;;  %v4700_v34 = vld [vmem:[%s6543_s1 + $0x640] ss:$8 sps:$4 sm:$0xff]   ;;  %v4705_v35 = vld [vmem:[%s6543_s1 + $0x534] ss:$8 sps:$4 sm:$0xff]  }
  0xa8   : > { %1482 = vmatprep.subr.bf16.mxu1 %v4639_v37  ;;  %1512 = vmatprep.mubr.bf16.mxu1 %v5092_v32  ;;  %v4708_v36 = vld [vmem:[%s6543_s1 + $0x634] ss:$8 sps:$4 sm:$0xff]   ;;  %v4703_v37 = vld [vmem:[%s6543_s1 + $0x530] ss:$8 sps:$4 sm:$0xff]  }
  0xaa   : > { %1456 = vmatpush2.bf16.msra.mxu0 %v4634_v38  ;;  %v4706_v38 = vld [vmem:[%s6543_s1 + $0x630] ss:$8 sps:$4 sm:$0xff]  }
  0xab   : > { %1483 = vmatpush1.bf16.msra.mxu1 %v4637_v39  ;;  %1457 = vmatprep.subr.bf16.mxu0 %v4642_v40  ;;  %v4711_v39 = vld [vmem:[%s6543_s1 + $0x524] ss:$8 sps:$4 sm:$0xff]  }
  0xac   : > { %1484 = vmatprep.subr.bf16.mxu1 %v4645_v41  ;;  %v4714_v40 = vld [vmem:[%s6543_s1 + $0x624] ss:$8 sps:$4 sm:$0xff]   ;;  %v4709_v41 = vld [vmem:[%s6543_s1 + $0x520] ss:$8 sps:$4 sm:$0xff]  }
  0xae   : > { %1458 = vmatpush2.bf16.msra.mxu0 %v4640_v42  ;;  %v4712_v42 = vld [vmem:[%s6543_s1 + $0x620] ss:$8 sps:$4 sm:$0xff]  }
  0xaf   : > { %1485 = vmatpush1.bf16.msra.mxu1 %v4643_v43  ;;  %1459 = vmatprep.subr.bf16.mxu0 %v4648_v44  ;;  %v4717_v43 = vld [vmem:[%s6543_s1 + $0x514] ss:$8 sps:$4 sm:$0xff]  }
  0xb0   : > { %1486 = vmatprep.subr.bf16.mxu1 %v4651_v45  ;;  %v4720_v44 = vld [vmem:[%s6543_s1 + $0x614] ss:$8 sps:$4 sm:$0xff]   ;;  %v4715_v45 = vld [vmem:[%s6543_s1 + $0x510] ss:$8 sps:$4 sm:$0xff]  }
  0xb2   : > { %1460 = vmatpush2.bf16.msra.mxu0 %v4646_v46  ;;  %v4718_v46 = vld [vmem:[%s6543_s1 + $0x610] ss:$8 sps:$4 sm:$0xff]  }
  0xb3   : > { %1487 = vmatpush1.bf16.msra.mxu1 %v4649_v47  ;;  %1461 = vmatprep.subr.bf16.mxu0 %v4654_v48  ;;  %v4723_v47 = vld [vmem:[%s6543_s1 + $0x504] ss:$8 sps:$4 sm:$0xff]  }
  0xb4   : > { %1488 = vmatprep.subr.bf16.mxu1 %v4657_v49  ;;  %v4726_v48 = vld [vmem:[%s6543_s1 + $0x604] ss:$8 sps:$4 sm:$0xff]   ;;  %v4721_v49 = vld [vmem:[%s6543_s1 + $0x500] ss:$8 sps:$4 sm:$0xff]  }
  0xb6   : > { %1462 = vmatpush2.bf16.msra.mxu0 %v4652_v50  ;;  %v4724_v50 = vld [vmem:[%s6543_s1 + $0x600] ss:$8 sps:$4 sm:$0xff]  }
  0xb7   : > { %1489 = vmatpush1.bf16.msra.mxu1 %v4655_v51  ;;  %1463 = vmatprep.subr.bf16.mxu0 %v4660_v52  ;;  %v4729_v51 = vld [vmem:[%s6543_s1 + $0x5f4] ss:$8 sps:$4 sm:$0xff]  }
  0xb8   : > { %1490 = vmatprep.subr.bf16.mxu1 %v4663_v53  ;;  %v4732_v52 = vld [vmem:[%s6543_s1 + $0x6f4] ss:$8 sps:$4 sm:$0xff]   ;;  %v4727_v53 = vld [vmem:[%s6543_s1 + $0x5f0] ss:$8 sps:$4 sm:$0xff]  }
  0xba   : > { %1464 = vmatpush2.bf16.msra.mxu0 %v4658_v55  ;;  %v4730_v55 = vld [vmem:[%s6543_s1 + $0x6f0] ss:$8 sps:$4 sm:$0xff]  }
  0xbb   : > { %1491 = vmatpush1.bf16.msra.mxu1 %v4661_v56  ;;  %1465 = vmatprep.subr.bf16.mxu0 %v4666_v57  ;;  %v4735_v56 = vld [vmem:[%s6543_s1 + $0x5e4] ss:$8 sps:$4 sm:$0xff]  }
  0xbc   : > { %1492 = vmatprep.subr.bf16.mxu1 %v4669_v58  ;;  %v4738_v57 = vld [vmem:[%s6543_s1 + $0x6e4] ss:$8 sps:$4 sm:$0xff]   ;;  %v4733_v58 = vld [vmem:[%s6543_s1 + $0x5e0] ss:$8 sps:$4 sm:$0xff]  }
  0xbe   : > { %1466 = vmatpush2.bf16.msra.mxu0 %v4664_v59  ;;  %v4736_v59 = vld [vmem:[%s6543_s1 + $0x6e0] ss:$8 sps:$4 sm:$0xff]  }
  0xbf   : > { %1493 = vmatpush1.bf16.msra.mxu1 %v4667_v60  ;;  %1467 = vmatprep.subr.bf16.mxu0 %v4672_v61  ;;  %v4741_v60 = vld [vmem:[%s6543_s1 + $0x5d4] ss:$8 sps:$4 sm:$0xff]  }
  0xc0   : > { %1494 = vmatprep.subr.bf16.mxu1 %v4675_v62  ;;  %v4744_v61 = vld [vmem:[%s6543_s1 + $0x6d4] ss:$8 sps:$4 sm:$0xff]   ;;  %v4739_v62 = vld [vmem:[%s6543_s1 + $0x5d0] ss:$8 sps:$4 sm:$0xff]  }
  0xc2   : > { %1468 = vmatpush2.bf16.msra.mxu0 %v4670_v63  ;;  %v4742_v63 = vld [vmem:[%s6543_s1 + $0x6d0] ss:$8 sps:$4 sm:$0xff]  }
  0xc3   : > { %1495 = vmatpush1.bf16.msra.mxu1 %v4673_v0  ;;  %2068 = vmatprep.subr.bf16.mxu0 %v4680_v1  ;;  %v4747_v0 = vld [vmem:[%s6543_s1 + $0x5c4] ss:$8 sps:$4 sm:$0xff]  }
  0xc4   : > { %2111 = vmatprep.subr.bf16.mxu1 %v4683_v8  ;;  %v4750_v1 = vld [vmem:[%s6543_s1 + $0x6c4] ss:$8 sps:$4 sm:$0xff]   ;;  %v4753_v8 = vld [vmem:[%s6543_s1 + $0x5b4] ss:$8 sps:$4 sm:$0xff]  }
  0xc5   : > { %1470 = vmatmul.mubr.bf16.vlgmr.msra.gmra.mxu0 %v3799_v12  ;;  %v4759_v12 = vld [vmem:[%s6543_s1 + $0x5a4] ss:$8 sps:$4 sm:$0xff]  }
  0xc6   : > { %1513 = vmatmul.mubr.bf16.vlgmr.msra.gmra.mxu1 %v4684_v9  ;;  %2069 = vmatpush1.bf16.msra.mxu0 %v4678_v19  ;;  %v4756_v9 = vld [vmem:[%s6543_s1 + $0x6b4] ss:$8 sps:$4 sm:$0xff]  }
  0xc7   : > { %2112 = vmatpush1.bf16.msra.mxu1 %v4681_v20  ;;  %2070 = vmatprep.subr.bf16.mxu0 %v4687_v14  ;;  %v4768_v19 = vld [vmem:[%s6543_s1 + $0x694] ss:$8 sps:$4 sm:$0xff]   ;;  %v4763_v20 = vld [vmem:[%s6543_s1 + $0x590] ss:$8 sps:$4 sm:$0xff]  }
  0xc8   : > { %2113 = vmatprep.subr.bf16.mxu1 %v4690_v21  ;;  %2100 = vmatprep.mubr.bf16.mxu0 %v1653_v23  ;;  %v4766_v14 = vld [vmem:[%s6543_s1 + $0x690] ss:$8 sps:$4 sm:$0xff]   ;;  %v3962_v21 = vcombine.low %v5701_v2, %v5483_v54  ;;  %v3964_v23 = vcombine.low %v5711_v6, %v5555_v15  ;;  %v4774_v54 = vld [vmem:[%s6543_s1 + $0x684] ss:$8 sps:$4 sm:$0xff]   ;;  %v4769_v2 = vld [vmem:[%s6543_s1 + $0x580] ss:$8 sps:$4 sm:$0xff]  }
  0xc9   : > { %2143 = vmatprep.mubr.bf16.mxu1 %v1659_v24  ;;  %v3969_v24 = vcombine.low %v5714_v7, %v5714_v7  ;;  %v4772_v15 = vld [vmem:[%s6543_s1 + $0x680] ss:$8 sps:$4 sm:$0xff]  }
  0xca   : > { %2071 = vmatpush1.bf16.msra.mxu0 %v4685_v22  ;;  %v3967_v22 = vcombine.low %v5704_v3, %v5704_v3  ;;  %v4881_v3 = vld [vmem:[%s5334_s18 + $0x40] ss:$20 sps:$4 sm:$0xfc]   ;;  %v1648_v7 = vrot.slane %v3962_v21, 2 }
  0xcb   : > { %2114 = vmatpush1.bf16.msra.mxu1 %v4688_v25  ;;  %2072 = vmatprep.subr.bf16.mxu0 %v4693_v26  ;;  %v5911_v25 = vld [vmem:[%s5334_s18 + $0x64] sm:$0x33]  ;;  %v4833_v21 = vld [vmem:[%s6543_s1 + $0x870] ss:$8 sps:$4 sm:$0xff]  }
  0xcc   : > { %2115 = vmatprep.subr.bf16.mxu1 %v4696_v27  ;;  %v4771_v26 = vld [vmem:[%s6543_s1 + $0x584] ss:$8 sps:$4 sm:$0xff]   ;;  %v4147_v6 = vcombine.high %v5911_v25, %v5911_v25  ;;  %v1649_v27 = vrot.slane %v3967_v22, 2  ;;  %v4836_v22 = vld [vmem:[%s6543_s1 + $0x8f0] ss:$8 sps:$4 sm:$0xff]  }
  0xce   : > { %2073 = vmatpush1.bf16.msra.mxu0 %v4691_v28  ;;  %v1654_v28 = vrot.slane %v3964_v23, 2 }
  0xcf   : > { %2116 = vmatpush1.bf16.msra.mxu1 %v4694_v29  ;;  %2074 = vmatprep.subr.bf16.mxu0 %v4699_v30  ;;  %v1655_v29 = vrot.slane %v3969_v24, 2  ;;  %v4785_v30 = vld [vmem:[%s6543_s1 + $0x774] ss:$8 sps:$4 sm:$0xff]  }
  0xd0   : > { %2117 = vmatprep.subr.bf16.mxu1 %v4702_v31  ;;  %v4788_v31 = vld [vmem:[%s6543_s1 + $0x7f4] ss:$8 sps:$4 sm:$0xff]  }
  0xd2   : > { %2075 = vmatpush1.bf16.msra.mxu0 %v4697_v33  ;;  %v4783_v33 = vld [vmem:[%s6543_s1 + $0x770] ss:$8 sps:$4 sm:$0xff]  }
  0xd3   : > { %2118 = vmatpush1.bf16.msra.mxu1 %v4700_v34  ;;  %2076 = vmatprep.subr.bf16.mxu0 %v4705_v35  ;;  %v2328_v34 = vrot.slane %v4881_v3, 2  ;;  %v2329_v35 = vrot.slane %v4147_v6, 2  ;;  %v4842_v3 = vld [vmem:[%s6543_s1 + $0x8e0] ss:$8 sps:$4 sm:$0xff]  }
  0xd4   : > { %2119 = vmatprep.subr.bf16.mxu1 %v4708_v36  ;;  %v1650_v36 = vsel %vm1647_vm0, %v1648_v7, %v1649_v27  ;;  %v4847_v7 = vld [vmem:[%s6543_s1 + $0x854] ss:$8 sps:$4 sm:$0xff]  }
  0xd5   : > { %v4850_v27 = vld [vmem:[%s6543_s1 + $0x8d4] ss:$8 sps:$4 sm:$0xff]  }
  0xd6   : > { %2077 = vmatpush1.bf16.msra.mxu0 %v4703_v37  ;;  %v1656_v37 = vsel %vm1647_vm0, %v1654_v28, %v1655_v29  ;;  %v4845_v28 = vld [vmem:[%s6543_s1 + $0x850] ss:$8 sps:$4 sm:$0xff]  }
  0xd7   : > { %2120 = vmatpush1.bf16.msra.mxu1 %v4706_v38  ;;  %2078 = vmatprep.subr.bf16.mxu0 %v4711_v39  ;;  %v4786_v38 = vld [vmem:[%s6543_s1 + $0x7f0] ss:$8 sps:$4 sm:$0xff]   ;;  %v4791_v39 = vld [vmem:[%s6543_s1 + $0x764] ss:$8 sps:$4 sm:$0xff]  }
  0xd8   : > { %2121 = vmatprep.subr.bf16.mxu1 %v4714_v40  ;;  %v4794_v40 = vld [vmem:[%s6543_s1 + $0x7e4] ss:$8 sps:$4 sm:$0xff]   ;;  %v4848_v29 = vld [vmem:[%s6543_s1 + $0x8d0] ss:$8 sps:$4 sm:$0xff]  }
  0xda   : > { %2079 = vmatpush1.bf16.msra.mxu0 %v4709_v41  ;;  %v4789_v41 = vld [vmem:[%s6543_s1 + $0x760] ss:$8 sps:$4 sm:$0xff]  }
  0xdb   : > { %2122 = vmatpush1.bf16.msra.mxu1 %v4712_v42  ;;  %2080 = vmatprep.subr.bf16.mxu0 %v4717_v43  ;;  %v2330_v42 = vsel %vm1647_vm0, %v2328_v34, %v2329_v35  ;;  %v4792_v43 = vld [vmem:[%s6543_s1 + $0x7e0] ss:$8 sps:$4 sm:$0xff]   ;;  %v4859_v35 = vld [vmem:[%s6543_s1 + $0x834] ss:$8 sps:$4 sm:$0xff]  }
  0xdc   : > { %2123 = vmatprep.subr.bf16.mxu1 %v4720_v44  ;;  %v4797_v44 = vld [vmem:[%s6543_s1 + $0x754] ss:$8 sps:$4 sm:$0xff]   ;;  %v4854_v34 = vld [vmem:[%s6543_s1 + $0x8c0] ss:$8 sps:$4 sm:$0xff]  }
  0xde   : > { %2081 = vmatpush1.bf16.msra.mxu0 %v4715_v45  ;;  %v4800_v45 = vld [vmem:[%s6543_s1 + $0x7d4] ss:$8 sps:$4 sm:$0xff]  }
  0xdf   : > { %2124 = vmatpush1.bf16.msra.mxu1 %v4718_v46  ;;  %2082 = vmatprep.subr.bf16.mxu0 %v4723_v47  ;;  %v4795_v46 = vld [vmem:[%s6543_s1 + $0x750] ss:$8 sps:$4 sm:$0xff]  }
  0xe0   : > { %2125 = vmatprep.subr.bf16.mxu1 %v4726_v48  ;;  %v4798_v47 = vld [vmem:[%s6543_s1 + $0x7d0] ss:$8 sps:$4 sm:$0xff]   ;;  %v4803_v48 = vld [vmem:[%s6543_s1 + $0x744] ss:$8 sps:$4 sm:$0xff]  }
  0xe2   : > { %2083 = vmatpush1.bf16.msra.mxu0 %v4721_v49  ;;  %v4806_v49 = vld [vmem:[%s6543_s1 + $0x7c4] ss:$8 sps:$4 sm:$0xff]  }
  0xe3   : > { %2126 = vmatpush1.bf16.msra.mxu1 %v4724_v50  ;;  %2084 = vmatprep.subr.bf16.mxu0 %v4729_v51  ;;  %v4801_v50 = vld [vmem:[%s6543_s1 + $0x740] ss:$8 sps:$4 sm:$0xff]  }
  0xe4   : > { %2127 = vmatprep.subr.bf16.mxu1 %v4732_v52  ;;  %v4804_v51 = vld [vmem:[%s6543_s1 + $0x7c0] ss:$8 sps:$4 sm:$0xff]   ;;  %v4809_v52 = vld [vmem:[%s6543_s1 + $0x734] ss:$8 sps:$4 sm:$0xff]  }
  0xe6   : > { %2085 = vmatpush2.bf16.msra.mxu0 %v4727_v53  ;;  %v4812_v53 = vld [vmem:[%s6543_s1 + $0x7b4] ss:$8 sps:$4 sm:$0xff]  }
  0xe7   : > { %2128 = vmatpush2.bf16.msra.mxu1 %v4730_v55  ;;  %2086 = vmatprep.subr.bf16.mxu0 %v4735_v56  ;;  %v4807_v55 = vld [vmem:[%s6543_s1 + $0x730] ss:$8 sps:$4 sm:$0xff]  }
  0xe8   : > { %2129 = vmatprep.subr.bf16.mxu1 %v4738_v57  ;;  %v4810_v56 = vld [vmem:[%s6543_s1 + $0x7b0] ss:$8 sps:$4 sm:$0xff]   ;;  %v4815_v57 = vld [vmem:[%s6543_s1 + $0x724] ss:$8 sps:$4 sm:$0xff]  }
  0xea   : > { %2087 = vmatpush2.bf16.msra.mxu0 %v4733_v58  ;;  %v4818_v58 = vld [vmem:[%s6543_s1 + $0x7a4] ss:$8 sps:$4 sm:$0xff]  }
  0xeb   : > { %2130 = vmatpush2.bf16.msra.mxu1 %v4736_v59  ;;  %2088 = vmatprep.subr.bf16.mxu0 %v4741_v60  ;;  %v4813_v59 = vld [vmem:[%s6543_s1 + $0x720] ss:$8 sps:$4 sm:$0xff]  }
  0xec   : > { %2131 = vmatprep.subr.bf16.mxu1 %v4744_v61  ;;  %v4816_v60 = vld [vmem:[%s6543_s1 + $0x7a0] ss:$8 sps:$4 sm:$0xff]   ;;  %v4821_v61 = vld [vmem:[%s6543_s1 + $0x714] ss:$8 sps:$4 sm:$0xff]  }
  0xee   : > { %2089 = vmatpush2.bf16.msra.mxu0 %v4739_v62  ;;  %v4824_v62 = vld [vmem:[%s6543_s1 + $0x794] ss:$8 sps:$4 sm:$0xff]  }
  0xef   : > { %2132 = vmatpush2.bf16.msra.mxu1 %v4742_v63  ;;  %2090 = vmatprep.subr.bf16.mxu0 %v4747_v0  ;;  %v1525_v63 = vld [vmem:[%s5334_s18 + $0x10] sm:$0xc]  ;;  %v6012_v0 = vld [vmem:[%s5334_s18 + $0x24] sm:$0xf] }
  0xf0   : > { %2133 = vmatprep.subr.bf16.mxu1 %v4750_v1  ;;  %v4819_v1 = vld [vmem:[%s6543_s1 + $0x710] ss:$8 sps:$4 sm:$0xff]  }
  0xf2   : > { %2091 = vmatpush2.bf16.msra.mxu0 %v4745_v4  ;;  %v4822_v4 = vld [vmem:[%s6543_s1 + $0x790] ss:$8 sps:$4 sm:$0xff]  }
  0xf3   : > { %2134 = vmatpush2.bf16.msra.mxu1 %v4748_v5  ;;  %2092 = vmatprep.subr.bf16.mxu0 %v4753_v8  ;;  %v4827_v5 = vld [vmem:[%s6543_s1 + $0x704] ss:$8 sps:$4 sm:$0xff]   ;;  %v4832_v8 = vld [vmem:[%s5334_s18 + $0x38] ss:$0 sps:$4 sm:$0x33]  }
  0xf4   : > { %2135 = vmatprep.subr.bf16.mxu1 %v4756_v9  ;;  %v3966_v9 = vcombine.low %v1525_v63, %v6012_v0  ;;  %v4895_v63 = vld [vmem:[%s6543_s1 + $0x9e0] ss:$8 sps:$4 sm:$0xff]  }
  0xf6   : > { %2093 = vmatpush2.bf16.msra.mxu0 %v4751_v10  ;;  %v6026_v10 = vld [vmem:[%s5334_s18 + $0x6c] sm:$0x33] }
  0xf7   : > { %2136 = vmatpush2.bf16.msra.mxu1 %v4754_v11  ;;  %2094 = vmatprep.subr.bf16.mxu0 %v4759_v12  ;;  %v4830_v11 = vld [vmem:[%s6543_s1 + $0x784] ss:$8 sps:$4 sm:$0xff]   ;;  %v4825_v12 = vld [vmem:[%s6543_s1 + $0x700] ss:$8 sps:$4 sm:$0xff]  }
  0xf8   : > { %2137 = vmatprep.subr.bf16.mxu1 %v4762_v13  ;;  %v4828_v13 = vld [vmem:[%s6543_s1 + $0x780] ss:$8 sps:$4 sm:$0xff]  }
  0xfa   : > { %2095 = vmatpush2.bf16.msra.mxu0 %v4757_v16  ;;  %v4934_v16 = vld [vmem:[%s5334_s18 + $0x48] ss:$20 sps:$4 sm:$0xfc]  }
  0xfb   : > { %2138 = vmatpush2.bf16.msra.mxu1 %v4760_v17  ;;  %2096 = vmatprep.subr.bf16.mxu0 %v4765_v18  ;;  %v4149_v17 = vcombine.high %v6026_v10, %v6026_v10  ;;  %v1660_v18 = vrot.slane %v3966_v9, 2  ;;  %v2334_v23 = vrot.slane %v4934_v16, 2  ;;  %v4906_v9 = vld [vmem:[%s6543_s1 + $0x944] ss:$8 sps:$4 sm:$0xff]   ;;  %v4912_v16 = vld [vmem:[%s6543_s1 + $0x934] ss:$8 sps:$4 sm:$0xff]  }
  0xfc   : > { %2139 = vmatprep.subr.bf16.mxu1 %v4768_v19  ;;  %v1661_v19 = vrot.slane %v4832_v8, 2  ;;  %v4901_v8 = vld [vmem:[%s6543_s1 + $0x9d0] ss:$8 sps:$4 sm:$0xff]  }
  0xfd   : > { %v2335_v24 = vrot.slane %v4149_v17, 2  ;;  %v4915_v17 = vld [vmem:[%s6543_s1 + $0x9b4] ss:$8 sps:$4 sm:$0xff]  }
  0xfe   : > { %2097 = vmatpush2.bf16.msra.mxu0 %v4763_v20  ;;  %v4835_v20 = vld [vmem:[%s6543_s1 + $0x874] ss:$8 sps:$4 sm:$0xff]  }
  0xff   : > { %2140 = vmatpush2.bf16.msra.mxu1 %v4766_v14  ;;  %2098 = vmatprep.subr.bf16.mxu0 %v4771_v26  ;;  %v4838_v14 = vld [vmem:[%s6543_s1 + $0x8f4] ss:$8 sps:$4 sm:$0xff]   ;;  %v1662_v26 = vsel %vm1647_vm0, %v1660_v18, %v1661_v19  ;;  %v2336_v6 = vsel %vm1647_vm0, %v2334_v23, %v2335_v24  ;;  %v4910_v18 = vld [vmem:[%s6543_s1 + $0x930] ss:$8 sps:$4 sm:$0xff]  }
 0x100   : > { %2141 = vmatprep.subr.bf16.mxu1 %v4774_v54  ;;  %v4841_v54 = vld [vmem:[%s6543_s1 + $0x864] ss:$8 sps:$4 sm:$0xff]   ;;  %v4913_v19 = vld [vmem:[%s6543_s1 + $0x9b0] ss:$8 sps:$4 sm:$0xff]   ;;  %v4924_v23 = vld [vmem:[%s6543_s1 + $0x914] ss:$8 sps:$4 sm:$0xff]  }
 0x101   : > { %v4927_v24 = vld [vmem:[%s6543_s1 + $0x994] ss:$8 sps:$4 sm:$0xff]  }
 0x102   : > { %2099 = vmatpush2.bf16.msra.mxu0 %v4769_v2  ;;  %v4844_v2 = vld [vmem:[%s6543_s1 + $0x8e4] ss:$8 sps:$4 sm:$0xff]  }
 0x103   : > { %2142 = vmatpush2.bf16.msra.mxu1 %v4772_v15  ;;  %2154 = vmatprep.subr.bf16.mxu0 %v4785_v30  ;;  %v4839_v15 = vld [vmem:[%s6543_s1 + $0x860] ss:$8 sps:$4 sm:$0xff]   ;;  %v4853_v30 = vld [vmem:[%s6543_s1 + $0x844] ss:$8 sps:$4 sm:$0xff]  }
 0x104   : > { %2745 = vmatprep.subr.bf16.mxu1 %v4788_v31  ;;  %v4856_v31 = vld [vmem:[%s6543_s1 + $0x8c4] ss:$8 sps:$4 sm:$0xff]  }
 0x105   : > { %2101 = vmatmul.mubr.bf16.vlgmr.msra.gmra.mxu0 %v1650_v36  ;;  %v4862_v36 = vld [vmem:[%s6543_s1 + $0x8b4] ss:$8 sps:$4 sm:$0xff]  }
 0x106   : > { %2144 = vmatmul.mubr.bf16.vlgmr.msra.gmra.mxu1 %v1656_v37  ;;  %2155 = vmatpush1.bf16.msra.mxu0 %v4783_v33  ;;  %v4851_v33 = vld [vmem:[%s6543_s1 + $0x840] ss:$8 sps:$4 sm:$0xff]   ;;  %v4857_v37 = vld [vmem:[%s6543_s1 + $0x830] ss:$8 sps:$4 sm:$0xff]  }
 0x107   : > { %2746 = vmatpush1.bf16.msra.mxu1 %v4786_v38  ;;  %2156 = vmatprep.subr.bf16.mxu0 %v4791_v39  ;;  %v4860_v38 = vld [vmem:[%s6543_s1 + $0x8b0] ss:$8 sps:$4 sm:$0xff]   ;;  %v4865_v39 = vld [vmem:[%s6543_s1 + $0x824] ss:$8 sps:$4 sm:$0xff]  }
 0x108   : > { %2747 = vmatprep.subr.bf16.mxu1 %v4794_v40  ;;  %2186 = vmatprep.mubr.bf16.mxu0 %v5092_v32  ;;  %v4868_v40 = vld [vmem:[%s6543_s1 + $0x8a4] ss:$8 sps:$4 sm:$0xff]  }
 0x109   : > { %2777 = vmatprep.mubr.bf16.mxu1 %v2330_v42  ;;  %v4866_v42 = vld [vmem:[%s6543_s1 + $0x8a0] ss:$8 sps:$4 sm:$0xff]  }
 0x10a   : > { %2157 = vmatpush1.bf16.msra.mxu0 %v4789_v41  ;;  %v4863_v41 = vld [vmem:[%s6543_s1 + $0x820] ss:$8 sps:$4 sm:$0xff]  }
 0x10b   : > { %2748 = vmatpush1.bf16.msra.mxu1 %v4792_v43  ;;  %2158 = vmatprep.subr.bf16.mxu0 %v4797_v44  ;;  %v4871_v43 = vld [vmem:[%s6543_s1 + $0x814] ss:$8 sps:$4 sm:$0xff]  }
 0x10c   : > { %2749 = vmatprep.subr.bf16.mxu1 %v4800_v45  ;;  %v4874_v44 = vld [vmem:[%s6543_s1 + $0x894] ss:$8 sps:$4 sm:$0xff]   ;;  %v4869_v45 = vld [vmem:[%s6543_s1 + $0x810] ss:$8 sps:$4 sm:$0xff]  }
 0x10e   : > { %2159 = vmatpush1.bf16.msra.mxu0 %v4795_v46  ;;  %v4872_v46 = vld [vmem:[%s6543_s1 + $0x890] ss:$8 sps:$4 sm:$0xff]  }
 0x10f   : > { %2750 = vmatpush1.bf16.msra.mxu1 %v4798_v47  ;;  %2160 = vmatprep.subr.bf16.mxu0 %v4803_v48  ;;  %v4890_v47 = vld [vmem:[%s5334_s18 + $0x3c] ss:$20 sps:$4 sm:$0xfc]   ;;  %v4146_v48 = vcombine.low %v5911_v25, %v5911_v25 }
 0x110   : > { %2751 = vmatprep.subr.bf16.mxu1 %v4806_v49  ;;  %v4877_v49 = vld [vmem:[%s6543_s1 + $0x804] ss:$8 sps:$4 sm:$0xff]   ;;  %v4878_v25 = vld [vmem:[%s6543_s1 + $0x880] ss:$8 sps:$4 sm:$0xff]  }
 0x112   : > { %2161 = vmatpush1.bf16.msra.mxu0 %v4801_v50  ;;  %v4880_v50 = vld [vmem:[%s6543_s1 + $0x884] ss:$8 sps:$4 sm:$0xff]  }
 0x113   : > { %2752 = vmatpush1.bf16.msra.mxu1 %v4804_v51  ;;  %2162 = vmatprep.subr.bf16.mxu0 %v4809_v52  ;;  %v4875_v51 = vld [vmem:[%s6543_s1 + $0x800] ss:$8 sps:$4 sm:$0xff]   ;;  %v2325_v52 = vrot.slane %v4890_v47, 2 }
 0x114   : > { %2753 = vmatprep.subr.bf16.mxu1 %v4812_v53  ;;  %v2326_v53 = vrot.slane %v4146_v48, 2  ;;  %v4947_v48 = vld [vmem:[%s6543_s1 + $0xa60] ss:$8 sps:$4 sm:$0xff]  }
 0x116   : > { %2163 = vmatpush1.bf16.msra.mxu0 %v4807_v55  ;;  %v4886_v55 = vld [vmem:[%s6543_s1 + $0x974] ss:$8 sps:$4 sm:$0xff]  }
 0x117   : > { %2754 = vmatpush1.bf16.msra.mxu1 %v4810_v56  ;;  %2164 = vmatprep.subr.bf16.mxu0 %v4815_v57  ;;  %v4889_v56 = vld [vmem:[%s6543_s1 + $0x9f4] ss:$8 sps:$4 sm:$0xff]   ;;  %v4884_v57 = vld [vmem:[%s6543_s1 + $0x970] ss:$8 sps:$4 sm:$0xff]  }
 0x118   : > { %2755 = vmatprep.subr.bf16.mxu1 %v4818_v58  ;;  %v4887_v58 = vld [vmem:[%s6543_s1 + $0x9f0] ss:$8 sps:$4 sm:$0xff]  }
 0x11a   : > { %2165 = vmatpush1.bf16.msra.mxu0 %v4813_v59  ;;  %v2327_v59 = vsel %vm1647_vm0, %v2325_v52, %v2326_v53  ;;  %v4956_v52 = vld [vmem:[%s6543_s1 + $0xb50] ss:$8 sps:$4 sm:$0xff]   ;;  %v4961_v53 = vld [vmem:[%s6543_s1 + $0xa44] ss:$8 sps:$4 sm:$0xff]  }
 0x11b   : > { %2756 = vmatpush1.bf16.msra.mxu1 %v4816_v60  ;;  %2166 = vmatprep.subr.bf16.mxu0 %v4821_v61  ;;  %v4894_v60 = vld [vmem:[%s6543_s1 + $0x964] ss:$8 sps:$4 sm:$0xff]  }
 0x11c   : > { %2757 = vmatprep.subr.bf16.mxu1 %v4824_v62  ;;  %v4897_v61 = vld [vmem:[%s6543_s1 + $0x9e4] ss:$8 sps:$4 sm:$0xff]   ;;  %v4892_v62 = vld [vmem:[%s6543_s1 + $0x960] ss:$8 sps:$4 sm:$0xff]  }
 0x11e   : > { %2167 = vmatpush1.bf16.msra.mxu0 %v4819_v1  ;;  %v4900_v1 = vld [vmem:[%s6543_s1 + $0x954] ss:$8 sps:$4 sm:$0xff]  }
 0x11f   : > { %2758 = vmatpush1.bf16.msra.mxu1 %v4822_v4  ;;  %2168 = vmatprep.subr.bf16.mxu0 %v4827_v5  ;;  %v4903_v4 = vld [vmem:[%s6543_s1 + $0x9d4] ss:$8 sps:$4 sm:$0xff]   ;;  %v4898_v5 = vld [vmem:[%s6543_s1 + $0x950] ss:$8 sps:$4 sm:$0xff]  }
 0x120   : > { %2759 = vmatprep.subr.bf16.mxu1 %v4830_v11  ;;  %v4909_v11 = vld [vmem:[%s6543_s1 + $0x9c4] ss:$8 sps:$4 sm:$0xff]  }
 0x122   : > { %2169 = vmatpush1.bf16.msra.mxu0 %v4825_v12  ;;  %v4904_v12 = vld [vmem:[%s6543_s1 + $0x940] ss:$8 sps:$4 sm:$0xff]  }
 0x123   : > { %2760 = vmatpush1.bf16.msra.mxu1 %v4828_v13  ;;  %2788 = vmatprep.subr.bf16.mxu0 %v4838_v14  ;;  %v4907_v13 = vld [vmem:[%s6543_s1 + $0x9c0] ss:$8 sps:$4 sm:$0xff]   ;;  %v4921_v14 = vld [vmem:[%s6543_s1 + $0x9a4] ss:$8 sps:$4 sm:$0xff]  }
 0x124   : > { %2761 = vmatprep.subr.bf16.mxu1 %v4835_v20  ;;  %v4918_v20 = vld [vmem:[%s6543_s1 + $0x924] ss:$8 sps:$4 sm:$0xff]  }
 0x125   : > { %2187 = vmatmul.mubr.bf16.vlgmr.msra.gmra.mxu0 %v1662_v26  ;;  %v4922_v26 = vld [vmem:[%s6543_s1 + $0x910] ss:$8 sps:$4 sm:$0xff]  }
 0x126   : > { %2789 = vmatpush1.bf16.msra.mxu0 %v4836_v22  ;;  %2820 = vmatprep.mubr.bf16.mxu0 %v2336_v6  ;;  %v4919_v22 = vld [vmem:[%s6543_s1 + $0x9a0] ss:$8 sps:$4 sm:$0xff]   ;;  %v4946_v6 = vld [vmem:[%s5334_s18 + $0x74] ss:$0 sps:$4 sm:$0x33]  }
 0x127   : > { %2762 = vmatpush2.bf16.msra.mxu1 %v4833_v21  ;;  %2790 = vmatprep.subr.bf16.mxu0 %v4844_v2  ;;  %v4916_v21 = vld [vmem:[%s6543_s1 + $0x920] ss:$8 sps:$4 sm:$0xff]   ;;  %v4937_v2 = vld [vmem:[%s5334_s18 + $0x44] ss:$20 sps:$4 sm:$0xfc]  }
 0x128   : > { %2763 = vmatprep.subr.bf16.mxu1 %v4841_v54  ;;  %v4925_v54 = vld [vmem:[%s6543_s1 + $0x990] ss:$8 sps:$4 sm:$0xff]  }
 0x12a   : > { %2791 = vmatpush1.bf16.msra.mxu0 %v4842_v3  ;;  %v4945_v3 = vld [vmem:[%s5334_s18 + $0x4c] ss:$20 sps:$4 sm:$0xfc]  }
 0x12b   : > { %2764 = vmatpush2.bf16.msra.mxu1 %v4839_v15  ;;  %2792 = vmatprep.subr.bf16.mxu0 %v4850_v27  ;;  %v4148_v15 = vcombine.low %v6026_v10, %v6026_v10  ;;  %v4933_v27 = vld [vmem:[%s6543_s1 + $0x984] ss:$8 sps:$4 sm:$0xff]   ;;  %v4931_v10 = vld [vmem:[%s6543_s1 + $0x980] ss:$8 sps:$4 sm:$0xff]  }
 0x12c   : > { %2765 = vmatprep.subr.bf16.mxu1 %v4847_v7  ;;  %v4930_v7 = vld [vmem:[%s6543_s1 + $0x904] ss:$8 sps:$4 sm:$0xff]  }
 0x12e   : > { %2793 = vmatpush1.bf16.msra.mxu0 %v4848_v29  ;;  %v2331_v29 = vrot.slane %v4937_v2, 2  ;;  %v5001_v2 = vld [vmem:[%s6543_s1 + $0xad0] ss:$8 sps:$4 sm:$0xff]  }
 0x12f   : > { %2766 = vmatpush2.bf16.msra.mxu1 %v4845_v28  ;;  %2794 = vmatprep.subr.bf16.mxu0 %v4856_v31  ;;  %v4928_v28 = vld [vmem:[%s6543_s1 + $0x900] ss:$8 sps:$4 sm:$0xff]   ;;  %v2337_v31 = vrot.slane %v4945_v3, 2  ;;  %v5009_v3 = vld [vmem:[%s6543_s1 + $0xac4] ss:$8 sps:$4 sm:$0xff]  }
 0x130   : > { %2767 = vmatprep.subr.bf16.mxu1 %v4853_v30  ;;  %v2332_v30 = vrot.slane %v4148_v15, 2  ;;  %v5004_v15 = vld [vmem:[%s6543_s1 + $0xbd0] ss:$8 sps:$4 sm:$0xff]  }
 0x132   : > { %2795 = vmatpush1.bf16.msra.mxu0 %v4854_v34  ;;  %v4941_v34 = vld [vmem:[%s6543_s1 + $0xa74] ss:$8 sps:$4 sm:$0xff]  }
 0x133   : > { %2768 = vmatpush2.bf16.msra.mxu1 %v4851_v33  ;;  %2796 = vmatprep.subr.bf16.mxu0 %v4862_v36  ;;  %v2338_v33 = vrot.slane %v4946_v6, 2  ;;  %v6251_v36 = vld [vmem:[%s5334_s18 + $0x28] sm:$0xff] }
 0x134   : > { %2769 = vmatprep.subr.bf16.mxu1 %v4859_v35  ;;  %v4944_v35 = vld [vmem:[%s6543_s1 + $0xb74] ss:$8 sps:$4 sm:$0xff]   ;;  %v5012_v6 = vld [vmem:[%s6543_s1 + $0xbc4] ss:$8 sps:$4 sm:$0xff]  }
 0x136   : > { %2797 = vmatpush1.bf16.msra.mxu0 %v4860_v38  ;;  %v2333_v38 = vsel %vm1647_vm0, %v2331_v29, %v2332_v30  ;;  %v5013_v29 = vld [vmem:[%s6543_s1 + $0xab0] ss:$8 sps:$4 sm:$0xff]  }
 0x137   : > { %2770 = vmatpush2.bf16.msra.mxu1 %v4857_v37  ;;  %2798 = vmatprep.subr.bf16.mxu0 %v4868_v40  ;;  %v6254_v37 = vld [vmem:[%s5334_s18 + $0x30] sm:$0xff] }
 0x138   : > { %2771 = vmatprep.subr.bf16.mxu1 %v4865_v39  ;;  %v4939_v39 = vld [vmem:[%s6543_s1 + $0xa70] ss:$8 sps:$4 sm:$0xff]  }
 0x139   : > { %v4942_v40 = vld [vmem:[%s6543_s1 + $0xb70] ss:$8 sps:$4 sm:$0xff]  }
 0x13a   : > { %2799 = vmatpush1.bf16.msra.mxu0 %v4866_v42  ;;  %v4949_v42 = vld [vmem:[%s6543_s1 + $0xa64] ss:$8 sps:$4 sm:$0xff]   ;;  %v5016_v30 = vld [vmem:[%s6543_s1 + $0xbb0] ss:$8 sps:$4 sm:$0xff]  }
 0x13b   : > { %2772 = vmatpush2.bf16.msra.mxu1 %v4863_v41  ;;  %2800 = vmatprep.subr.bf16.mxu0 %v4874_v44  ;;  %v2339_v41 = vsel %vm1647_vm0, %v2337_v31, %v2338_v33  ;;  %v6271_v44 = vld [vmem:[%s5334_s18 + $0x14] sm:$0xff] }
 0x13c   : > { %2773 = vmatprep.subr.bf16.mxu1 %v4871_v43  ;;  %v4952_v43 = vld [vmem:[%s6543_s1 + $0xb64] ss:$8 sps:$4 sm:$0xff]  }
 0x13d   : > { %v5021_v31 = vld [vmem:[%s6543_s1 + $0xaa4] ss:$8 sps:$4 sm:$0xff]  }
 0x13e   : > { %2801 = vmatpush1.bf16.msra.mxu0 %v4872_v46  ;;  %v6276_v46 = vld [vmem:[%s5334_s18 + $0x1c] sm:$0xff]  ;;  %v5024_v33 = vld [vmem:[%s6543_s1 + $0xba4] ss:$8 sps:$4 sm:$0xff]  }
 0x13f   : > { %2774 = vmatpush2.bf16.msra.mxu1 %v4869_v45  ;;  %2802 = vmatprep.subr.bf16.mxu0 %v4880_v50  ;;  %v4312_v45 = vcombine.high %v6271_v44, %v6251_v36  ;;  %v4314_v47 = vcombine.high %v6276_v46, %v6254_v37  ;;  %v4955_v50 = vld [vmem:[%s6543_s1 + $0xa54] ss:$8 sps:$4 sm:$0xff]  }
 0x140   : > { %2775 = vmatprep.subr.bf16.mxu1 %v4877_v49  ;;  %v4950_v49 = vld [vmem:[%s6543_s1 + $0xb60] ss:$8 sps:$4 sm:$0xff]  }
 0x142   : > { %2803 = vmatpush1.bf16.msra.mxu0 %v4878_v25  ;;  %v4953_v25 = vld [vmem:[%s6543_s1 + $0xa50] ss:$8 sps:$4 sm:$0xff]  }
 0x143   : > { %2776 = vmatpush2.bf16.msra.mxu1 %v4875_v51  ;;  %2804 = vmatprep.subr.bf16.mxu0 %v4886_v55  ;;  %v4958_v51 = vld [vmem:[%s6543_s1 + $0xb54] ss:$8 sps:$4 sm:$0xff]   ;;  %v4964_v55 = vld [vmem:[%s6543_s1 + $0xb44] ss:$8 sps:$4 sm:$0xff]  }
 0x144   : > { %2831 = vmatprep.subr.bf16.mxu1 %v4889_v56  ;;  %v4959_v56 = vld [vmem:[%s6543_s1 + $0xa40] ss:$8 sps:$4 sm:$0xff]  }
 0x146   : > { %2778 = vmatmul.mubr.bf16.vlgmr.msra.gmra.mxu1 %v2327_v59  ;;  %2805 = vmatpush2.bf16.msra.mxu0 %v4884_v57  ;;  %v4962_v57 = vld [vmem:[%s6543_s1 + $0xb40] ss:$8 sps:$4 sm:$0xff]   ;;  %v4970_v59 = vld [vmem:[%s6543_s1 + $0xb34] ss:$8 sps:$4 sm:$0xff]  }
 0x147   : > { %2832 = vmatpush1.bf16.msra.mxu1 %v4887_v58  ;;  %2806 = vmatprep.subr.bf16.mxu0 %v4894_v60  ;;  %v4967_v58 = vld [vmem:[%s6543_s1 + $0xa34] ss:$8 sps:$4 sm:$0xff]   ;;  %v4965_v60 = vld [vmem:[%s6543_s1 + $0xa30] ss:$8 sps:$4 sm:$0xff]  }
 0x148   : > { %2833 = vmatprep.subr.bf16.mxu1 %v4897_v61  ;;  %2863 = vmatprep.mubr.bf16.mxu1 %v5092_v32  ;;  %v4968_v61 = vld [vmem:[%s6543_s1 + $0xb30] ss:$8 sps:$4 sm:$0xff]  }
 0x14a   : > { %2807 = vmatpush2.bf16.msra.mxu0 %v4892_v62  ;;  %v4973_v62 = vld [vmem:[%s6543_s1 + $0xa24] ss:$8 sps:$4 sm:$0xff]  }
 0x14b   : > { %2834 = vmatpush1.bf16.msra.mxu1 %v4895_v63  ;;  %2808 = vmatprep.subr.bf16.mxu0 %v4900_v1  ;;  %v4976_v63 = vld [vmem:[%s6543_s1 + $0xb24] ss:$8 sps:$4 sm:$0xff]   ;;  %v4971_v1 = vld [vmem:[%s6543_s1 + $0xa20] ss:$8 sps:$4 sm:$0xff]  }
 0x14c   : > { %2835 = vmatprep.subr.bf16.mxu1 %v4903_v4  ;;  %v4974_v4 = vld [vmem:[%s6543_s1 + $0xb20] ss:$8 sps:$4 sm:$0xff]  }
 0x14e   : > { %2809 = vmatpush2.bf16.msra.mxu0 %v4898_v5  ;;  %v4979_v5 = vld [vmem:[%s6543_s1 + $0xa14] ss:$8 sps:$4 sm:$0xff]  }
 0x14f   : > { %2836 = vmatpush1.bf16.msra.mxu1 %v4901_v8  ;;  %2810 = vmatprep.subr.bf16.mxu0 %v4906_v9  ;;  %v4982_v8 = vld [vmem:[%s6543_s1 + $0xb14] ss:$8 sps:$4 sm:$0xff]   ;;  %v4977_v9 = vld [vmem:[%s6543_s1 + $0xa10] ss:$8 sps:$4 sm:$0xff]  }
 0x150   : > { %2837 = vmatprep.subr.bf16.mxu1 %v4909_v11  ;;  %v4980_v11 = vld [vmem:[%s6543_s1 + $0xb10] ss:$8 sps:$4 sm:$0xff]  }
 0x152   : > { %2811 = vmatpush2.bf16.msra.mxu0 %v4904_v12  ;;  %v4985_v12 = vld [vmem:[%s6543_s1 + $0xa04] ss:$8 sps:$4 sm:$0xff]  }
 0x153   : > { %2838 = vmatpush1.bf16.msra.mxu1 %v4907_v13  ;;  %2812 = vmatprep.subr.bf16.mxu0 %v4912_v16  ;;  %v4988_v13 = vld [vmem:[%s6543_s1 + $0xb04] ss:$8 sps:$4 sm:$0xff]   ;;  %v4983_v16 = vld [vmem:[%s6543_s1 + $0xa00] ss:$8 sps:$4 sm:$0xff]  }
 0x154   : > { %2839 = vmatprep.subr.bf16.mxu1 %v4915_v17  ;;  %v4986_v17 = vld [vmem:[%s6543_s1 + $0xb00] ss:$8 sps:$4 sm:$0xff]  }
 0x156   : > { %2813 = vmatpush2.bf16.msra.mxu0 %v4910_v18  ;;  %v4991_v18 = vld [vmem:[%s6543_s1 + $0xaf4] ss:$8 sps:$4 sm:$0xff]  }
 0x157   : > { %2840 = vmatpush1.bf16.msra.mxu1 %v4913_v19  ;;  %2814 = vmatprep.subr.bf16.mxu0 %v4918_v20  ;;  %v4994_v19 = vld [vmem:[%s6543_s1 + $0xbf4] ss:$8 sps:$4 sm:$0xff]   ;;  %v4989_v20 = vld [vmem:[%s6543_s1 + $0xaf0] ss:$8 sps:$4 sm:$0xff]  }
 0x158   : > { %2841 = vmatprep.subr.bf16.mxu1 %v4921_v14  ;;  %v4992_v14 = vld [vmem:[%s6543_s1 + $0xbf0] ss:$8 sps:$4 sm:$0xff]  }
 0x15a   : > { %2815 = vmatpush2.bf16.msra.mxu0 %v4916_v21  ;;  %v4997_v21 = vld [vmem:[%s6543_s1 + $0xae4] ss:$8 sps:$4 sm:$0xff]  }
 0x15b   : > { %2842 = vmatpush1.bf16.msra.mxu1 %v4919_v22  ;;  %2816 = vmatprep.subr.bf16.mxu0 %v4924_v23  ;;  %v5000_v22 = vld [vmem:[%s6543_s1 + $0xbe4] ss:$8 sps:$4 sm:$0xff]   ;;  %v4995_v23 = vld [vmem:[%s6543_s1 + $0xae0] ss:$8 sps:$4 sm:$0xff]  }
 0x15c   : > { %2843 = vmatprep.subr.bf16.mxu1 %v4927_v24  ;;  %v4998_v24 = vld [vmem:[%s6543_s1 + $0xbe0] ss:$8 sps:$4 sm:$0xff]  }
 0x15e   : > { %2817 = vmatpush2.bf16.msra.mxu0 %v4922_v26  ;;  %v5003_v26 = vld [vmem:[%s6543_s1 + $0xad4] ss:$8 sps:$4 sm:$0xff]  }
 0x15f   : > { %2844 = vmatpush1.bf16.msra.mxu1 %v4925_v54  ;;  %2818 = vmatprep.subr.bf16.mxu0 %v4930_v7  ;;  %v5006_v54 = vld [vmem:[%s6543_s1 + $0xbd4] ss:$8 sps:$4 sm:$0xff]   ;;  %v5007_v7 = vld [vmem:[%s6543_s1 + $0xac0] ss:$8 sps:$4 sm:$0xff]  }
 0x160   : > { %2845 = vmatprep.subr.bf16.mxu1 %v4933_v27  ;;  %v5010_v27 = vld [vmem:[%s6543_s1 + $0xbc0] ss:$8 sps:$4 sm:$0xff]  }
 0x162   : > { %2819 = vmatpush2.bf16.msra.mxu0 %v4928_v28  ;;  %v5015_v28 = vld [vmem:[%s6543_s1 + $0xab4] ss:$8 sps:$4 sm:$0xff]  }
 0x163   : > { %2846 = vmatpush1.bf16.msra.mxu1 %v4931_v10  ;;  %3380 = vmatprep.subr.bf16.mxu0 %v4941_v34  ;;  %v5018_v10 = vld [vmem:[%s6543_s1 + $0xbb4] ss:$8 sps:$4 sm:$0xff]   ;;  %v5019_v34 = vld [vmem:[%s6543_s1 + $0xaa0] ss:$8 sps:$4 sm:$0xff]  }
 0x164   : > { %3423 = vmatprep.subr.bf16.mxu1 %v4944_v35  ;;  %v5022_v35 = vld [vmem:[%s6543_s1 + $0xba0] ss:$8 sps:$4 sm:$0xff]  }
 0x165   : > { %2821 = vmatmul.mubr.bf16.vlgmr.msra.gmra.mxu0 %v2333_v38  ;;  %v5027_v38 = vld [vmem:[%s6543_s1 + $0xa94] ss:$8 sps:$4 sm:$0xff]  }
 0x166   : > { %2864 = vmatmul.mubr.bf16.vlgmr.msra.gmra.mxu1 %v2339_v41  ;;  %3381 = vmatpush1.bf16.msra.mxu0 %v4939_v39  ;;  %v5030_v39 = vld [vmem:[%s6543_s1 + $0xb94] ss:$8 sps:$4 sm:$0xff]   ;;  %v5028_v41 = vld [vmem:[%s6543_s1 + $0xb90] ss:$8 sps:$4 sm:$0xff]  }
 0x167   : > { %3424 = vmatpush1.bf16.msra.mxu1 %v4942_v40  ;;  %3382 = vmatprep.subr.bf16.mxu0 %v4949_v42  ;;  %v5025_v40 = vld [vmem:[%s6543_s1 + $0xa90] ss:$8 sps:$4 sm:$0xff]   ;;  %v5033_v42 = vld [vmem:[%s6543_s1 + $0xa84] ss:$8 sps:$4 sm:$0xff]  }
 0x168   : > { %3425 = vmatprep.subr.bf16.mxu1 %v4952_v43  ;;  %3412 = vmatprep.mubr.bf16.mxu0 %v4312_v45  ;;  %v5036_v43 = vld [vmem:[%s6543_s1 + $0xb84] ss:$8 sps:$4 sm:$0xff]   ;;  %v5031_v45 = vld [vmem:[%s6543_s1 + $0xa80] ss:$8 sps:$4 sm:$0xff]  }
 0x169   : > { %3455 = vmatprep.mubr.bf16.mxu1 %v4314_v47  ;;  %v5034_v47 = vld [vmem:[%s6543_s1 + $0xb80] ss:$8 sps:$4 sm:$0xff]  }
 0x16a   : > { %3383 = vmatpush1.bf16.msra.mxu0 %v4947_v48  ;;  %v5043_v48 = vld [vmem:[%s6543_s1 + $0xc74] ss:$8 sps:$4 sm:$0xff]  }
 0x16b   : > { %3426 = vmatpush1.bf16.msra.mxu1 %v4950_v49  ;;  %3384 = vmatprep.subr.bf16.mxu0 %v4955_v50  ;;  %v4311_v49 = vcombine.low %v6271_v44, %v6251_v36  ;;  %v4313_v50 = vcombine.low %v6276_v46, %v6254_v37  ;;  %v5044_v36 = vld [vmem:[%s6543_s1 + $0xc60] ss:$8 sps:$4 sm:$0xff]   ;;  %v5049_v37 = vld [vmem:[%s6543_s1 + $0xc54] ss:$8 sps:$4 sm:$0xff]   ;;  %v5047_v44 = vld [vmem:[%s6543_s1 + $0xc50] ss:$8 sps:$4 sm:$0xff]  }
 0x16c   : > { %3427 = vmatprep.subr.bf16.mxu1 %v4958_v51  ;;  %v5041_v51 = vld [vmem:[%s6543_s1 + $0xc70] ss:$8 sps:$4 sm:$0xff]   ;;  %v5052_v46 = vld [vmem:[%s6543_s1 + $0xc44] ss:$8 sps:$4 sm:$0xff]  }
 0x16e   : > { %3385 = vmatpush1.bf16.msra.mxu0 %v4953_v25  ;;  %v5046_v25 = vld [vmem:[%s6543_s1 + $0xc64] ss:$8 sps:$4 sm:$0xff]  }
 0x16f   : > { %3428 = vmatpush1.bf16.msra.mxu1 %v4956_v52  ;;  %3386 = vmatprep.subr.bf16.mxu0 %v4961_v53  ;;  %v5055_v52 = vld [vmem:[%s6543_s1 + $0xc34] ss:$8 sps:$4 sm:$0xff]   ;;  %v5053_v53 = vld [vmem:[%s6543_s1 + $0xc30] ss:$8 sps:$4 sm:$0xff]  }
 0x170   : > { %3429 = vmatprep.subr.bf16.mxu1 %v4964_v55  ;;  %v5058_v55 = vld [vmem:[%s6543_s1 + $0xc24] ss:$8 sps:$4 sm:$0xff]  }
 0x172   : > { %3387 = vmatpush1.bf16.msra.mxu0 %v4959_v56  ;;  %v5056_v56 = vld [vmem:[%s6543_s1 + $0xc20] ss:$8 sps:$4 sm:$0xff]  }
 0x173   : > { %3430 = vmatpush1.bf16.msra.mxu1 %v4962_v57  ;;  %3388 = vmatprep.subr.bf16.mxu0 %v4967_v58  ;;  %v5061_v57 = vld [vmem:[%s6543_s1 + $0xc14] ss:$8 sps:$4 sm:$0xff]   ;;  %v5059_v58 = vld [vmem:[%s6543_s1 + $0xc10] ss:$8 sps:$4 sm:$0xff]  }
 0x174   : > { %3431 = vmatprep.subr.bf16.mxu1 %v4970_v59  ;;  %v5064_v59 = vld [vmem:[%s6543_s1 + $0xc04] ss:$8 sps:$4 sm:$0xff]  }
 0x176   : > { %3389 = vmatpush1.bf16.msra.mxu0 %v4965_v60  ;;  %v5062_v60 = vld [vmem:[%s6543_s1 + $0xc00] ss:$8 sps:$4 sm:$0xff]  }
 0x177   : > { %3432 = vmatpush1.bf16.msra.mxu1 %v4968_v61  ;;  %3390 = vmatprep.subr.bf16.mxu0 %v4973_v62  ;;  %v2880_v61 = vld [vmem:[%s5334_s18 + $0x38] sm:$0xf]  ;;  %s6515_s18 = sshll.u32 %s3605_s15, 1 }
 0x178   : > { %3433 = vmatprep.subr.bf16.mxu1 %v4976_v63  ;;  %v4315_v62 = vcombine.low %v6012_v0, %v2880_v61  ;;  %v873_v63 = vpop.f32.mrf.mxu0  ;;  %p232_p8 = scmp.lt.s32.totalorder %s6515_s18, 3 }
 0x17a   : > { %3391 = vmatpush1.bf16.msra.mxu0 %v4971_v1  ;;  %v916_v1 = vpop.f32.mrf.mxu1  ;;  %s6550_s18 = smov (!%p232_p8, %s6515_s18), 3 }
 0x17b   : > { %3434 = vmatpush1.bf16.msra.mxu1 %v4974_v4  ;;  %3392 = vmatprep.subr.bf16.mxu0 %v4979_v5  ;;  %v875_v4 = vpop.f32.mrf.mxu0  ;;  %s4398_s30 = sshll.u32 %s6550_s18, 4 }
 0x17c   : > { %3435 = vmatprep.subr.bf16.mxu1 %v4982_v8  ;;  %v918_v5 = vpop.f32.mrf.mxu1  ;;  %s236_s6 = scalar_lea.vmem %s6545_s3, %s4398_s30 }
 0x17d   : > { %v877_v8 = vpop.f32.mrf.mxu0 }
 0x17e   : > { %3393 = vmatpush1.bf16.msra.mxu0 %v4977_v9  ;;  %v920_v9 = vpop.f32.mrf.mxu1 }
 0x17f   : > { %3436 = vmatpush1.bf16.msra.mxu1 %v4980_v11  ;;  %3394 = vmatprep.subr.bf16.mxu0 %v4985_v12  ;;  %v879_v11 = vpop.f32.mrf.mxu0 }
 0x180   : > { %3437 = vmatprep.subr.bf16.mxu1 %v4988_v13  ;;  %v922_v12 = vpop.f32.mrf.mxu1 }
 0x181   : > { %v959_v13 = vpop.f32.mrf.mxu0 }
 0x182   : > { %3395 = vmatpush1.bf16.msra.mxu0 %v4983_v16  ;;  %v1428_v16 = vpop.f32.mrf.mxu1 }
 0x183   : > { %3438 = vmatpush1.bf16.msra.mxu1 %v4986_v17  ;;  %3396 = vmatprep.subr.bf16.mxu0 %v4991_v18  ;;  %v961_v17 = vpop.f32.mrf.mxu0 }
 0x184   : > { %3439 = vmatprep.subr.bf16.mxu1 %v4994_v19  ;;  %v1430_v18 = vpop.f32.mrf.mxu1 }
 0x185   : > { %v963_v19 = vpop.f32.mrf.mxu0 }
 0x186   : > { %3397 = vmatpush2.bf16.msra.mxu0 %v4989_v20  ;;  %v1432_v20 = vpop.f32.mrf.mxu1 }
 0x187   : > { %3440 = vmatpush2.bf16.msra.mxu1 %v4992_v14  ;;  %3398 = vmatprep.subr.bf16.mxu0 %v4997_v21  ;;  %v965_v14 = vpop.f32.mrf.mxu0 }
 0x188   : > { %3441 = vmatprep.subr.bf16.mxu1 %v5000_v22  ;;  %v1434_v21 = vpop.f32.mrf.mxu1 }
 0x189   : > { %v1471_v22 = vpop.f32.mrf.mxu0 }
 0x18a   : > { %3399 = vmatpush2.bf16.msra.mxu0 %v4995_v23  ;;  %v1514_v0 = vpop.f32.mrf.mxu1 }
 0x18b   : > { %3442 = vmatpush2.bf16.msra.mxu1 %v4998_v24  ;;  %3400 = vmatprep.subr.bf16.mxu0 %v5003_v26  ;;  %v1473_v23 = vpop.f32.mrf.mxu0 }
 0x18c   : > { %3443 = vmatprep.subr.bf16.mxu1 %v5006_v54  ;;  %v1516_v24 = vpop.f32.mrf.mxu1 }
 0x18d   : > { %v1475_v26 = vpop.f32.mrf.mxu0 }
 0x18e   : > { %3401 = vmatpush2.bf16.msra.mxu0 %v5001_v2  ;;  %v6509_v54 = vpop.f32.mrf.mxu1 }
 0x18f   : > { %3444 = vmatpush2.bf16.msra.mxu1 %v5004_v15  ;;  %3402 = vmatprep.subr.bf16.mxu0 %v5009_v3  ;;  %v1477_v2 = vpop.f32.mrf.mxu0 }
 0x190   : > { %3445 = vmatprep.subr.bf16.mxu1 %v5012_v6  ;;  %v6511_v15 = vpop.f32.mrf.mxu1 }
 0x192   : > { %3403 = vmatpush2.bf16.msra.mxu0 %v5007_v7 }
 0x193   : > { %3446 = vmatpush2.bf16.msra.mxu1 %v5010_v27  ;;  %3404 = vmatprep.subr.bf16.mxu0 %v5015_v28 }
 0x194   : > { %3447 = vmatprep.subr.bf16.mxu1 %v5018_v10 }
 0x196   : > { %3405 = vmatpush2.bf16.msra.mxu0 %v5013_v29 }
 0x197   : > { %3448 = vmatpush2.bf16.msra.mxu1 %v5016_v30  ;;  %3406 = vmatprep.subr.bf16.mxu0 %v5021_v31 }
 0x198   : > { %3449 = vmatprep.subr.bf16.mxu1 %v5024_v33 }
 0x19a   : > { %3407 = vmatpush2.bf16.msra.mxu0 %v5019_v34 }
 0x19b   : > { %3450 = vmatpush2.bf16.msra.mxu1 %v5022_v35  ;;  %3408 = vmatprep.subr.bf16.mxu0 %v5027_v38 }
 0x19c   : > { %3451 = vmatprep.subr.bf16.mxu1 %v5030_v39 }
 0x19e   : > { %3409 = vmatpush2.bf16.msra.mxu0 %v5025_v40 }
 0x19f   : > { %3452 = vmatpush2.bf16.msra.mxu1 %v5028_v41  ;;  %3410 = vmatprep.subr.bf16.mxu0 %v5033_v42 }
 0x1a0   : > { %3453 = vmatprep.subr.bf16.mxu1 %v5036_v43 }
 0x1a2   : > { %3411 = vmatpush2.bf16.msra.mxu0 %v5031_v45 }
 0x1a3   : > { %3454 = vmatpush2.bf16.msra.mxu1 %v5034_v47  ;;  %3466 = vmatprep.subr.bf16.mxu0 %v5043_v48 }
 0x1a5   : > { %3413 = vmatmul.mubr.bf16.vlgmr.msra.gmra.mxu0 %v4311_v49 }
 0x1a6   : > { %3456 = vmatmul.mubr.bf16.vlgmr.msra.gmra.mxu1 %v4313_v50  ;;  %3467 = vmatpush1.bf16.msra.mxu0 %v5041_v51  ;;  %v917_v51 = vadd.f32 %v916_v1, %v873_v63 }
 0x1a7   : > { %3498 = vmatprep.mubr.bf16.mxu0 %v5092_v32  ;;  %3468 = vmatprep.subr.bf16.mxu0 %v5046_v25  ;;  %v5050_v32 = vld [vmem:[%s6543_s1 + $0xc40] ss:$8 sps:$4 sm:$0xff]  }
 0x1aa   : > { %3469 = vmatpush1.bf16.msra.mxu0 %v5044_v36  ;;  %v919_v36 = vadd.f32 %v918_v5, %v875_v4 }
 0x1ab   : > { %3470 = vmatprep.subr.bf16.mxu0 %v5049_v37  ;;  %v960_v37 = vadd.f32 %v959_v13, %v917_v51 }
 0x1ae   : > { %3471 = vmatpush1.bf16.msra.mxu0 %v5047_v44 }
 0x1af   : > { %3472 = vmatprep.subr.bf16.mxu0 %v5052_v46  ;;  %v962_v46 = vadd.f32 %v961_v17, %v919_v36 }
 0x1b2   : > { %3473 = vmatpush1.bf16.msra.mxu0 %v5050_v32  ;;  %v1429_v32 = vadd.f32 %v1428_v16, %v960_v37 }
 0x1b3   : > { %3474 = vmatprep.subr.bf16.mxu0 %v5055_v52  ;;  %v3515_v52 = vlaneseq }
 0x1b5   : > { %v3516_v4 = vshrl.u32 %v3515_v52, 7 }
 0x1b6   : > { %3475 = vmatpush1.bf16.msra.mxu0 %v5053_v53  ;;  %v921_v53 = vadd.f32 %v920_v9, %v877_v8 }
 0x1b7   : > { %3476 = vmatprep.subr.bf16.mxu0 %v5058_v55  ;;  %v923_v55 = vadd.f32 %v922_v12, %v879_v11 }
 0x1b9   : > { %v966_v61 = vadd.f32 %v965_v14, %v923_v55 }
 0x1ba   : > { %3477 = vmatpush1.bf16.msra.mxu0 %v5056_v56 }
 0x1bb   : > { %3478 = vmatprep.subr.bf16.mxu0 %v5061_v57  ;;  %v1435_v8 = vadd.f32 %v1434_v21, %v966_v61  ;;  %v3513_v21 = vld [vmem:[%s6544_s2] sm:$0x3] }
 0x1be   : > { %3479 = vmatpush1.bf16.msra.mxu0 %v5059_v58  ;;  %v1431_v58 = vadd.f32 %v1430_v18, %v962_v46 }
 0x1bf   : > { %3480 = vmatprep.subr.bf16.mxu0 %v5064_v59  ;;  %v1472_v59 = vadd.f32 %v1471_v22, %v1429_v32 }
 0x1c1   : > { %v1515_v9 = vadd.f32 %v1514_v0, %v1472_v59  ;;  %v3521_v0 = vsub.s32 1, %v3516_v4 }
 0x1c2   : > { %3481 = vmatpush1.bf16.msra.mxu0 %v5062_v60  ;;  %v964_v60 = vadd.f32 %v963_v19, %v921_v53 }
 0x1c4   : > { %v1433_v5 = vadd.f32 %v1432_v20, %v964_v60 }
 0x1c5   : > { %3499 = vmatmul.mubr.bf16.vlgmr.msra.gmra.mxu0 %v4315_v62  ;;  %v2102_v3 = vpop.f32.mrf.mxu0  ;;  %v1474_v62 = vadd.f32 %v1473_v23, %v1431_v58  ;;  %v1478_v23 = vadd.f32 %v1477_v2, %v1435_v8 }
 0x1c6   : > { %v2145_v6 = vpop.f32.mrf.mxu1  ;;  %v1476_v18 = vadd.f32 %v1475_v26, %v1433_v5 }
 0x1c7   : > { %v2104_v7 = vpop.f32.mrf.mxu0  ;;  %v2146_v63 = vadd.f32 %v2145_v6, %v2102_v3  ;;  %v1517_v51 = vadd.f32 %v1516_v24, %v1474_v62  ;;  %v3517_v6 = vsub.s32 0, %v3516_v4 }
 0x1c8   : > { %v2147_v27 = vpop.f32.mrf.mxu1  ;;  %v1519_v24 = vadd.f32 %v6509_v54, %v1476_v18 }
 0x1c9   : > { %v2106_v28 = vpop.f32.mrf.mxu0  ;;  %v2148_v13 = vadd.f32 %v2147_v27, %v2104_v7 }
 0x1ca   : > { %v2149_v10 = vpop.f32.mrf.mxu1 }
 0x1cb   : > { %v2108_v29 = vpop.f32.mrf.mxu0  ;;  %v2150_v19 = vadd.f32 %v2149_v10, %v2106_v28 }
 0x1cc   : > { %v2151_v30 = vpop.f32.mrf.mxu1 }
 0x1e5   : > { %v2188_v31 = vpop.f32.mrf.mxu0 }
 0x1e6   : > { %v2189_v11 = vadd.f32 %v2188_v31, %v2146_v63 }
 0x1e7   : > { %v2190_v34 = vpop.f32.mrf.mxu0 }
 0x1e8   : > { %v2191_v14 = vadd.f32 %v2190_v34, %v2148_v13  ;;  %v2197_v26 = vadd.f32 %v2189_v11, %v1515_v9 }
 0x1e9   : > { %v2192_v38 = vpop.f32.mrf.mxu0 }
 0x1ea   : > { %v2193_v20 = vadd.f32 %v2192_v38, %v2150_v19  ;;  %v2198_v2 = vadd.f32 %v2191_v14, %v1517_v51 }
 0x1eb   : > { %v2194_v40 = vpop.f32.mrf.mxu0 }
 0x206   : > { %v2779_v33 = vpop.f32.mrf.mxu1 }
 0x208   : > { %v2781_v35 = vpop.f32.mrf.mxu1 }
 0x20a   : > { %v2783_v39 = vpop.f32.mrf.mxu1 }
 0x20c   : > { %v2785_v41 = vpop.f32.mrf.mxu1 }
 0x225   : > { %v2822_v42 = vpop.f32.mrf.mxu0 }
 0x226   : > { %v2865_v45 = vpop.f32.mrf.mxu1  ;;  %v2823_v1 = vadd.f32 %v2822_v42, %v2779_v33  ;;  %v2152_v33 = vadd.f32 %v2151_v30, %v2108_v29 }
 0x227   : > { %v2824_v43 = vpop.f32.mrf.mxu0 }
 0x228   : > { %v2867_v48 = vpop.f32.mrf.mxu1  ;;  %v2825_v12 = vadd.f32 %v2824_v43, %v2781_v35  ;;  %v2866_v3 = vadd.f32 %v2865_v45, %v2823_v1  ;;  %v2195_v29 = vadd.f32 %v2194_v40, %v2152_v33  ;;  %v2199_v43 = vadd.f32 %v2193_v20, %v1519_v24 }
 0x229   : > { %v2826_v47 = vpop.f32.mrf.mxu0 }
 0x22a   : > { %v2869_v50 = vpop.f32.mrf.mxu1  ;;  %v2827_v22 = vadd.f32 %v2826_v47, %v2783_v39  ;;  %v2868_v28 = vadd.f32 %v2867_v48, %v2825_v12  ;;  %v2874_v34 = vadd.f32 %v2866_v3, %v2197_v26  ;;  %v3518_v39 = vrot.slane %v3513_v21, %v3517_v6 }
 0x22b   : > { %v2828_v49 = vpop.f32.mrf.mxu0 }
 0x22c   : > { %v2871_v44 = vpop.f32.mrf.mxu1  ;;  %v2829_v7 = vadd.f32 %v2828_v49, %v2785_v41  ;;  %v2870_v30 = vadd.f32 %v2869_v50, %v2827_v22  ;;  %v1521_v41 = vadd.f32 %v6511_v15, %v1478_v23  ;;  %v3522_v49 = vrot.slane %v3513_v21, %v3521_v0 }
 0x22e   : > { %v2872_v45 = vadd.f32 %v2871_v44, %v2829_v7  ;;  %v2200_v46 = vadd.f32 %v2195_v29, %v1521_v41  ;;  %v2876_v40 = vadd.f32 %v2870_v30, %v2199_v43 }
 0x265   : > { %v3414_v25 = vpop.f32.mrf.mxu0 }
 0x266   : > { %v3457_v56 = vpop.f32.mrf.mxu1 }
 0x267   : > { %v3416_v57 = vpop.f32.mrf.mxu0  ;;  %v3458_v10 = vadd.f32 %v3457_v56, %v3414_v25  ;;  %v2875_v25 = vadd.f32 %v2868_v28, %v2198_v2  ;;  %v2877_v56 = vadd.f32 %v2872_v45, %v2200_v46 }
 0x268   : > { %v3459_v16 = vpop.f32.mrf.mxu1 }
 0x269   : > { %v3418_v17 = vpop.f32.mrf.mxu0  ;;  %v3460_v35 = vadd.f32 %v3459_v16, %v3416_v57 }
 0x26a   : > { %v3461_v27 = vpop.f32.mrf.mxu1 }
 0x26b   : > { %v3420_v42 = vpop.f32.mrf.mxu0  ;;  %v3462_v36 = vadd.f32 %v3461_v27, %v3418_v17 }
 0x26c   : > { %v3463_v47 = vpop.f32.mrf.mxu1 }
 0x26d   : > { %v3464_v32 = vadd.f32 %v3463_v47, %v3420_v42 }
 0x285   : > { %v3500_v31 = vpop.f32.mrf.mxu0 }
 0x286   : > { %v3501_v38 = vadd.f32 %v3500_v31, %v3458_v10 }
 0x287   : > { %v3502_v48 = vpop.f32.mrf.mxu0 }
 0x288   : > { %v3509_v54 = vadd.f32 %v3501_v38, %v2874_v34  ;;  %v3503_v37 = vadd.f32 %v3502_v48, %v3460_v35 }
 0x289   : > { %v3504_v50 = vpop.f32.mrf.mxu0 }
 0x28a   : > { %v3525_v52 = vadd.f32 %v3518_v39, %v3509_v54  ;;  %v3510_v53 = vadd.f32 %v3503_v37, %v2875_v25  ;;  %v3505_v55 = vadd.f32 %v3504_v50, %v3462_v36 }
 0x28b   : > { %v3506_v15 = vpop.f32.mrf.mxu0 }
 0x28c   : > { %v3529_v44 = vmax.f32 %v3525_v52, 0.0  ;;  %v3526_v57 = vadd.f32 %v3522_v49, %v3510_v53  ;;  %v3511_v58 = vadd.f32 %v3505_v55, %v2876_v40  ;;  %v3507_v59 = vadd.f32 %v3506_v15, %v3464_v32 }
 0x28e   : > { %3533 = vst [vmem:[%s236_s6] sm:$0xff] %v3529_v44  ;;  %v3530_v60 = vmax.f32 %v3526_v57, 0.0  ;;  %v3527_v61 = vadd.f32 %v3518_v39, %v3511_v58  ;;  %v3512_v62 = vadd.f32 %v3507_v59, %v2877_v56 }
 0x290   : > { %3534 = vst [vmem:[%s236_s6 + $0x8] sm:$0xff] %v3530_v60  ;;  %v3531_v63 = vmax.f32 %v3527_v61, 0.0  ;;  %v3528_v1 = vadd.f32 %v3522_v49, %v3512_v62 }
 0x292   : > { %3535 = vst [vmem:[%s236_s6 + $0x10] sm:$0xff] %v3531_v63  ;;  %v3532_v4 = vmax.f32 %v3528_v1, 0.0 }
 0x294   : > { %3536 = vst [vmem:[%s236_s6 + $0x18] sm:$0xff] %v3532_v4 }
 0x295 PF: > { %p10_p9 = scmp.ge.s32.totalorder %s5130_s16, 4   ;;  %s6546_s12 = smov %s5086_s13 }
 0x296   : > { %s6547_s13 = smov %s5139_s19  ;;  %s6548_s14 = smov %s5130_s16 }
 0x297   :  { %12 = sbr.rel (!%p10_p9) target bundleno = 2 (0x2), region = 104 }

</bundles_post_ra>
